<compile_context>
chip_gen: v7x
topology: tpu7x:2x2x1
jax: 0.10.0
libtpu: 0.0.40
codegen_flags: <defaults>
</compile_context>

<pallas_src>
import math

import jax
import jax.numpy as jnp
import numpy as np
from jax.experimental import pallas as pl
from jax.experimental.pallas import tpu as pltpu

FEATURE_DIM = 32          # feature_dim
VOCAB = 16                # diacritic_vocab_size
HIDDEN = FEATURE_DIM // 2
LN_EPS = 1e-5
ROWPACK = 8               # original rows packed into the lane axis


# ----------------------------------------------------------------------------
# Pallas kernel: 8-row-packed fused 4-head MLP + softmax gate + output fusion.
# Packed-lane layout (per packed row g, sub-row r = 0..7, heads [pos|r0|r1|r2]):
#   x      lanes [32r + d]                      h/hn/a lanes [64r + c]
#   s_r    lanes [48r + i*V + j]  (region i)    p      lanes [3r + i]
#   out    lanes [16r + j]
# ----------------------------------------------------------------------------
def _vda_kernel(x_ref, w1_ref, seg_ref, w2r_ref, w2p_ref, sum3_ref, rep_ref,
                fw_ref, vec_ref, o_ref):
    RV = fw_ref.shape[-1]          # R*V  = 128
    RC = w2r_ref.shape[-1]         # R*3V = 384
    RP = w2p_ref.shape[-1]         # R*3  = 24

    x = x_ref[...]                                   # (TP, R*D)  f32
    vec = vec_ref[...]                               # (6, R*4H)  packed vectors
    b1, gamma, beta = vec[0:1], vec[1:2], vec[2:3]   # (1, R*4H) each
    b2r = vec[3:4, :RC]                              # (1, R*3V)
    b2p = vec[4:5, :RP]                              # (1, R*3)
    fb = vec[5:6, :RV]                               # (1, R*V)

    # --- fused first Linear of all 4 heads x 8 packed rows: one dense matmul
    h = jnp.dot(x, w1_ref[...], preferred_element_type=jnp.float32) + b1

    # --- per-head LayerNorm via block-averaging matmuls (lane-aligned, no
    #     cross-lane reshape/reduce).  seg is block-diag with 1/H entries.
    seg = seg_ref[...]
    mu = jnp.dot(h, seg, preferred_element_type=jnp.float32)
    c = h - mu
    var = jnp.dot(c * c, seg, preferred_element_type=jnp.float32)
    hn = c * jax.lax.rsqrt(var + LN_EPS) * gamma + beta

    # tanh-GELU -> EUP (free slot); Dropout = identity in eval mode.
    a = jax.nn.gelu(hn, approximate=True)

    # --- region logits, packed (lane-dense 384 lanes)
    s_r = jnp.dot(a, w2r_ref[...], preferred_element_type=jnp.float32) + b2r

    # --- position logits, packed (24 lanes) + 3-way softmax per original row.
    #     Subtracting the per-*packed*-row max is softmax-invariant (the same
    #     constant is subtracted from all 3 logits of any original row).
    p = jnp.dot(a, w2p_ref[...], preferred_element_type=jnp.float32) + b2p
    m = jnp.max(p, axis=-1, keepdims=True)
    e = jnp.exp(p - m)
    l = jnp.dot(e, sum3_ref[...], preferred_element_type=jnp.float32)  # 3-sum, replicated
    pos_w = e * pl.reciprocal(l, approx=True)                          # (TP, R*3)

    # --- broadcast position weights over region lanes (tiny matmul), then one
    #     fused output-fusion matmul -> exactly 128-lane-dense output.
    rep = jnp.dot(pos_w, rep_ref[...], preferred_element_type=jnp.float32)     # (TP, R*3V)
    out = jnp.dot(s_r * rep, fw_ref[...], preferred_element_type=jnp.float32) + fb
    o_ref[...] = out                                                            # (TP, R*V)


# ----------------------------------------------------------------------------
# Host-side parameter packing: 15 tensors -> 8 grid-invariant, block-diagonal,
# 8-way-replicated slabs.  Head order inside each 64-lane block: [pos|r0|r1|r2].
# ----------------------------------------------------------------------------
def pack_params(p, R=ROWPACK):
    D, H = p["pw1"].shape
    V = p["rw2"].shape[-1]
    Hh = 4 * H

    # per-original-row building blocks -----------------------------------
    w1_row = jnp.concatenate(
        [p["pw1"], p["rw1"][0], p["rw1"][1], p["rw1"][2]], axis=1)     # (D, 4H)
    b1_row = jnp.concatenate(
        [p["pb1"], p["rb1"][0], p["rb1"][1], p["rb1"][2]], axis=1)     # (1, 4H)
    g_row = jnp.concatenate(
        [p["pg"], p["rg"][0], p["rg"][1], p["rg"][2]], axis=1)
    be_row = jnp.concatenate(
        [p["pbe"], p["rbe"][0], p["rbe"][1], p["rbe"][2]], axis=1)

    seg_row = jnp.kron(jnp.eye(4, dtype=jnp.float32),
                       jnp.full((H, H), 1.0 / H, jnp.float32))         # (4H, 4H)

    w2r_row = jnp.zeros((Hh, 3 * V), jnp.float32)                      # region heads
    for i in range(3):
        w2r_row = w2r_row.at[(i + 1) * H:(i + 2) * H,
                             i * V:(i + 1) * V].set(p["rw2"][i])
    b2r_row = jnp.concatenate([p["rb2"][0], p["rb2"][1], p["rb2"][2]], axis=1)

    w2p_row = jnp.zeros((Hh, 3), jnp.float32)                          # pos head
    w2p_row = w2p_row.at[0:H, :].set(p["pw2"])
    b2p_row = p["pb2"]                                                  # (1, 3)

    sum3_row = jnp.ones((3, 3), jnp.float32)                            # 3-way sum
    rep_row = jnp.kron(jnp.eye(3, dtype=jnp.float32),
                       jnp.ones((1, V), jnp.float32))                   # (3, 3V)
    fw_row = p["fw"]                                                     # (3V, V)

    # 8-way block-diagonal replication ------------------------------------
    def blockdiag(m):
        return jnp.kron(jnp.eye(R, dtype=jnp.float32), m).astype(jnp.float32)

    def tile_vec(v):
        return jnp.tile(v, (1, R))

    W1 = blockdiag(w1_row)        # (R*D,  R*4H) = (256, 512)
    SEG = blockdiag(seg_row)      # (R*4H, R*4H) = (512, 512)
    W2R = blockdiag(w2r_row)      # (R*4H, R*3V) = (512, 384)
    W2P = blockdiag(w2p_row)      # (R*4H, R*3 ) = (512, 24)
    SUM3 = blockdiag(sum3_row)    # (R*3,  R*3 ) = (24, 24)
    REP = blockdiag(rep_row)      # (R*3,  R*3V) = (24, 384)
    FW = blockdiag(fw_row)        # (R*3V, R*V ) = (384, 128)

    W = R * Hh

    def pad_lanes(v):
        return jnp.pad(v, ((0, 0), (0, W - v.shape[1])))

    vec = jnp.concatenate(
        [tile_vec(b1_row), tile_vec(g_row), tile_vec(be_row),
         pad_lanes(tile_vec(b2r_row)),
         pad_lanes(tile_vec(b2p_row)),
         pad_lanes(tile_vec(p["fb"]))], axis=0).astype(jnp.float32)     # (6, 512)

    return {"w1": W1, "seg": SEG, "w2r": W2R, "w2p": W2P, "sum3": SUM3,
            "rep": REP, "fw": FW, "vec": vec}


# ----------------------------------------------------------------------------
# Wrapper
# ----------------------------------------------------------------------------
def visual_diacritic_attention(features, packed, *, tm=2048):
    """features: (B, S, D) float32 -> (B, S, V) float32."""
    R = ROWPACK
    B, S, D = features.shape
    assert packed["w1"].shape[0] == R * D
    V = packed["fw"].shape[-1] // R
    M = B * S
    x = features.reshape(M, D).astype(jnp.float32)

    # Packed-row tiling: tile size in packed rows (each = 8 original rows),
    # multiple of 8 sublanes, capped at the (rounded-up) problem size.
    M8 = pl.cdiv(M, R)
    tp = min(max(tm // R, 8), pl.cdiv(M8, 8) * 8)
    tp = max(8, (tp // 8) * 8)
    # v7x megacore: if a single step would cover everything but the problem is
    # big enough to split, halve the tile so grid_m >= 2 and both TCs get work.
    if pl.cdiv(M8, tp) < 2 and M8 > 8:
        tp = max(8, ((pl.cdiv(M8, 2) + 7) // 8) * 8)
    grid_m = pl.cdiv(M8, tp)
    M8_pad = grid_m * tp
    M_pad = M8_pad * R

    if M_pad != M:
        x = jnp.pad(x, ((0, M_pad - M), (0, 0)))
    xp = x.reshape(M8_pad, R * D)            # free row-major reinterpretation

    # Grid-invariant weight slabs (constant index_map -> DMA'd once).
    # NOTE: pl.Buffered(1) could drop their second buffer; skipped (minor).
    full = lambda a: pl.BlockSpec(a.shape, lambda i, _nd=a.ndim: (0,) * _nd)

    out = pl.pallas_call(
        _vda_kernel,
        out_shape=jax.ShapeDtypeStruct((M8_pad, R * V), jnp.float32),
        grid_spec=pltpu.PrefetchScalarGridSpec(
            num_scalar_prefetch=0,
            grid=(grid_m,),
            in_specs=[
                pl.BlockSpec((tp, R * D), lambda i: (i, 0)),   # packed features
                full(packed["w1"]), full(packed["seg"]),
                full(packed["w2r"]), full(packed["w2p"]),
                full(packed["sum3"]), full(packed["rep"]),
                full(packed["fw"]), full(packed["vec"]),
            ],
            out_specs=pl.BlockSpec((tp, R * V), lambda i: (i, 0)),
        ),
        compiler_params=pltpu.CompilerParams(
            dimension_semantics=("parallel",)),
    )(xp, packed["w1"], packed["seg"], packed["w2r"], packed["w2p"],
      packed["sum3"], packed["rep"], packed["fw"], packed["vec"])

    return out.reshape(M_pad, V)[:M].reshape(B, S, V)


# ----------------------------------------------------------------------------
# Deterministic parameter init (xavier_uniform weights, zero biases,
# LayerNorm gamma=1 / beta=0 — matching the module's _init_weights).
# Weights stored as (in_features, out_features) = transpose of nn.Linear.
# ----------------------------------------------------------------------------
def init_params(key, D, V):
    H = D // 2

    def xavier(k, fan_in, fan_out):
        bound = math.sqrt(6.0 / (fan_in + fan_out))
        return jax.random.uniform(k, (fan_in, fan_out), jnp.float32,
                                  -bound, bound)

    ks = jax.random.split(key, 9)
    return {
        # position encoder
        "pw1": xavier(ks[0], D, H),
        "pb1": jnp.zeros((1, H), jnp.float32),
        "pg":  jnp.ones((1, H), jnp.float32),
        "pbe": jnp.zeros((1, H), jnp.float32),
        "pw2": xavier(ks[1], H, 3),
        "pb2": jnp.zeros((1, 3), jnp.float32),
        # 3 region classifiers (stacked on leading axis)
        "rw1": jnp.stack([xavier(ks[2 + j], D, H) for j in range(3)]),
        "rb1": jnp.zeros((3, 1, H), jnp.float32),
        "rg":  jnp.ones((3, 1, H), jnp.float32),
        "rbe": jnp.zeros((3, 1, H), jnp.float32),
        "rw2": jnp.stack([xavier(ks[5 + j], H, V) for j in range(3)]),
        "rb2": jnp.zeros((3, 1, V), jnp.float32),
        # output fusion
        "fw": xavier(ks[8], 3 * V, V),
        "fb": jnp.zeros((1, V), jnp.float32),
    }


# ----------------------------------------------------------------------------
# Pure-JAX reference (mirrors the PyTorch forward, eval mode, exact erf-GELU).
# ----------------------------------------------------------------------------
def ref_forward(features, p):
    def mlp(x, w1, b1, g, be, w2, b2):
        h = x @ w1 + b1
        mu = h.mean(-1, keepdims=True)
        var = ((h - mu) ** 2).mean(-1, keepdims=True)
        hn = (h - mu) / jnp.sqrt(var + LN_EPS) * g + be
        return jax.nn.gelu(hn, approximate=False) @ w2 + b2

    pos = jax.nn.softmax(
        mlp(features, p["pw1"], p["pb1"][0], p["pg"][0], p["pbe"][0],
            p["pw2"], p["pb2"][0]), axis=-1)
    outs = []
    for i in range(3):
        r = mlp(features, p["rw1"][i], p["rb1"][i, 0], p["rg"][i, 0],
                p["rbe"][i, 0], p["rw2"][i], p["rb2"][i, 0])
        outs.append(pos[..., i:i + 1] * r)
    concat = jnp.concatenate(outs, axis=-1)
    return concat @ p["fw"] + p["fb"][0]


if __name__ == "__main__":
    key = jax.random.PRNGKey(0)
    k_param, k_x1, k_x2 = jax.random.split(key, 3)

    params = init_params(k_param, FEATURE_DIM, VOCAB)
    packed = pack_params(params)

    # Tolerance relaxed vs. the exact reference because the kernel uses
    # tanh-GELU and an approximate (EUP) softmax reciprocal (perf feedback).
    RTOL = ATOL = 2e-2

    # --- small canonical shape (single tile)
    B, S = 2, 8
    features = jax.random.normal(k_x1, (B, S, FEATURE_DIM), jnp.float32)
    out = jax.block_until_ready(visual_diacritic_attention(features, packed))
    ref = ref_forward(features, params)
    np.testing.assert_allclose(np.asarray(out), np.asarray(ref),
                               rtol=RTOL, atol=ATOL)
    assert out.shape == (B, S, VOCAB)

    # --- non-multiple-of-8 row count: exercises tail padding, the row-packed
    #     reshapes, and the grid_m >= 2 split (multi-step pipelined grid).
    B2, S2 = 3, 50                      # M = 150 rows
    features2 = jax.random.normal(k_x2, (B2, S2, FEATURE_DIM), jnp.float32)
    out2 = jax.block_until_ready(visual_diacritic_attention(features2, packed))
    ref2 = ref_forward(features2, params)
    np.testing.assert_allclose(np.asarray(out2), np.asarray(ref2),
                               rtol=RTOL, atol=ATOL)
    assert out2.shape == (B2, S2, VOCAB)

    print("KERNEL_OK")
</pallas_src>

<mosaic_0001>
module attributes {stable_mosaic.version = 11 : i64} {
  func.func @_vda_kernel(%arg0: i32, %arg1: memref<8x256xf32, #tpu.memory_space<vmem>>, %arg2: memref<256x512xf32, #tpu.memory_space<vmem>>, %arg3: memref<512x512xf32, #tpu.memory_space<vmem>>, %arg4: memref<512x384xf32, #tpu.memory_space<vmem>>, %arg5: memref<512x24xf32, #tpu.memory_space<vmem>>, %arg6: memref<24x24xf32, #tpu.memory_space<vmem>>, %arg7: memref<24x384xf32, #tpu.memory_space<vmem>>, %arg8: memref<384x128xf32, #tpu.memory_space<vmem>>, %arg9: memref<6x512xf32, #tpu.memory_space<vmem>>, %arg10: memref<8x128xf32, #tpu.memory_space<vmem>>) attributes {dimension_semantics = [#tpu.dimension_semantics<parallel>], iteration_bounds = array<i64: 1>, scalar_prefetch = 0 : i64, scratch_operands = 0 : i64, tpu.core_type = #tpu.core_type<tc>, window_params = [{transform_indices = @transform_0, window_bounds = array<i64: 8, 256>}, {pipeline_mode = #tpu.pipeline_mode<synchronous>, transform_indices = @transform_1, window_bounds = array<i64: 256, 512>}, {pipeline_mode = #tpu.pipeline_mode<synchronous>, transform_indices = @transform_2, window_bounds = array<i64: 512, 512>}, {pipeline_mode = #tpu.pipeline_mode<synchronous>, transform_indices = @transform_3, window_bounds = array<i64: 512, 384>}, {pipeline_mode = #tpu.pipeline_mode<synchronous>, transform_indices = @transform_4, window_bounds = array<i64: 512, 24>}, {pipeline_mode = #tpu.pipeline_mode<synchronous>, transform_indices = @transform_5, window_bounds = array<i64: 24, 24>}, {pipeline_mode = #tpu.pipeline_mode<synchronous>, transform_indices = @transform_6, window_bounds = array<i64: 24, 384>}, {pipeline_mode = #tpu.pipeline_mode<synchronous>, transform_indices = @transform_7, window_bounds = array<i64: 384, 128>}, {pipeline_mode = #tpu.pipeline_mode<synchronous>, transform_indices = @transform_8, window_bounds = array<i64: 6, 512>}, {transform_indices = @transform_9, window_bounds = array<i64: 8, 128>}]} {
    %c0 = arith.constant 0 : index
    %c0_0 = arith.constant 0 : index
    %0 = vector.load %arg1[%c0, %c0_0] : memref<8x256xf32, #tpu.memory_space<vmem>>, vector<8x256xf32>
    %c0_1 = arith.constant 0 : index
    %c0_2 = arith.constant 0 : index
    %1 = vector.load %arg9[%c0_1, %c0_2] : memref<6x512xf32, #tpu.memory_space<vmem>>, vector<6x512xf32>
    %2 = vector.extract_strided_slice %1 {offsets = [0, 0], sizes = [1, 512], strides = [1, 1]} : vector<6x512xf32> to vector<1x512xf32>
    %3 = vector.extract_strided_slice %1 {offsets = [1, 0], sizes = [1, 512], strides = [1, 1]} : vector<6x512xf32> to vector<1x512xf32>
    %4 = vector.extract_strided_slice %1 {offsets = [2, 0], sizes = [1, 512], strides = [1, 1]} : vector<6x512xf32> to vector<1x512xf32>
    %5 = vector.extract_strided_slice %1 {offsets = [3, 0], sizes = [1, 384], strides = [1, 1]} : vector<6x512xf32> to vector<1x384xf32>
    %6 = vector.extract_strided_slice %1 {offsets = [4, 0], sizes = [1, 24], strides = [1, 1]} : vector<6x512xf32> to vector<1x24xf32>
    %7 = vector.extract_strided_slice %1 {offsets = [5, 0], sizes = [1, 128], strides = [1, 1]} : vector<6x512xf32> to vector<1x128xf32>
    %c0_3 = arith.constant 0 : index
    %c0_4 = arith.constant 0 : index
    %8 = vector.load %arg2[%c0_3, %c0_4] : memref<256x512xf32, #tpu.memory_space<vmem>>, vector<256x512xf32>
    %cst = arith.constant dense<0.000000e+00> : vector<8x512xf32>
    %9 = tpu.matmul %0, %8, %cst {dimension_numbers = #tpu.dot_dimension_numbers<[1], [0], [0], [1], [0, 0, 1, 1], [], []>} : vector<8x256xf32>, vector<256x512xf32>, vector<8x512xf32> -> vector<8x512xf32>
    %10 = vector.broadcast %2 : vector<1x512xf32> to vector<8x512xf32>
    %11 = arith.addf %9, %10 : vector<8x512xf32>
    %c0_5 = arith.constant 0 : index
    %c0_6 = arith.constant 0 : index
    %12 = vector.load %arg3[%c0_5, %c0_6] : memref<512x512xf32, #tpu.memory_space<vmem>>, vector<512x512xf32>
    %cst_7 = arith.constant dense<0.000000e+00> : vector<8x512xf32>
    %13 = tpu.matmul %11, %12, %cst_7 {dimension_numbers = #tpu.dot_dimension_numbers<[1], [0], [0], [1], [0, 0, 1, 1], [], []>} : vector<8x512xf32>, vector<512x512xf32>, vector<8x512xf32> -> vector<8x512xf32>
    %14 = arith.subf %11, %13 : vector<8x512xf32>
    %15 = arith.mulf %14, %14 : vector<8x512xf32>
    %cst_8 = arith.constant dense<0.000000e+00> : vector<8x512xf32>
    %16 = tpu.matmul %15, %12, %cst_8 {dimension_numbers = #tpu.dot_dimension_numbers<[1], [0], [0], [1], [0, 0, 1, 1], [], []>} : vector<8x512xf32>, vector<512x512xf32>, vector<8x512xf32> -> vector<8x512xf32>
    %cst_9 = arith.constant 9.99999974E-6 : f32
    %17 = vector.broadcast %cst_9 : f32 to vector<8x512xf32>
    %18 = arith.addf %16, %17 : vector<8x512xf32>
    %19 = math.rsqrt %18 : vector<8x512xf32>
    %20 = arith.mulf %14, %19 : vector<8x512xf32>
    %21 = vector.broadcast %3 : vector<1x512xf32> to vector<8x512xf32>
    %22 = arith.mulf %20, %21 : vector<8x512xf32>
    %23 = vector.broadcast %4 : vector<1x512xf32> to vector<8x512xf32>
    %24 = arith.addf %22, %23 : vector<8x512xf32>
    %25 = arith.mulf %24, %24 : vector<8x512xf32>
    %26 = arith.mulf %24, %25 : vector<8x512xf32>
    %cst_10 = arith.constant 4.471500e-02 : f32
    %27 = vector.broadcast %cst_10 : f32 to vector<8x512xf32>
    %28 = arith.mulf %27, %26 : vector<8x512xf32>
    %29 = arith.addf %24, %28 : vector<8x512xf32>
    %cst_11 = arith.constant 0.797884583 : f32
    %30 = vector.broadcast %cst_11 : f32 to vector<8x512xf32>
    %31 = arith.mulf %30, %29 : vector<8x512xf32>
    %32 = math.tanh %31 : vector<8x512xf32>
    %cst_12 = arith.constant 1.000000e+00 : f32
    %33 = vector.broadcast %cst_12 : f32 to vector<8x512xf32>
    %34 = arith.addf %33, %32 : vector<8x512xf32>
    %cst_13 = arith.constant 5.000000e-01 : f32
    %35 = vector.broadcast %cst_13 : f32 to vector<8x512xf32>
    %36 = arith.mulf %35, %34 : vector<8x512xf32>
    %37 = arith.mulf %24, %36 : vector<8x512xf32>
    %c0_14 = arith.constant 0 : index
    %c0_15 = arith.constant 0 : index
    %38 = vector.load %arg4[%c0_14, %c0_15] : memref<512x384xf32, #tpu.memory_space<vmem>>, vector<512x384xf32>
    %cst_16 = arith.constant dense<0.000000e+00> : vector<8x384xf32>
    %39 = tpu.matmul %37, %38, %cst_16 {dimension_numbers = #tpu.dot_dimension_numbers<[1], [0], [0], [1], [0, 0, 1, 1], [], []>} : vector<8x512xf32>, vector<512x384xf32>, vector<8x384xf32> -> vector<8x384xf32>
    %40 = vector.broadcast %5 : vector<1x384xf32> to vector<8x384xf32>
    %41 = arith.addf %39, %40 : vector<8x384xf32>
    %c0_17 = arith.constant 0 : index
    %c0_18 = arith.constant 0 : index
    %42 = vector.load %arg5[%c0_17, %c0_18] : memref<512x24xf32, #tpu.memory_space<vmem>>, vector<512x24xf32>
    %cst_19 = arith.constant dense<0.000000e+00> : vector<8x24xf32>
    %43 = tpu.matmul %37, %42, %cst_19 {dimension_numbers = #tpu.dot_dimension_numbers<[1], [0], [0], [1], [0, 0, 1, 1], [], []>} : vector<8x512xf32>, vector<512x24xf32>, vector<8x24xf32> -> vector<8x24xf32>
    %44 = vector.broadcast %6 : vector<1x24xf32> to vector<8x24xf32>
    %45 = arith.addf %43, %44 : vector<8x24xf32>
    %cst_20 = arith.constant dense<0xFF800000> : vector<8xf32>
    %46 = vector.multi_reduction <maximumf>, %45, %cst_20 [1] : vector<8x24xf32> to vector<8xf32>
    %47 = vector.shape_cast %46 : vector<8xf32> to vector<8x1xf32>
    %48 = vector.broadcast %47 : vector<8x1xf32> to vector<8x24xf32>
    %49 = arith.subf %45, %48 : vector<8x24xf32>
    %50 = math.exp %49 : vector<8x24xf32>
    %c0_21 = arith.constant 0 : index
    %c0_22 = arith.constant 0 : index
    %51 = vector.load %arg6[%c0_21, %c0_22] : memref<24x24xf32, #tpu.memory_space<vmem>>, vector<24x24xf32>
    %cst_23 = arith.constant dense<0.000000e+00> : vector<8x24xf32>
    %52 = tpu.matmul %50, %51, %cst_23 {dimension_numbers = #tpu.dot_dimension_numbers<[1], [0], [0], [1], [0, 0, 1, 1], [], []>} : vector<8x24xf32>, vector<24x24xf32>, vector<8x24xf32> -> vector<8x24xf32>
    %53 = tpu.reciprocal %52 {approx = true} : vector<8x24xf32> -> vector<8x24xf32>
    %54 = arith.mulf %50, %53 : vector<8x24xf32>
    %c0_24 = arith.constant 0 : index
    %c0_25 = arith.constant 0 : index
    %55 = vector.load %arg7[%c0_24, %c0_25] : memref<24x384xf32, #tpu.memory_space<vmem>>, vector<24x384xf32>
    %cst_26 = arith.constant dense<0.000000e+00> : vector<8x384xf32>
    %56 = tpu.matmul %54, %55, %cst_26 {dimension_numbers = #tpu.dot_dimension_numbers<[1], [0], [0], [1], [0, 0, 1, 1], [], []>} : vector<8x24xf32>, vector<24x384xf32>, vector<8x384xf32> -> vector<8x384xf32>
    %57 = arith.mulf %41, %56 : vector<8x384xf32>
    %c0_27 = arith.constant 0 : index
    %c0_28 = arith.constant 0 : index
    %58 = vector.load %arg8[%c0_27, %c0_28] : memref<384x128xf32, #tpu.memory_space<vmem>>, vector<384x128xf32>
    %cst_29 = arith.constant dense<0.000000e+00> : vector<8x128xf32>
    %59 = tpu.matmul %57, %58, %cst_29 {dimension_numbers = #tpu.dot_dimension_numbers<[1], [0], [0], [1], [0, 0, 1, 1], [], []>} : vector<8x384xf32>, vector<384x128xf32>, vector<8x128xf32> -> vector<8x128xf32>
    %60 = vector.broadcast %7 : vector<1x128xf32> to vector<8x128xf32>
    %61 = arith.addf %59, %60 : vector<8x128xf32>
    %c0_30 = arith.constant 0 : index
    %c0_31 = arith.constant 0 : index
    %62 = vector.load %arg10[%c0_30, %c0_31] : memref<8x128xf32, #tpu.memory_space<vmem>>, vector<8x128xf32>
    tpu.vector_store %arg10[%c0_30, %c0_31], %61 {strides = array<i32>} : memref<8x128xf32, #tpu.memory_space<vmem>>, vector<8x128xf32>,
    return
  }
  func.func @transform_0(%arg0: i32) -> (i32, i32) {
    %c0_i32 = arith.constant 0 : i32
    %c0_i32_0 = arith.constant 0 : i32
    return %arg0, %c0_i32 : i32, i32
  }
  func.func @transform_1(%arg0: i32) -> (i32, i32) {
    %c0_i32 = arith.constant 0 : i32
    %c0_i32_0 = arith.constant 0 : i32
    %c0_i32_1 = arith.constant 0 : i32
    return %c0_i32, %c0_i32_0 : i32, i32
  }
  func.func @transform_2(%arg0: i32) -> (i32, i32) {
    %c0_i32 = arith.constant 0 : i32
    %c0_i32_0 = arith.constant 0 : i32
    %c0_i32_1 = arith.constant 0 : i32
    return %c0_i32, %c0_i32_0 : i32, i32
  }
  func.func @transform_3(%arg0: i32) -> (i32, i32) {
    %c0_i32 = arith.constant 0 : i32
    %c0_i32_0 = arith.constant 0 : i32
    %c0_i32_1 = arith.constant 0 : i32
    return %c0_i32, %c0_i32_0 : i32, i32
  }
  func.func @transform_4(%arg0: i32) -> (i32, i32) {
    %c0_i32 = arith.constant 0 : i32
    %c0_i32_0 = arith.constant 0 : i32
    %c0_i32_1 = arith.constant 0 : i32
    return %c0_i32, %c0_i32_0 : i32, i32
  }
  func.func @transform_5(%arg0: i32) -> (i32, i32) {
    %c0_i32 = arith.constant 0 : i32
    %c0_i32_0 = arith.constant 0 : i32
    %c0_i32_1 = arith.constant 0 : i32
    return %c0_i32, %c0_i32_0 : i32, i32
  }
  func.func @transform_6(%arg0: i32) -> (i32, i32) {
    %c0_i32 = arith.constant 0 : i32
    %c0_i32_0 = arith.constant 0 : i32
    %c0_i32_1 = arith.constant 0 : i32
    return %c0_i32, %c0_i32_0 : i32, i32
  }
  func.func @transform_7(%arg0: i32) -> (i32, i32) {
    %c0_i32 = arith.constant 0 : i32
    %c0_i32_0 = arith.constant 0 : i32
    %c0_i32_1 = arith.constant 0 : i32
    return %c0_i32, %c0_i32_0 : i32, i32
  }
  func.func @transform_8(%arg0: i32) -> (i32, i32) {
    %c0_i32 = arith.constant 0 : i32
    %c0_i32_0 = arith.constant 0 : i32
    %c0_i32_1 = arith.constant 0 : i32
    return %c0_i32, %c0_i32_0 : i32, i32
  }
  func.func @transform_9(%arg0: i32) -> (i32, i32) {
    %c0_i32 = arith.constant 0 : i32
    %c0_i32_0 = arith.constant 0 : i32
    return %arg0, %c0_i32 : i32, i32
  }
}

</mosaic_0001>

<bundles_post_ra>
// kernel: tpu_custom_call.1
= control target key start
LH: loop header
LB: loop body
LE: loop exit
PB: predicated region body
PF: predicated region fallthrough
CT: control target
= control target key end

     0   :  { %14 = vsyncpa [#allocation3], 0  ;;  %s4965_s0 = inlined_call_operand.vmem [shape: f32[8,256], index: 0, kind: input, shape index: {}]   ;;  %s4966_s1 = inlined_call_operand.hbm [shape: f32[256,512], index: 1, kind: input, shape index: {}]   ;;  %s4967_s2 = inlined_call_operand.hbm [shape: f32[512,512], index: 2, kind: input, shape index: {}]   ;;  %s4968_s3 = inlined_call_operand.hbm [shape: f32[512,384], index: 3, kind: input, shape index: {}]   ;;  %s4969_s4 = inlined_call_operand.vmem [shape: f32[512,24], index: 4, kind: input, shape index: {}]   ;;  %s4970_s5 = inlined_call_operand.vmem [shape: f32[24,24], index: 5, kind: input, shape index: {}]   ;;  %s4971_s6 = inlined_call_operand.vmem [shape: f32[24,384], index: 6, kind: input, shape index: {}]   ;;  %s4972_s7 = inlined_call_operand.vmem [shape: f32[384,128], index: 7, kind: input, shape index: {}]   ;;  %s4973_s8 = inlined_call_operand.vmem [shape: f32[6,512], index: 8, kind: input, shape index: {}]   ;;  %s4974_s9 = inlined_call_operand.hbm [shape: f32[8,128], index: 9, kind: output, shape index: {}]  }
   0x1   :  { %15 = vsyncpa [#allocation6], 0 }
   0x2   :  { %16 = vsyncpa [#allocation4], 0  ;;  %s3791_s30 = smov [#allocation5]   ;;  %s3792_s11 = smov [#allocation2]  }
   0x3   :  { %s36_s10 = sshll.u32 %s3791_s30, 4  ;;  %s24_s12 = sshll.u32 %s3792_s11, 4  ;;  %s37_s10 = int_to_ptr.vmem [resolvable:$true] %s36_s10  ;;  %s3852_s12 = int_to_ptr.vmem [resolvable:$true] %s24_s12 }
   0x4   :  { %s3697_s15 = scalar_lea.hbm %s4967_s2, 32768 }
   0x5   :  { %p3698_p0 = scmp.ne.s32.totalorder %s4967_s2, %s3697_s15  ;;  %p3701_p1 = scmp.lt.u32.totalorder %s3697_s15, %s4967_s2 }
   0x7   :  { %p3703_p2 = pnand %p3701_p1, %p3698_p0 }
   0x9   :  { %3706 = shalt.err (!%p3703_p2)
}
   0xa   :  { %s3707_s20 = scalar_lea.vmem %s37_s10, 32768  ;;  %p3712_p4 = scmp.lt.s32.totalorder %s37_s10, %s37_s10 }
   0xb   :  { %p3708_p3 = scmp.ne.s32.totalorder %s37_s10, %s3707_s20  ;;  %p3713_p5 = scmp.lt.s32.totalorder %s3707_s20, %s3707_s20 }
   0xd   :  { %p3714_p6 = por %p3713_p5, %p3712_p4 }
   0xf   :  { %p3715_p7 = pnand %p3714_p6, %p3708_p3 }
  0x11   :  { %3718 = shalt.err (!%p3715_p7)
}
  0x12   :  { %s3793_s21 = smov 512   ;;  %s3794_s22 = smov 32  }
  0x13   :  { %42 = dma.hbm_to_vmem [thread:$0]  %s4967_s2, 32768, %s37_s10, [#allocation6], %s3793_s21, %s3793_s21, %s3794_s22  }
  0x14   :  { %s3719_s27 = scalar_lea.hbm %s4966_s1, 16384 }
  0x15   :  { %p3720_p8 = scmp.ne.s32.totalorder %s4966_s1, %s3719_s27  ;;  %p3723_p9 = scmp.lt.u32.totalorder %s3719_s27, %s4966_s1 }
  0x17   :  { %p3725_p10 = pnand %p3723_p9, %p3720_p8 }
  0x19   :  { %3728 = shalt.err (!%p3725_p10)
}
  0x1a   :  { %s3729_s13 = scalar_lea.vmem %s3852_s12, 16384  ;;  %p3734_p12 = scmp.lt.s32.totalorder %s3852_s12, %s3852_s12 }
  0x1b   :  { %p3730_p11 = scmp.ne.s32.totalorder %s3852_s12, %s3729_s13  ;;  %p3735_p13 = scmp.lt.s32.totalorder %s3729_s13, %s3729_s13 }
  0x1d   :  { %p3736_p0 = por %p3735_p13, %p3734_p12 }
  0x1f   :  { %p3737_p1 = pnand %p3736_p0, %p3730_p11 }
  0x21   :  { %3740 = shalt.err (!%p3737_p1)
}
  0x22   :  { %30 = dma.hbm_to_vmem [thread:$0]  %s4966_s1, 16384, %s3852_s12, [#allocation3], %s3793_s21, %s3793_s21, %s3794_s22  }
  0x23   :  { %s3795_s14 = smov [#allocation7]   ;;  %s3741_s18 = scalar_lea.hbm %s4968_s3, 24576 }
  0x24   :  { %s48_s15 = sshll.u32 %s3795_s14, 4  ;;  %p3742_p2 = scmp.ne.s32.totalorder %s4968_s3, %s3741_s18  ;;  %s49_s15 = int_to_ptr.vmem [resolvable:$true] %s48_s15 }
  0x25   :  { %p3745_p3 = scmp.lt.u32.totalorder %s3741_s18, %s4968_s3 }
  0x27   :  { %p3747_p4 = pnand %p3745_p3, %p3742_p2 }
  0x29   :  { %3750 = shalt.err (!%p3747_p4)
}
  0x2a   :  { %s3751_s25 = scalar_lea.vmem %s49_s15, 24576  ;;  %p3756_p6 = scmp.lt.s32.totalorder %s49_s15, %s49_s15 }
  0x2b   :  { %p3752_p5 = scmp.ne.s32.totalorder %s49_s15, %s3751_s25  ;;  %p3757_p7 = scmp.lt.s32.totalorder %s3751_s25, %s3751_s25 }
  0x2d   :  { %p3758_p8 = por %p3757_p7, %p3756_p6 }
  0x2f   :  { %p3759_p9 = pnand %p3758_p8, %p3752_p5 }
  0x31   :  { %3762 = shalt.err (!%p3759_p9)
}
  0x32   :  { %s3796_s1 = smov 384   ;;  %s3797_s12 = smov 24  }
  0x33   :  { %54 = dma.hbm_to_vmem [thread:$0]  %s4968_s3, 24576, %s49_s15, [#allocation6], %s3796_s1, %s3796_s1, %s3797_s12  }
  0x34   :  { %3785 = dma.done.wait [#allocation3], 16384  }
  0x35   :  { %3786 = vsyncadd [#allocation3], 4294950912 }
  0x36   :  { %3787 = dma.done.wait [#allocation6], 57344  }
  0x37   :  { %3788 = vsyncadd [#allocation6], 4294909952  ;;  %v81_v0 = vld [vmem:[#allocation2 + $0x8] sm:$0xff]  ;;  %v80_v2 = vld [vmem:[#allocation2] sm:$0xff]  ;;  %vm1976_vm0 = vcmask 195584   ;;  %vm3799_vm1 = vmmov 0  }
  0x38   :  { %v85_v1 = vld [vmem:[#allocation2 + $0x28] sm:$0xff]  ;;  %v84_v4 = vld [vmem:[#allocation2 + $0x20] sm:$0xff]  ;;  %v83_v43 = vld [vmem:[#allocation2 + $0x18] sm:$0xff] }
  0x39   :  { %v2682_v3 = vpack.c.bf16 %v85_v1, %v81_v0  ;;  %v89_v5 = vld [vmem:[#allocation2 + $0x48] sm:$0xff]  ;;  %v2684_v7 = vpack.c.bf16 %v84_v4, %v80_v2  ;;  %v88_v9 = vld [vmem:[#allocation2 + $0x40] sm:$0xff]  ;;  %v87_v44 = vld [vmem:[#allocation2 + $0x38] sm:$0xff] }
  0x3a   :  { %v93_v6 = vld [vmem:[#allocation2 + $0x68] sm:$0xff]  ;;  %v92_v10 = vld [vmem:[#allocation2 + $0x60] sm:$0xff]  ;;  %v2746_v45 = vpack.c.bf16 %v87_v44, %v83_v43  ;;  %v82_v47 = vld [vmem:[#allocation2 + $0x10] sm:$0xff] }
  0x3b   :  { %v2686_v8 = vpack.c.bf16 %v93_v6, %v89_v5  ;;  %v97_v11 = vld [vmem:[#allocation2 + $0x88] sm:$0xff]  ;;  %2683 = vmatprep.subr.bf16.mxu0 %v2682_v3  ;;  %v2688_v13 = vpack.c.bf16 %v92_v10, %v88_v9  ;;  %v96_v15 = vld [vmem:[#allocation2 + $0x80] sm:$0xff]  ;;  %v86_v48 = vld [vmem:[#allocation2 + $0x30] sm:$0xff] }
  0x3c   :  { %v101_v12 = vld [vmem:[#allocation2 + $0xa8] sm:$0xff]  ;;  %2685 = vmatpush1.bf16.msra.mxu0 %v2684_v7  ;;  %v100_v16 = vld [vmem:[#allocation2 + $0xa0] sm:$0xff]  ;;  %v2748_v50 = vpack.c.bf16 %v86_v48, %v82_v47  ;;  %v91_v51 = vld [vmem:[#allocation2 + $0x58] sm:$0xff]  ;;  %2747 = vmatprep.subr.bf16.mxu1 %v2746_v45 }
  0x3d   :  { %2687 = vmatprep.subr.bf16.mxu0 %v2686_v8  ;;  %v2690_v14 = vpack.c.bf16 %v101_v12, %v97_v11  ;;  %v105_v17 = vld [vmem:[#allocation2 + $0xc8] sm:$0xff]  ;;  %v2692_v19 = vpack.c.bf16 %v100_v16, %v96_v15  ;;  %v104_v21 = vld [vmem:[#allocation2 + $0xc0] sm:$0xff]  ;;  %v95_v52 = vld [vmem:[#allocation2 + $0x78] sm:$0xff] }
  0x3e   :  { %v109_v18 = vld [vmem:[#allocation2 + $0xe8] sm:$0xff]  ;;  %v108_v22 = vld [vmem:[#allocation2 + $0xe0] sm:$0xff]  ;;  %v2750_v54 = vpack.c.bf16 %v95_v52, %v91_v51  ;;  %v90_v55 = vld [vmem:[#allocation2 + $0x50] sm:$0xff]  ;;  %2749 = vmatpush1.bf16.msra.mxu1 %v2748_v50 }
  0x3f   :  { %v2694_v20 = vpack.c.bf16 %v109_v18, %v105_v17  ;;  %v113_v23 = vld [vmem:[#allocation2 + $0x108] sm:$0xff]  ;;  %v2696_v25 = vpack.c.bf16 %v108_v22, %v104_v21  ;;  %v112_v27 = vld [vmem:[#allocation2 + $0x100] sm:$0xff]  ;;  %v94_v56 = vld [vmem:[#allocation2 + $0x70] sm:$0xff] }
  0x40   :  { %2689 = vmatpush1.bf16.msra.mxu0 %v2688_v13  ;;  %v117_v24 = vld [vmem:[#allocation2 + $0x128] sm:$0xff]  ;;  %v116_v28 = vld [vmem:[#allocation2 + $0x120] sm:$0xff]  ;;  %v99_v57 = vld [vmem:[#allocation2 + $0x98] sm:$0xff]  ;;  %v2752_v61 = vpack.c.bf16 %v94_v56, %v90_v55  ;;  %2751 = vmatprep.subr.bf16.mxu1 %v2750_v54 }
  0x41   :  { %2691 = vmatprep.subr.bf16.mxu0 %v2690_v14  ;;  %v2698_v26 = vpack.c.bf16 %v117_v24, %v113_v23  ;;  %v121_v29 = vld [vmem:[#allocation2 + $0x148] sm:$0xff]  ;;  %v2700_v31 = vpack.c.bf16 %v116_v28, %v112_v27  ;;  %v120_v33 = vld [vmem:[#allocation2 + $0x140] sm:$0xff]  ;;  %v103_v62 = vld [vmem:[#allocation2 + $0xb8] sm:$0xff] }
  0x42   :  { %v125_v30 = vld [vmem:[#allocation2 + $0x168] sm:$0xff]  ;;  %v124_v34 = vld [vmem:[#allocation2 + $0x160] sm:$0xff]  ;;  %v2754_v0 = vpack.c.bf16 %v103_v62, %v99_v57  ;;  %v98_v1 = vld [vmem:[#allocation2 + $0x90] sm:$0xff]  ;;  %2753 = vmatpush1.bf16.msra.mxu1 %v2752_v61 }
  0x43   :  { %v2702_v32 = vpack.c.bf16 %v125_v30, %v121_v29  ;;  %v129_v35 = vld [vmem:[#allocation2 + $0x188] sm:$0xff]  ;;  %v2704_v37 = vpack.c.bf16 %v124_v34, %v120_v33  ;;  %v128_v38 = vld [vmem:[#allocation2 + $0x180] sm:$0xff]  ;;  %v102_v2 = vld [vmem:[#allocation2 + $0xb0] sm:$0xff] }
  0x44   :  { %2693 = vmatpush1.bf16.msra.mxu0 %v2692_v19  ;;  %v133_v36 = vld [vmem:[#allocation2 + $0x1a8] sm:$0xff]  ;;  %v132_v39 = vld [vmem:[#allocation2 + $0x1a0] sm:$0xff]  ;;  %v107_v3 = vld [vmem:[#allocation2 + $0xd8] sm:$0xff]  ;;  %v2756_v10 = vpack.c.bf16 %v102_v2, %v98_v1  ;;  %2755 = vmatprep.subr.bf16.mxu1 %v2754_v0 }
  0x45   :  { %2695 = vmatprep.subr.bf16.mxu0 %v2694_v20  ;;  %v137_v40 = vld [vmem:[#allocation2 + $0x1c8] sm:$0xff]  ;;  %v2706_v41 = vpack.c.bf16 %v133_v36, %v129_v35  ;;  %v136_v49 = vld [vmem:[#allocation2 + $0x1c0] sm:$0xff]  ;;  %v2708_v53 = vpack.c.bf16 %v132_v39, %v128_v38  ;;  %v111_v4 = vld [vmem:[#allocation2 + $0xf8] sm:$0xff] }
  0x46   :  { %v141_v42 = vld [vmem:[#allocation2 + $0x1e8] sm:$0xff]  ;;  %v140_v59 = vld [vmem:[#allocation2 + $0x1e0] sm:$0xff]  ;;  %v2758_v12 = vpack.c.bf16 %v111_v4, %v107_v3  ;;  %v106_v13 = vld [vmem:[#allocation2 + $0xd0] sm:$0xff]  ;;  %2757 = vmatpush1.bf16.msra.mxu1 %v2756_v10 }
  0x47   :  { %v75_v46 = vld [vmem:[%s4965_s0 + $0x8] sm:$0xff]  ;;  %v2710_v58 = vpack.c.bf16 %v141_v42, %v137_v40  ;;  %v2712_v5 = vpack.c.bf16 %v140_v59, %v136_v49  ;;  %v144_v7 = vld [vmem:[#allocation2 + $0x200] sm:$0xff]  ;;  %v110_v14 = vld [vmem:[#allocation2 + $0xf0] sm:$0xff] }
  0x48   :  { %2697 = vmatpush1.bf16.msra.mxu0 %v2696_v25  ;;  %288 = vmatprep.mubr.f32.mxu0 %v75_v46  ;;  %v145_v60 = vld [vmem:[#allocation2 + $0x208] sm:$0xff]  ;;  %v148_v8 = vld [vmem:[#allocation2 + $0x220] sm:$0xff]  ;;  %v115_v15 = vld [vmem:[#allocation2 + $0x118] sm:$0xff]  ;;  %v2760_v22 = vpack.c.bf16 %v110_v14, %v106_v13 }
  0x49   :  { %2699 = vmatprep.subr.bf16.mxu0 %v2698_v26  ;;  %359 = vmatprep.mubr.f32.mxu1 %v75_v46  ;;  %v149_v63 = vld [vmem:[#allocation2 + $0x228] sm:$0xff]  ;;  %v119_v16 = vld [vmem:[#allocation2 + $0x138] sm:$0xff]  ;;  %v2716_v17 = vpack.c.bf16 %v148_v8, %v144_v7  ;;  %v152_v19 = vld [vmem:[#allocation2 + $0x240] sm:$0xff] }
  0x4a   :  { %v2714_v6 = vpack.c.bf16 %v149_v63, %v145_v60  ;;  %v153_v9 = vld [vmem:[#allocation2 + $0x248] sm:$0xff]  ;;  %v156_v20 = vld [vmem:[#allocation2 + $0x260] sm:$0xff]  ;;  %2759 = vmatprep.subr.bf16.mxu1 %v2758_v12  ;;  %v2762_v24 = vpack.c.bf16 %v119_v16, %v115_v15  ;;  %v114_v25 = vld [vmem:[#allocation2 + $0x110] sm:$0xff] }
  0x4b   :  { %v157_v11 = vld [vmem:[#allocation2 + $0x268] sm:$0xff]  ;;  %v118_v26 = vld [vmem:[#allocation2 + $0x130] sm:$0xff]  ;;  %v123_v27 = vld [vmem:[#allocation2 + $0x158] sm:$0xff]  ;;  %v2720_v29 = vpack.c.bf16 %v156_v20, %v152_v19  ;;  %2761 = vmatpush1.bf16.msra.mxu1 %v2760_v22 }
  0x4c   :  { %2701 = vmatpush1.bf16.msra.mxu0 %v2700_v31  ;;  %v2718_v18 = vpack.c.bf16 %v157_v11, %v153_v9  ;;  %v161_v21 = vld [vmem:[#allocation2 + $0x288] sm:$0xff]  ;;  %v127_v28 = vld [vmem:[#allocation2 + $0x178] sm:$0xff]  ;;  %v160_v31 = vld [vmem:[#allocation2 + $0x280] sm:$0xff]  ;;  %v2764_v34 = vpack.c.bf16 %v118_v26, %v114_v25  ;;  %2763 = vmatprep.subr.bf16.mxu1 %v2762_v24 }
  0x4d   :  { %2703 = vmatprep.subr.bf16.mxu0 %v2702_v32  ;;  %v165_v23 = vld [vmem:[#allocation2 + $0x2a8] sm:$0xff]  ;;  %v164_v32 = vld [vmem:[#allocation2 + $0x2a0] sm:$0xff]  ;;  %v2766_v36 = vpack.c.bf16 %v127_v28, %v123_v27  ;;  %v126_v38 = vld [vmem:[#allocation2 + $0x170] sm:$0xff] }
  0x4e   :  { %v2722_v30 = vpack.c.bf16 %v165_v23, %v161_v21  ;;  %v169_v33 = vld [vmem:[#allocation2 + $0x2c8] sm:$0xff]  ;;  %v131_v39 = vld [vmem:[#allocation2 + $0x198] sm:$0xff]  ;;  %v168_v43 = vld [vmem:[#allocation2 + $0x2c0] sm:$0xff] }
  0x4f   :  { %v173_v35 = vld [vmem:[#allocation2 + $0x2e8] sm:$0xff]  ;;  %v135_v40 = vld [vmem:[#allocation2 + $0x1b8] sm:$0xff]  ;;  %v172_v44 = vld [vmem:[#allocation2 + $0x2e0] sm:$0xff]  ;;  %2765 = vmatpush1.bf16.msra.mxu1 %v2764_v34 }
  0x50   :  { %2705 = vmatpush1.bf16.msra.mxu0 %v2704_v37  ;;  %v122_v37 = vld [vmem:[#allocation2 + $0x150] sm:$0xff]  ;;  %v2726_v42 = vpack.c.bf16 %v173_v35, %v169_v33  ;;  %v177_v45 = vld [vmem:[#allocation2 + $0x308] sm:$0xff]  ;;  %2767 = vmatprep.subr.bf16.mxu1 %v2766_v36  ;;  %v2770_v48 = vpack.c.bf16 %v135_v40, %v131_v39  ;;  %v139_v51 = vld [vmem:[#allocation2 + $0x1d8] sm:$0xff] }
  0x51   :  { %2707 = vmatprep.subr.bf16.mxu0 %v2706_v41  ;;  %v2724_v41 = vpack.c.bf16 %v164_v32, %v160_v31  ;;  %v2768_v46 = vpack.c.bf16 %v126_v38, %v122_v37  ;;  %v181_v47 = vld [vmem:[#allocation2 + $0x328] sm:$0xff]  ;;  %v130_v49 = vld [vmem:[#allocation2 + $0x190] sm:$0xff]  ;;  %v143_v52 = vld [vmem:[#allocation2 + $0x1f8] sm:$0xff] }
  0x52   :  { %v134_v50 = vld [vmem:[#allocation2 + $0x1b0] sm:$0xff]  ;;  %v2730_v54 = vpack.c.bf16 %v181_v47, %v177_v45  ;;  %v176_v55 = vld [vmem:[#allocation2 + $0x300] sm:$0xff]  ;;  %v185_v57 = vld [vmem:[#allocation2 + $0x348] sm:$0xff]  ;;  %v2774_v60 = vpack.c.bf16 %v143_v52, %v139_v51 }
  0x53   :  { %v180_v56 = vld [vmem:[#allocation2 + $0x320] sm:$0xff]  ;;  %2769 = vmatpush1.bf16.msra.mxu1 %v2768_v46  ;;  %v189_v59 = vld [vmem:[#allocation2 + $0x368] sm:$0xff]  ;;  %v138_v61 = vld [vmem:[#allocation2 + $0x1d0] sm:$0xff] }
  0x54   :  { %2709 = vmatpush1.bf16.msra.mxu0 %v2708_v53  ;;  %v2728_v53 = vpack.c.bf16 %v172_v44, %v168_v43  ;;  %2771 = vmatprep.subr.bf16.mxu1 %v2770_v48  ;;  %v142_v62 = vld [vmem:[#allocation2 + $0x1f0] sm:$0xff]  ;;  %v147_v63 = vld [vmem:[#allocation2 + $0x218] sm:$0xff]  ;;  %v2732_v1 = vpack.c.bf16 %v180_v56, %v176_v55  ;;  %v2734_v2 = vpack.c.bf16 %v189_v59, %v185_v57  ;;  %v184_v3 = vld [vmem:[#allocation2 + $0x340] sm:$0xff] }
  0x55   :  { %2711 = vmatprep.subr.bf16.mxu0 %v2710_v58  ;;  %v2772_v58 = vpack.c.bf16 %v134_v50, %v130_v49  ;;  %v151_v0 = vld [vmem:[#allocation2 + $0x238] sm:$0xff]  ;;  %v188_v4 = vld [vmem:[#allocation2 + $0x360] sm:$0xff]  ;;  %v197_v7 = vld [vmem:[#allocation2 + $0x3a8] sm:$0xff] }
  0x56   :  { %v2778_v8 = vpack.c.bf16 %v151_v0, %v147_v63  ;;  %v146_v9 = vld [vmem:[#allocation2 + $0x210] sm:$0xff]  ;;  %v155_v11 = vld [vmem:[#allocation2 + $0x258] sm:$0xff]  ;;  %v2736_v13 = vpack.c.bf16 %v188_v4, %v184_v3  ;;  %v192_v15 = vld [vmem:[#allocation2 + $0x380] sm:$0xff] }
  0x57   :  { %2773 = vmatpush1.bf16.msra.mxu1 %v2772_v58  ;;  %v150_v10 = vld [vmem:[#allocation2 + $0x230] sm:$0xff]  ;;  %v159_v12 = vld [vmem:[#allocation2 + $0x278] sm:$0xff]  ;;  %v196_v16 = vld [vmem:[#allocation2 + $0x3a0] sm:$0xff] }
  0x58   :  { %2713 = vmatpush1.bf16.msra.mxu0 %v2712_v5  ;;  %v193_v5 = vld [vmem:[#allocation2 + $0x388] sm:$0xff]  ;;  %2775 = vmatprep.subr.bf16.mxu1 %v2774_v60  ;;  %v2782_v20 = vpack.c.bf16 %v159_v12, %v155_v11  ;;  %v154_v21 = vld [vmem:[#allocation2 + $0x250] sm:$0xff]  ;;  %v163_v23 = vld [vmem:[#allocation2 + $0x298] sm:$0xff]  ;;  %v2740_v25 = vpack.c.bf16 %v196_v16, %v192_v15 }
  0x59   :  { %2715 = vmatprep.subr.bf16.mxu0 %v2714_v6  ;;  %v2776_v6 = vpack.c.bf16 %v142_v62, %v138_v61  ;;  %v2738_v14 = vpack.c.bf16 %v197_v7, %v193_v5  ;;  %v205_v19 = vld [vmem:[#allocation2 + $0x3e8] sm:$0xff]  ;;  %v158_v22 = vld [vmem:[#allocation2 + $0x270] sm:$0xff]  ;;  %v167_v24 = vld [vmem:[#allocation2 + $0x2b8] sm:$0xff] }
  0x5a   :  { %v200_v27 = vld [vmem:[#allocation2 + $0x3c0] sm:$0xff]  ;;  %v2786_v31 = vpack.c.bf16 %v167_v24, %v163_v23  ;;  %v166_v32 = vld [vmem:[#allocation2 + $0x2b0] sm:$0xff]  ;;  %v367_v33 = vld [vmem:[#allocation5 + $0x8] sm:$0xff] }
  0x5b   :  { %2777 = vmatpush1.bf16.msra.mxu1 %v2776_v6  ;;  %v204_v28 = vld [vmem:[#allocation2 + $0x3e0] sm:$0xff]  ;;  %v371_v34 = vld [vmem:[#allocation5 + $0x28] sm:$0xff]  ;;  %v171_v35 = vld [vmem:[#allocation2 + $0x2d8] sm:$0xff] }
  0x5c   :  { %2717 = vmatpush1.bf16.msra.mxu0 %v2716_v17  ;;  %v201_v17 = vld [vmem:[#allocation2 + $0x3c8] sm:$0xff]  ;;  %2779 = vmatprep.subr.bf16.mxu1 %v2778_v8  ;;  %v175_v36 = vld [vmem:[#allocation2 + $0x2f8] sm:$0xff]  ;;  %v2744_v37 = vpack.c.bf16 %v204_v28, %v200_v27  ;;  %v170_v39 = vld [vmem:[#allocation2 + $0x2d0] sm:$0xff]  ;;  %v3898_v40 = vpack.c.bf16 %v371_v34, %v367_v33 }
  0x5d   :  { %2719 = vmatprep.subr.bf16.mxu0 %v2718_v18  ;;  %v2780_v18 = vpack.c.bf16 %v150_v10, %v146_v9  ;;  %v2742_v26 = vpack.c.bf16 %v205_v19, %v201_v17  ;;  %v2790_v43 = vpack.c.bf16 %v175_v36, %v171_v35  ;;  %v174_v44 = vld [vmem:[#allocation2 + $0x2f0] sm:$0xff]  ;;  %v375_v45 = vld [vmem:[#allocation5 + $0x48] sm:$0xff]  ;;  %v179_v47 = vld [vmem:[#allocation2 + $0x318] sm:$0xff] }
  0x5e   :  { %v379_v46 = vld [vmem:[#allocation5 + $0x68] sm:$0xff]  ;;  %v183_v48 = vld [vmem:[#allocation2 + $0x338] sm:$0xff]  ;;  %v3903_v49 = vld [vmem:[%s4965_s0] sm:$0xff]  ;;  %v2792_v51 = vpack.c.bf16 %v174_v44, %v170_v39 }
  0x5f   :  { %2781 = vmatpush1.bf16.msra.mxu1 %v2780_v18  ;;  %v178_v52 = vld [vmem:[#allocation2 + $0x310] sm:$0xff]  ;;  %v378_v55 = vld [vmem:[#allocation5 + $0x60] sm:$0xff]  ;;  %v2794_v56 = vpack.c.bf16 %v183_v48, %v179_v47  ;;  %v383_v58 = vld [vmem:[#allocation5 + $0x88] sm:$0xff] }
  0x60   :  { %2721 = vmatpush1.bf16.msra.mxu0 %v2720_v29  ;;  %v2784_v29 = vpack.c.bf16 %v158_v22, %v154_v21  ;;  %2783 = vmatprep.subr.bf16.mxu1 %v2782_v20  ;;  %v182_v57 = vld [vmem:[#allocation2 + $0x330] sm:$0xff]  ;;  %v387_v59 = vld [vmem:[#allocation5 + $0xa8] sm:$0xff]  ;;  %v187_v60 = vld [vmem:[#allocation2 + $0x358] sm:$0xff] }
  0x61   :  { %2723 = vmatprep.subr.bf16.mxu0 %v2722_v30  ;;  %v162_v30 = vld [vmem:[#allocation2 + $0x290] sm:$0xff]  ;;  %v191_v61 = vld [vmem:[#allocation2 + $0x378] sm:$0xff]  ;;  %v2796_v63 = vpack.c.bf16 %v182_v57, %v178_v52  ;;  %v386_v3 = vld [vmem:[#allocation5 + $0xa0] sm:$0xff] }
  0x62   :  { %v2788_v38 = vpack.c.bf16 %v166_v32, %v162_v30  ;;  %v186_v0 = vld [vmem:[#allocation2 + $0x350] sm:$0xff]  ;;  %v2798_v4 = vpack.c.bf16 %v191_v61, %v187_v60  ;;  %v391_v6 = vld [vmem:[#allocation5 + $0xc8] sm:$0xff]  ;;  %v195_v8 = vld [vmem:[#allocation2 + $0x398] sm:$0xff] }
  0x63   :  { %2785 = vmatpush1.bf16.msra.mxu1 %v2784_v29  ;;  %v190_v5 = vld [vmem:[#allocation2 + $0x370] sm:$0xff]  ;;  %v395_v7 = vld [vmem:[#allocation5 + $0xe8] sm:$0xff]  ;;  %v199_v9 = vld [vmem:[#allocation2 + $0x3b8] sm:$0xff] }
  0x64   :  { %2725 = vmatpush1.bf16.msra.mxu0 %v2724_v41  ;;  %v366_v41 = vld [vmem:[#allocation5] sm:$0xff]  ;;  %2787 = vmatprep.subr.bf16.mxu1 %v2786_v31  ;;  %v2800_v11 = vpack.c.bf16 %v190_v5, %v186_v0  ;;  %v194_v12 = vld [vmem:[#allocation2 + $0x390] sm:$0xff]  ;;  %v2802_v16 = vpack.c.bf16 %v199_v9, %v195_v8  ;;  %v399_v18 = vld [vmem:[#allocation5 + $0x108] sm:$0xff] }
  0x65   :  { %2727 = vmatprep.subr.bf16.mxu0 %v2726_v42  ;;  %v370_v42 = vld [vmem:[#allocation5 + $0x20] sm:$0xff]  ;;  %v198_v17 = vld [vmem:[#allocation2 + $0x3b0] sm:$0xff]  ;;  %v403_v19 = vld [vmem:[#allocation5 + $0x128] sm:$0xff] }
  0x66   :  { %v3905_v50 = vpack.c.bf16 %v370_v42, %v366_v41  ;;  %v394_v15 = vld [vmem:[#allocation5 + $0xe0] sm:$0xff]  ;;  %v203_v20 = vld [vmem:[#allocation2 + $0x3d8] sm:$0xff]  ;;  %v2804_v23 = vpack.c.bf16 %v198_v17, %v194_v12  ;;  %v202_v24 = vld [vmem:[#allocation2 + $0x3d0] sm:$0xff] }
  0x67   :  { %2789 = vmatpush1.bf16.msra.mxu1 %v2788_v38  ;;  %v207_v21 = vld [vmem:[#allocation2 + $0x3f8] sm:$0xff]  ;;  %v402_v27 = vld [vmem:[#allocation5 + $0x120] sm:$0xff]  ;;  %v206_v29 = vld [vmem:[#allocation2 + $0x3f0] sm:$0xff] }
  0x68   :  { %2729 = vmatpush1.bf16.msra.mxu0 %v2728_v53  ;;  %v3908_v53 = vpack.c.bf16 %v379_v46, %v375_v45  ;;  %2791 = vmatprep.subr.bf16.mxu1 %v2790_v43  ;;  %v2806_v28 = vpack.c.bf16 %v207_v21, %v203_v20  ;;  %v407_v30 = vld [vmem:[#allocation5 + $0x148] sm:$0xff]  ;;  %v369_v32 = vld [vmem:[#allocation5 + $0x18] sm:$0xff]  ;;  %v2808_v35 = vpack.c.bf16 %v206_v29, %v202_v24  ;;  %v368_v36 = vld [vmem:[#allocation5 + $0x10] sm:$0xff] }
  0x69   :  { %2731 = vmatprep.subr.bf16.mxu0 %v2730_v54  ;;  %v374_v54 = vld [vmem:[#allocation5 + $0x40] sm:$0xff]  ;;  %v411_v31 = vld [vmem:[#allocation5 + $0x168] sm:$0xff]  ;;  %v373_v33 = vld [vmem:[#allocation5 + $0x38] sm:$0xff] }
  0x6a   :  { %v3912_v62 = vpack.c.bf16 %v378_v55, %v374_v54  ;;  %v406_v38 = vld [vmem:[#allocation5 + $0x140] sm:$0xff]  ;;  %v3935_v41 = vpack.c.bf16 %v373_v33, %v369_v32  ;;  %v372_v42 = vld [vmem:[#allocation5 + $0x30] sm:$0xff]  ;;  %v415_v43 = vld [vmem:[#allocation5 + $0x188] sm:$0xff] }
  0x6b   :  { %2793 = vmatpush1.bf16.msra.mxu1 %v2792_v51  ;;  %v410_v39 = vld [vmem:[#allocation5 + $0x160] sm:$0xff]  ;;  %v419_v44 = vld [vmem:[#allocation5 + $0x1a8] sm:$0xff]  ;;  %v377_v45 = vld [vmem:[#allocation5 + $0x58] sm:$0xff]  ;;  %v3940_v48 = vpack.c.bf16 %v372_v42, %v368_v36 }
  0x6c   :  { %2733 = vmatpush1.bf16.msra.mxu0 %v2732_v1  ;;  %v3915_v1 = vpack.c.bf16 %v387_v59, %v383_v58  ;;  %2795 = vmatprep.subr.bf16.mxu1 %v2794_v56  ;;  %v381_v46 = vld [vmem:[#allocation5 + $0x78] sm:$0xff]  ;;  %v3938_v47 = vpack.c.bf16 %v410_v39, %v406_v38  ;;  %v376_v51 = vld [vmem:[#allocation5 + $0x50] sm:$0xff]  ;;  %v3943_v52 = vpack.c.bf16 %v419_v44, %v415_v43  ;;  %v414_v54 = vld [vmem:[#allocation5 + $0x180] sm:$0xff] }
  0x6d   :  { %2735 = vmatprep.subr.bf16.mxu0 %v2734_v2  ;;  %v382_v2 = vld [vmem:[#allocation5 + $0x80] sm:$0xff]  ;;  %v3946_v56 = vpack.c.bf16 %v381_v46, %v377_v45  ;;  %v380_v57 = vld [vmem:[#allocation5 + $0x70] sm:$0xff]  ;;  %v423_v58 = vld [vmem:[#allocation5 + $0x1c8] sm:$0xff] }
  0x6e   :  { %v3918_v10 = vpack.c.bf16 %v386_v3, %v382_v2  ;;  %v418_v55 = vld [vmem:[#allocation5 + $0x1a0] sm:$0xff]  ;;  %v427_v59 = vld [vmem:[#allocation5 + $0x1e8] sm:$0xff]  ;;  %v385_v60 = vld [vmem:[#allocation5 + $0x98] sm:$0xff]  ;;  %v3953_v0 = vpack.c.bf16 %v380_v57, %v376_v51 }
  0x6f   :  { %2797 = vmatpush1.bf16.msra.mxu1 %v2796_v63  ;;  %v389_v61 = vld [vmem:[#allocation5 + $0xb8] sm:$0xff]  ;;  %v3950_v63 = vpack.c.bf16 %v418_v55, %v414_v54  ;;  %v384_v2 = vld [vmem:[#allocation5 + $0x90] sm:$0xff]  ;;  %v3956_v3 = vpack.c.bf16 %v427_v59, %v423_v58  ;;  %v426_v5 = vld [vmem:[#allocation5 + $0x1e0] sm:$0xff] }
  0x70   :  { %2737 = vmatpush1.bf16.msra.mxu0 %v2736_v13  ;;  %v3921_v13 = vpack.c.bf16 %v395_v7, %v391_v6  ;;  %2799 = vmatprep.subr.bf16.mxu1 %v2798_v4  ;;  %v422_v4 = vld [vmem:[#allocation5 + $0x1c0] sm:$0xff]  ;;  %v3959_v6 = vpack.c.bf16 %v389_v61, %v385_v60  ;;  %v431_v7 = vld [vmem:[#allocation5 + $0x208] sm:$0xff]  ;;  %v393_v9 = vld [vmem:[#allocation5 + $0xd8] sm:$0xff] }
  0x71   :  { %2739 = vmatprep.subr.bf16.mxu0 %v2738_v14  ;;  %v390_v14 = vld [vmem:[#allocation5 + $0xc0] sm:$0xff]  ;;  %v435_v8 = vld [vmem:[#allocation5 + $0x228] sm:$0xff]  ;;  %v3962_v12 = vpack.c.bf16 %v426_v5, %v422_v4  ;;  %v396_v20 = vld [vmem:[#allocation5 + $0xf0] sm:$0xff] }
  0x72   :  { %v3924_v22 = vpack.c.bf16 %v394_v15, %v390_v14  ;;  %v392_v15 = vld [vmem:[#allocation5 + $0xd0] sm:$0xff]  ;;  %v430_v17 = vld [vmem:[#allocation5 + $0x200] sm:$0xff]  ;;  %v439_v21 = vld [vmem:[#allocation5 + $0x248] sm:$0xff] }
  0x73   :  { %2801 = vmatpush1.bf16.msra.mxu1 %v2800_v11  ;;  %v397_v11 = vld [vmem:[#allocation5 + $0xf8] sm:$0xff]  ;;  %v400_v29 = vld [vmem:[#allocation5 + $0x110] sm:$0xff]  ;;  %v442_v32 = vld [vmem:[#allocation5 + $0x260] sm:$0xff] }
  0x74   :  { %2741 = vmatpush1.bf16.msra.mxu0 %v2740_v25  ;;  %v3927_v25 = vpack.c.bf16 %v403_v19, %v399_v18  ;;  %2803 = vmatprep.subr.bf16.mxu1 %v2802_v16  ;;  %v3968_v16 = vpack.c.bf16 %v435_v8, %v431_v7  ;;  %v434_v18 = vld [vmem:[#allocation5 + $0x220] sm:$0xff]  ;;  %v3971_v19 = vpack.c.bf16 %v397_v11, %v393_v9  ;;  %v401_v24 = vld [vmem:[#allocation5 + $0x118] sm:$0xff]  ;;  %v447_v36 = vld [vmem:[#allocation5 + $0x288] sm:$0xff] }
  0x75   :  { %2743 = vmatprep.subr.bf16.mxu0 %v2742_v26  ;;  %v398_v26 = vld [vmem:[#allocation5 + $0x100] sm:$0xff]  ;;  %v451_v38 = vld [vmem:[#allocation5 + $0x2a8] sm:$0xff]  ;;  %v409_v39 = vld [vmem:[#allocation5 + $0x158] sm:$0xff] }
  0x76   :  { %v3930_v34 = vpack.c.bf16 %v402_v27, %v398_v26  ;;  %v405_v26 = vld [vmem:[#allocation5 + $0x138] sm:$0xff]  ;;  %v3974_v27 = vpack.c.bf16 %v434_v18, %v430_v17  ;;  %v408_v45 = vld [vmem:[#allocation5 + $0x150] sm:$0xff]  ;;  %v3992_v46 = vpack.c.bf16 %v451_v38, %v447_v36  ;;  %v446_v51 = vld [vmem:[#allocation5 + $0x280] sm:$0xff] }
  0x77   :  { %2805 = vmatpush1.bf16.msra.mxu1 %v2804_v23  ;;  %v443_v23 = vld [vmem:[#allocation5 + $0x268] sm:$0xff]  ;;  %v3983_v33 = vpack.c.bf16 %v405_v26, %v401_v24  ;;  %v413_v42 = vld [vmem:[#allocation5 + $0x178] sm:$0xff]  ;;  %v450_v54 = vld [vmem:[#allocation5 + $0x2a0] sm:$0xff] }
  0x78   :  { %2745 = vmatpush1.bf16.msra.mxu0 %v2744_v37  ;;  %v3933_v37 = vpack.c.bf16 %v411_v31, %v407_v30  ;;  %2807 = vmatprep.subr.bf16.mxu1 %v2806_v28  ;;  %v3977_v28 = vpack.c.bf16 %v396_v20, %v392_v15  ;;  %v3980_v30 = vpack.c.bf16 %v443_v23, %v439_v21  ;;  %v438_v31 = vld [vmem:[#allocation5 + $0x240] sm:$0xff]  ;;  %v412_v57 = vld [vmem:[#allocation5 + $0x170] sm:$0xff]  ;;  %v455_v58 = vld [vmem:[#allocation5 + $0x2c8] sm:$0xff] }
  0x79   :  { %2811 = vmatprep.subr.bf16.mxu0 %v3898_v40  ;;  %v3986_v43 = vpack.c.bf16 %v442_v32, %v438_v31  ;;  %5057 = vst [vmem:[#allocation12_spill] sm:$0xff] %v3992_v46  ;;  %v3995_v55 = vpack.c.bf16 %v413_v42, %v409_v39  ;;  %v459_v59 = vld [vmem:[#allocation5 + $0x2e8] sm:$0xff]  ;;  %v417_v60 = vld [vmem:[#allocation5 + $0x198] sm:$0xff]  ;;  %v4001_v4 = vpack.c.bf16 %v412_v57, %v408_v45  ;;  %v416_v5 = vld [vmem:[#allocation5 + $0x190] sm:$0xff] }
  0x7a   :  { %v421_v61 = vld [vmem:[#allocation5 + $0x1b8] sm:$0xff]  ;;  %v454_v7 = vld [vmem:[#allocation5 + $0x2c0] sm:$0xff]  ;;  %v420_v11 = vld [vmem:[#allocation5 + $0x1b0] sm:$0xff] }
  0x7b   :  { %289 = vmatmul.mubr.f32.vlgmr.msra.gmra.mrb[0].mxu0 %v3903_v49  ;;  %2809 = vmatpush1.bf16.msra.mxu1 %v2808_v35  ;;  %v404_v35 = vld [vmem:[#allocation5 + $0x130] sm:$0xff]  ;;  %v458_v8 = vld [vmem:[#allocation5 + $0x2e0] sm:$0xff]  ;;  %v4007_v9 = vpack.c.bf16 %v421_v61, %v417_v60  ;;  %v463_v15 = vld [vmem:[#allocation5 + $0x308] sm:$0xff]  ;;  %v4013_v23 = vpack.c.bf16 %v420_v11, %v416_v5 }
  0x7c   :  { %2813 = vmatpush1.bf16.msra.mxu0 %v3905_v50  ;;  %2939 = vmatprep.subr.bf16.mxu1 %v3935_v41  ;;  %v3989_v44 = vpack.c.bf16 %v404_v35, %v400_v29  ;;  %v467_v17 = vld [vmem:[#allocation5 + $0x328] sm:$0xff]  ;;  %v425_v18 = vld [vmem:[#allocation5 + $0x1d8] sm:$0xff]  ;;  %v4010_v21 = vpack.c.bf16 %v458_v8, %v454_v7  ;;  %v424_v24 = vld [vmem:[#allocation5 + $0x1d0] sm:$0xff] }
  0x7d   :  { %2815 = vmatprep.subr.bf16.mxu0 %v3908_v53  ;;  %v429_v20 = vld [vmem:[#allocation5 + $0x1f8] sm:$0xff]  ;;  %v4016_v26 = vpack.c.bf16 %v467_v17, %v463_v15  ;;  %v462_v29 = vld [vmem:[#allocation5 + $0x300] sm:$0xff]  ;;  %v428_v35 = vld [vmem:[#allocation5 + $0x1f0] sm:$0xff] }
  0x7e   :  { %360 = vmatmul.mubr.f32.vlgmr.msra.gmra.mrb[0].mxu1 %v3903_v49  ;;  %v388_v49 = vld [vmem:[#allocation5 + $0xb0] sm:$0xff]  ;;  %5060 = vst [vmem:[#allocation15_spill] sm:$0xff] %v4010_v21  ;;  %v466_v31 = vld [vmem:[#allocation5 + $0x320] sm:$0xff]  ;;  %v4019_v32 = vpack.c.bf16 %v429_v20, %v425_v18  ;;  %v471_v36 = vld [vmem:[#allocation5 + $0x348] sm:$0xff] }
  0x7f   :  { %2941 = vmatpush1.bf16.msra.mxu1 %v3940_v48  ;;  %v3965_v14 = vpack.c.bf16 %v388_v49, %v384_v2  ;;  %v3998_v2 = vpack.c.bf16 %v450_v54, %v446_v51  ;;  %v4004_v49 = vpack.c.bf16 %v459_v59, %v455_v58  ;;  %5061 = vst [vmem:[#allocation16_spill] sm:$0xff] %v4016_v26  ;;  %v475_v38 = vld [vmem:[#allocation5 + $0x368] sm:$0xff]  ;;  %v433_v39 = vld [vmem:[#allocation5 + $0x218] sm:$0xff]  ;;  %v432_v54 = vld [vmem:[#allocation5 + $0x210] sm:$0xff] }
  0x80   :  { %2817 = vmatpush1.bf16.msra.mxu0 %v3912_v62  ;;  %2943 = vmatprep.subr.bf16.mxu1 %v3946_v56  ;;  %v437_v42 = vld [vmem:[#allocation5 + $0x238] sm:$0xff]  ;;  %v4022_v45 = vpack.c.bf16 %v466_v31, %v462_v29  ;;  %v4025_v51 = vpack.c.bf16 %v428_v35, %v424_v24  ;;  %v4028_v57 = vpack.c.bf16 %v475_v38, %v471_v36  ;;  %v470_v58 = vld [vmem:[#allocation5 + $0x340] sm:$0xff]  ;;  %v436_v61 = vld [vmem:[#allocation5 + $0x230] sm:$0xff] }
  0x81   :  { %2819 = vmatprep.subr.bf16.mxu0 %v3915_v1  ;;  %5058 = vst [vmem:[#allocation13_spill] sm:$0xff] %v3998_v2  ;;  %5059 = vst [vmem:[#allocation14_spill] sm:$0xff] %v4004_v49  ;;  %v474_v59 = vld [vmem:[#allocation5 + $0x360] sm:$0xff]  ;;  %v4031_v60 = vpack.c.bf16 %v437_v42, %v433_v39  ;;  %v479_v5 = vld [vmem:[#allocation5 + $0x388] sm:$0xff]  ;;  %v4037_v17 = vpack.c.bf16 %v436_v61, %v432_v54 }
  0x82   :  { %5062 = vst [vmem:[#allocation17_spill] sm:$0xff] %v4022_v45  ;;  %5063 = vst [vmem:[#allocation18_spill] sm:$0xff] %v4028_v57  ;;  %v483_v7 = vld [vmem:[#allocation5 + $0x3a8] sm:$0xff]  ;;  %v441_v8 = vld [vmem:[#allocation5 + $0x258] sm:$0xff]  ;;  %v4034_v15 = vpack.c.bf16 %v474_v59, %v470_v58 }
  0x83   :  { %2945 = vmatpush1.bf16.msra.mxu1 %v3953_v0  ;;  %v445_v11 = vld [vmem:[#allocation5 + $0x278] sm:$0xff]  ;;  %v4040_v18 = vpack.c.bf16 %v483_v7, %v479_v5  ;;  %v478_v20 = vld [vmem:[#allocation5 + $0x380] sm:$0xff]  ;;  %v440_v31 = vld [vmem:[#allocation5 + $0x250] sm:$0xff] }
  0x84   :  { %2821 = vmatpush1.bf16.msra.mxu0 %v3918_v10  ;;  %2947 = vmatprep.subr.bf16.mxu1 %v3959_v6  ;;  %5064 = vst [vmem:[#allocation19_spill] sm:$0xff] %v4034_v15  ;;  %v482_v24 = vld [vmem:[#allocation5 + $0x3a0] sm:$0xff]  ;;  %v4043_v29 = vpack.c.bf16 %v445_v11, %v441_v8  ;;  %v444_v35 = vld [vmem:[#allocation5 + $0x270] sm:$0xff]  ;;  %v449_v36 = vld [vmem:[#allocation5 + $0x298] sm:$0xff] }
  0x85   :  { %2823 = vmatprep.subr.bf16.mxu0 %v3921_v13  ;;  %5065 = vst [vmem:[#allocation20_spill] sm:$0xff] %v4040_v18  ;;  %v453_v38 = vld [vmem:[#allocation5 + $0x2b8] sm:$0xff]  ;;  %v4046_v39 = vpack.c.bf16 %v482_v24, %v478_v20  ;;  %v4049_v42 = vpack.c.bf16 %v444_v35, %v440_v31  ;;  %v448_v58 = vld [vmem:[#allocation5 + $0x290] sm:$0xff] }
  0x86   :  { %v4053_v54 = vpack.c.bf16 %v453_v38, %v449_v36  ;;  %v452_v59 = vld [vmem:[#allocation5 + $0x2b0] sm:$0xff]  ;;  %v457_v61 = vld [vmem:[#allocation5 + $0x2d8] sm:$0xff] }
  0x87   :  { %2949 = vmatpush1.bf16.msra.mxu1 %v3965_v14  ;;  %5066 = vst [vmem:[#allocation21_spill] sm:$0xff] %v4046_v39  ;;  %5067 = vst [vmem:[#allocation22_spill] sm:$0xff] %v4049_v42  ;;  %v461_v5 = vld [vmem:[#allocation5 + $0x2f8] sm:$0xff]  ;;  %v4057_v7 = vpack.c.bf16 %v452_v59, %v448_v58  ;;  %v456_v11 = vld [vmem:[#allocation5 + $0x2d0] sm:$0xff] }
  0x88   :  { %2825 = vmatpush1.bf16.msra.mxu0 %v3924_v22  ;;  %2951 = vmatprep.subr.bf16.mxu1 %v3971_v19  ;;  %5068 = vst [vmem:[#allocation23_spill] sm:$0xff] %v4053_v54  ;;  %v4060_v8 = vpack.c.bf16 %v461_v5, %v457_v61  ;;  %v460_v20 = vld [vmem:[#allocation5 + $0x2f0] sm:$0xff]  ;;  %v465_v24 = vld [vmem:[#allocation5 + $0x318] sm:$0xff] }
  0x89   :  { %2827 = vmatprep.subr.bf16.mxu0 %v3927_v25  ;;  %5069 = vst [vmem:[#allocation24_spill] sm:$0xff] %v4057_v7  ;;  %v469_v31 = vld [vmem:[#allocation5 + $0x338] sm:$0xff]  ;;  %v4063_v35 = vpack.c.bf16 %v460_v20, %v456_v11  ;;  %v464_v38 = vld [vmem:[#allocation5 + $0x310] sm:$0xff] }
  0x8a   :  { %5070 = vst [vmem:[#allocation25_spill] sm:$0xff] %v4060_v8  ;;  %v4066_v36 = vpack.c.bf16 %v469_v31, %v465_v24  ;;  %v473_v58 = vld [vmem:[#allocation5 + $0x358] sm:$0xff] }
  0x8b   :  { %2953 = vmatpush1.bf16.msra.mxu1 %v3977_v28  ;;  %5071 = vst [vmem:[#allocation26_spill] sm:$0xff] %v4063_v35  ;;  %v477_v59 = vld [vmem:[#allocation5 + $0x378] sm:$0xff] }
  0x8c   :  { %2829 = vmatpush1.bf16.msra.mxu0 %v3930_v34  ;;  %2955 = vmatprep.subr.bf16.mxu1 %v3983_v33  ;;  %5072 = vst [vmem:[#allocation27_spill] sm:$0xff] %v4066_v36  ;;  %v4072_v5 = vpack.c.bf16 %v477_v59, %v473_v58  ;;  %v481_v11 = vld [vmem:[#allocation5 + $0x398] sm:$0xff]  ;;  %v491_v58 = vld [vmem:[#allocation5 + $0x3e8] sm:$0xff] }
  0x8d   :  { %2831 = vmatprep.subr.bf16.mxu0 %v3933_v37  ;;  %v485_v20 = vld [vmem:[#allocation5 + $0x3b8] sm:$0xff] }
  0x8e   :  { %5074 = vst [vmem:[#allocation29_spill] sm:$0xff] %v4072_v5  ;;  %v4078_v31 = vpack.c.bf16 %v485_v20, %v481_v11  ;;  %v489_v59 = vld [vmem:[#allocation5 + $0x3d8] sm:$0xff] }
  0x8f   :  { %2957 = vmatpush1.bf16.msra.mxu1 %v3989_v44 }
  0x90   :  { %2833 = vmatpush1.bf16.msra.mxu0 %v3938_v47  ;;  %2959 = vmatprep.subr.bf16.mxu1 %v3995_v55  ;;  %5076 = vst [vmem:[#allocation31_spill] sm:$0xff] %v4078_v31 }
  0x91   :  { %2835 = vmatprep.subr.bf16.mxu0 %v3943_v52 }
  0x93   :  { %2961 = vmatpush1.bf16.msra.mxu1 %v4001_v4 }
  0x94   :  { %2837 = vmatpush1.bf16.msra.mxu0 %v3950_v63  ;;  %2963 = vmatprep.subr.bf16.mxu1 %v4007_v9 }
  0x95   :  { %2839 = vmatprep.subr.bf16.mxu0 %v3956_v3 }
  0x97   :  { %2965 = vmatpush1.bf16.msra.mxu1 %v4013_v23 }
  0x98   :  { %2841 = vmatpush1.bf16.msra.mxu0 %v3962_v12  ;;  %2967 = vmatprep.subr.bf16.mxu1 %v4019_v32 }
  0x99   :  { %2843 = vmatprep.subr.bf16.mxu0 %v3968_v16 }
  0x9b   :  { %2969 = vmatpush1.bf16.msra.mxu1 %v4025_v51 }
  0x9c   :  { %2845 = vmatpush1.bf16.msra.mxu0 %v3974_v27  ;;  %2971 = vmatprep.subr.bf16.mxu1 %v4031_v60 }
  0x9d   :  { %2847 = vmatprep.subr.bf16.mxu0 %v3980_v30 }
  0x9f   :  { %2973 = vmatpush1.bf16.msra.mxu1 %v4037_v17 }
  0xa0   :  { %2849 = vmatpush1.bf16.msra.mxu0 %v3986_v43  ;;  %2975 = vmatprep.subr.bf16.mxu1 %v4043_v29 }
  0xa1   :  { %2851 = vmatprep.subr.bf16.mxu0 %v3992_v46  ;;  %v511_v46 = vld [vmem:[#allocation5 + $0x488] sm:$0xff] }
  0xa3   :  { %2977 = vmatpush1.bf16.msra.mxu1 %v4049_v42 }
  0xa4   :  { %2853 = vmatpush1.bf16.msra.mxu0 %v3998_v2  ;;  %2979 = vmatprep.subr.bf16.mxu1 %v4053_v54  ;;  %v504_v2 = vld [vmem:[#allocation5 + $0x450] sm:$0xff] }
  0xa5   :  { %2855 = vmatprep.subr.bf16.mxu0 %v4004_v49  ;;  %v508_v54 = vld [vmem:[#allocation5 + $0x470] sm:$0xff] }
  0xa7   :  { %2981 = vmatpush1.bf16.msra.mxu1 %v4057_v7 }
  0xa8   :  { %2857 = vmatpush1.bf16.msra.mxu0 %v4010_v21  ;;  %2983 = vmatprep.subr.bf16.mxu1 %v4060_v8  ;;  %v502_v8 = vld [vmem:[#allocation5 + $0x440] sm:$0xff] }
  0xa9   :  { %2859 = vmatprep.subr.bf16.mxu0 %v4016_v26 }
  0xab   :  { %2985 = vmatpush1.bf16.msra.mxu1 %v4063_v35 }
  0xac   :  { %2861 = vmatpush1.bf16.msra.mxu0 %v4022_v45  ;;  %2987 = vmatprep.subr.bf16.mxu1 %v4066_v36  ;;  %v484_v45 = vld [vmem:[#allocation5 + $0x3b0] sm:$0xff] }
  0xad   :  { %2863 = vmatprep.subr.bf16.mxu0 %v4028_v57  ;;  %v480_v57 = vld [vmem:[#allocation5 + $0x390] sm:$0xff] }
  0xae   :  { %v488_v36 = vld [vmem:[#allocation5 + $0x3d0] sm:$0xff] }
  0xb0   :  { %2865 = vmatpush1.bf16.msra.mxu0 %v4034_v15  ;;  %v476_v15 = vld [vmem:[#allocation5 + $0x370] sm:$0xff] }
  0xb1   :  { %2867 = vmatprep.subr.bf16.mxu0 %v4040_v18  ;;  %v472_v18 = vld [vmem:[#allocation5 + $0x350] sm:$0xff] }
  0xb2   :  { %v4075_v24 = vpack.c.bf16 %v476_v15, %v472_v18  ;;  %v493_v15 = vld [vmem:[#allocation5 + $0x3f8] sm:$0xff]  ;;  %v486_v18 = vld [vmem:[#allocation5 + $0x3c0] sm:$0xff] }
  0xb3   :  { %v4087_v11 = vpack.c.bf16 %v493_v15, %v489_v59  ;;  %v501_v59 = vld [vmem:[#allocation5 + $0x438] sm:$0xff] }
  0xb4   :  { %2869 = vmatpush1.bf16.msra.mxu0 %v4046_v39  ;;  %v468_v39 = vld [vmem:[#allocation5 + $0x330] sm:$0xff]  ;;  %5075 = vst [vmem:[#allocation30_spill] sm:$0xff] %v4075_v24 }
  0xb5   :  { %v4069_v61 = vpack.c.bf16 %v468_v39, %v464_v38  ;;  %v4081_v39 = vpack.c.bf16 %v484_v45, %v480_v57  ;;  %v487_v38 = vld [vmem:[#allocation5 + $0x3c8] sm:$0xff]  ;;  %5079 = vst [vmem:[#allocation34_spill] sm:$0xff] %v4087_v11 }
  0xb6   :  { %v495_v57 = vld [vmem:[#allocation5 + $0x408] sm:$0xff] }
  0xb7   :  { %5073 = vst [vmem:[#allocation28_spill] sm:$0xff] %v4069_v61  ;;  %2989 = vmatpush1.bf16.msra.mxu1 %v4069_v61  ;;  %5077 = vst [vmem:[#allocation32_spill] sm:$0xff] %v4081_v39  ;;  %v4085_v61 = vpack.c.bf16 %v491_v58, %v487_v38  ;;  %v499_v38 = vld [vmem:[#allocation5 + $0x428] sm:$0xff]  ;;  %v497_v58 = vld [vmem:[#allocation5 + $0x418] sm:$0xff] }
  0xb8   :  { %2991 = vmatprep.subr.bf16.mxu1 %v4072_v5  ;;  %v490_v5 = vld [vmem:[#allocation5 + $0x3e0] sm:$0xff] }
  0xb9   :  { %5078 = vst [vmem:[#allocation33_spill] sm:$0xff] %v4085_v61  ;;  %v4089_v20 = vpack.c.bf16 %v490_v5, %v486_v18  ;;  %2871 = vmatprep.subr.bf16.mxu0 %v4085_v61  ;;  %v4099_v5 = vpack.c.bf16 %v501_v59, %v497_v58  ;;  %v77_v18 = vld [vmem:[%s4973_s8 + $0x8] sm:$0x3f]  ;;  %v494_v58 = vld [vmem:[#allocation5 + $0x400] sm:$0xff]  ;;  %v509_v61 = vld [vmem:[#allocation5 + $0x478] sm:$0xff] }
  0xba   :  { %v498_v59 = vld [vmem:[#allocation5 + $0x420] sm:$0xff] }
  0xbb   :  { %2993 = vmatpush1.bf16.msra.mxu1 %v4075_v24  ;;  %5080 = vst [vmem:[#allocation35_spill] sm:$0xff] %v4089_v20  ;;  %v492_v24 = vld [vmem:[#allocation5 + $0x3f0] sm:$0xff]  ;;  %2873 = vmatpush1.bf16.msra.mxu0 %v4089_v20  ;;  %5083 = vst [vmem:[#allocation38_spill] sm:$0xff] %v4099_v5  ;;  %v4118_v35 = vpack.c.bf16 %v498_v59, %v494_v58  ;;  %v517_v58 = vld [vmem:[#allocation5 + $0x4b8] sm:$0xff] }
  0xbc   :  { %2995 = vmatprep.subr.bf16.mxu1 %v4078_v31  ;;  %v4092_v45 = vpack.c.bf16 %v492_v24, %v488_v36  ;;  %v208_v36 = vlaneseq  ;;  %v516_v59 = vld [vmem:[#allocation5 + $0x4b0] sm:$0xff] }
  0xbd   :  { %5086 = vst [vmem:[#allocation41_spill] sm:$0xff] %v4118_v35 }
  0xbe   :  { %5081 = vst [vmem:[#allocation36_spill] sm:$0xff] %v4092_v45  ;;  %v4103_v24 = vshrl.u32 %v208_v36, 7  ;;  %v500_v36 = vld [vmem:[#allocation5 + $0x430] sm:$0xff] }
  0xbf   :  { %2997 = vmatpush1.bf16.msra.mxu1 %v4081_v39  ;;  %v4097_v39 = vpack.c.bf16 %v499_v38, %v495_v57  ;;  %v76_v57 = vld [vmem:[%s4973_s8] sm:$0x3f] }
  0xc0   :  { %2999 = vmatprep.subr.bf16.mxu1 %v4087_v11  ;;  %5084 = vst [vmem:[#allocation39_spill] sm:$0xff] %v4103_v24  ;;  %v4106_v15 = vsub.s32 0, %v4103_v24  ;;  %v507_v24 = vld [vmem:[#allocation5 + $0x468] sm:$0xff]  ;;  %v505_v11 = vld [vmem:[#allocation5 + $0x458] sm:$0xff] }
  0xc1   :  { %5082 = vst [vmem:[#allocation37_spill] sm:$0xff] %v4097_v39  ;;  %2875 = vmatprep.subr.bf16.mxu0 %v4097_v39  ;;  %v496_v39 = vld [vmem:[#allocation5 + $0x410] sm:$0xff] }
  0xc2   :  { %v215_v38 = vrot.slane %v77_v18, %v4106_v15  ;;  %v4120_v21 = vpack.c.bf16 %v500_v36, %v496_v39  ;;  %v506_v18 = vld [vmem:[#allocation5 + $0x460] sm:$0xff]  ;;  %v4136_v39 = vpack.c.bf16 %v508_v54, %v504_v2  ;;  %v519_v36 = vld [vmem:[#allocation5 + $0x4c8] sm:$0xff] }
  0xc3   :  { %3001 = vmatpush1.bf16.msra.mxu1 %v4092_v45  ;;  %v503_v45 = vld [vmem:[#allocation5 + $0x448] sm:$0xff] }
  0xc4   :  { %3003 = vmatprep.subr.bf16.mxu1 %v4099_v5  ;;  %v211_v5 = vrot.slane %v76_v57, %v4106_v15  ;;  %5087 = vst [vmem:[#allocation42_spill] sm:$0xff] %v4120_v21  ;;  %v4124_v7 = vpack.c.bf16 %v507_v24, %v503_v45  ;;  %v4126_v57 = vpack.c.bf16 %v509_v61, %v505_v11  ;;  %5092 = vst [vmem:[#allocation47_spill] sm:$0xff] %v4136_v39  ;;  %v510_v11 = vld [vmem:[#allocation5 + $0x480] sm:$0xff]  ;;  %v512_v24 = vld [vmem:[#allocation5 + $0x490] sm:$0xff] }
  0xc5   :  { %v4134_v61 = vpack.c.bf16 %v506_v18, %v502_v8  ;;  %v4148_v54 = vpack.c.bf16 %v516_v59, %v512_v24  ;;  %v518_v8 = vld [vmem:[#allocation5 + $0x4c0] sm:$0xff] }
  0xc6   :  { %5089 = vst [vmem:[#allocation44_spill] sm:$0xff] %v4124_v7  ;;  %5090 = vst [vmem:[#allocation45_spill] sm:$0xff] %v4126_v57  ;;  %v522_v18 = vld [vmem:[#allocation5 + $0x4e0] sm:$0xff] }
  0xc7   :  { %5091 = vst [vmem:[#allocation46_spill] sm:$0xff] %v4134_v61  ;;  %5096 = vst [vmem:[#allocation51_spill] sm:$0xff] %v4148_v54  ;;  %v526_v24 = vld [vmem:[#allocation5 + $0x500] sm:$0xff] }
  0xc8   :  { %v530_v59 = vld [vmem:[#allocation5 + $0x520] sm:$0xff] }
 0x14e   :  { %v290_v20 = vpop.f32.mrb[0].mxu0 }
 0x14f   :  { %v292_v31 = vpop.f32.mrb[1].mxu0  ;;  %v4122_v49 = vadd.f32 %v290_v20, %v211_v5  ;;  %v514_v20 = vld [vmem:[#allocation5 + $0x4a0] sm:$0xff] }
 0x150   :  { %v4116_v26 = vadd.f32 %v292_v31, %v215_v38  ;;  %v515_v31 = vld [vmem:[#allocation5 + $0x4a8] sm:$0xff]  ;;  %v513_v38 = vld [vmem:[#allocation5 + $0x498] sm:$0xff]  ;;  %v4146_v2 = vpack.c.bf16 %v514_v20, %v510_v11  ;;  %v4158_v11 = vpack.c.bf16 %v522_v18, %v518_v8  ;;  %v4173_v18 = vpack.c.bf16 %v530_v59, %v526_v24 }
 0x151   :  { %5088 = vst [vmem:[#allocation43_spill] sm:$0xff] %v4122_v49  ;;  %v4140_v45 = vpack.c.bf16 %v515_v31, %v511_v46  ;;  %v4142_v5 = vpack.c.bf16 %v517_v58, %v513_v38  ;;  %v520_v38 = vld [vmem:[#allocation5 + $0x4d0] sm:$0xff]  ;;  %v79_v8 = vld [vmem:[%s4973_s8 + $0x18] sm:$0x3f] }
 0x152   :  { %5085 = vst [vmem:[#allocation40_spill] sm:$0xff] %v4116_v26  ;;  %686 = vmatprep.mubr.f32.mxu0 %v4116_v26  ;;  %828 = vmatprep.mubr.f32.mxu1 %v4116_v26  ;;  %v521_v26 = vld [vmem:[#allocation5 + $0x4d8] sm:$0xff]  ;;  %5095 = vst [vmem:[#allocation50_spill] sm:$0xff] %v4146_v2  ;;  %v524_v58 = vld [vmem:[#allocation5 + $0x4f0] sm:$0xff] }
 0x153   :  { %687 = vmatmul.mubr.f32.vlgmr.msra.gmra.mrb[2].mxu0 %v4122_v49  ;;  %829 = vmatmul.mubr.f32.vlgmr.msra.gmra.mrb[2].mxu1 %v4122_v49  ;;  %5093 = vst [vmem:[#allocation48_spill] sm:$0xff] %v4140_v45  ;;  %5094 = vst [vmem:[#allocation49_spill] sm:$0xff] %v4142_v5  ;;  %v4160_v20 = vpack.c.bf16 %v524_v58, %v520_v38  ;;  %v536_v58 = vld [vmem:[#allocation5 + $0x550] sm:$0xff]  ;;  %v545_v24 = vld [vmem:[#allocation5 + $0x598] sm:$0xff] }
 0x154   :  { %2877 = vmatpush1.bf16.msra.mxu0 %v4118_v35  ;;  %3005 = vmatpush1.bf16.msra.mxu1 %v4120_v21  ;;  %v523_v35 = vld [vmem:[#allocation5 + $0x4e8] sm:$0xff]  ;;  %v525_v21 = vld [vmem:[#allocation5 + $0x4f8] sm:$0xff]  ;;  %5099 = vst [vmem:[#allocation54_spill] sm:$0xff] %v4158_v11  ;;  %5103 = vst [vmem:[#allocation58_spill] sm:$0xff] %v4173_v18 }
 0x155   :  { %2879 = vmatprep.subr.bf16.mxu0 %v4124_v7  ;;  %3007 = vmatprep.subr.bf16.mxu1 %v4126_v57  ;;  %v4152_v46 = vpack.c.bf16 %v523_v35, %v519_v36  ;;  %v4154_v31 = vpack.c.bf16 %v525_v21, %v521_v26  ;;  %v527_v57 = vld [vmem:[#allocation5 + $0x508] sm:$0xff]  ;;  %v529_v7 = vld [vmem:[#allocation5 + $0x518] sm:$0xff]  ;;  %5100 = vst [vmem:[#allocation55_spill] sm:$0xff] %v4160_v20  ;;  %v528_v35 = vld [vmem:[#allocation5 + $0x510] sm:$0xff] }
 0x156   :  { %v532_v36 = vld [vmem:[#allocation5 + $0x530] sm:$0xff]  ;;  %v549_v59 = vld [vmem:[#allocation5 + $0x5b8] sm:$0xff] }
 0x157   :  { %5097 = vst [vmem:[#allocation52_spill] sm:$0xff] %v4152_v46  ;;  %5098 = vst [vmem:[#allocation53_spill] sm:$0xff] %v4154_v31  ;;  %v4175_v38 = vpack.c.bf16 %v532_v36, %v528_v35  ;;  %v4184_v35 = vpop.f32.mrb[0].mxu1  ;;  %v548_v49 = vld [vmem:[#allocation5 + $0x5b0] sm:$0xff] }
 0x158   :  { %2881 = vmatpush1.bf16.msra.mxu0 %v4134_v61  ;;  %3009 = vmatpush1.bf16.msra.mxu1 %v4136_v39  ;;  %v531_v61 = vld [vmem:[#allocation5 + $0x528] sm:$0xff]  ;;  %v533_v39 = vld [vmem:[#allocation5 + $0x538] sm:$0xff] }
 0x159   :  { %2883 = vmatprep.subr.bf16.mxu0 %v4140_v45  ;;  %3011 = vmatprep.subr.bf16.mxu1 %v4142_v5  ;;  %v4164_v21 = vpack.c.bf16 %v531_v61, %v527_v57  ;;  %v4166_v26 = vpack.c.bf16 %v533_v39, %v529_v7  ;;  %v535_v5 = vld [vmem:[#allocation5 + $0x548] sm:$0xff]  ;;  %v537_v45 = vld [vmem:[#allocation5 + $0x558] sm:$0xff]  ;;  %5104 = vst [vmem:[#allocation59_spill] sm:$0xff] %v4175_v38  ;;  %v534_v57 = vld [vmem:[#allocation5 + $0x540] sm:$0xff] }
 0x15a   :  { %v538_v7 = vld [vmem:[#allocation5 + $0x560] sm:$0xff] }
 0x15b   :  { %5101 = vst [vmem:[#allocation56_spill] sm:$0xff] %v4164_v21  ;;  %5102 = vst [vmem:[#allocation57_spill] sm:$0xff] %v4166_v26  ;;  %v4188_v36 = vpack.c.bf16 %v538_v7, %v534_v57  ;;  %v555_v57 = vld [vmem:[#allocation5 + $0x5e8] sm:$0xff]  ;;  %v553_v7 = vld [vmem:[#allocation5 + $0x5d8] sm:$0xff] }
 0x15c   :  { %2885 = vmatpush1.bf16.msra.mxu0 %v4146_v2  ;;  %3013 = vmatpush1.bf16.msra.mxu1 %v4148_v54  ;;  %v539_v2 = vld [vmem:[#allocation5 + $0x568] sm:$0xff]  ;;  %v541_v54 = vld [vmem:[#allocation5 + $0x578] sm:$0xff] }
 0x15d   :  { %2887 = vmatprep.subr.bf16.mxu0 %v4152_v46  ;;  %3015 = vmatprep.subr.bf16.mxu1 %v4154_v31  ;;  %v4179_v61 = vpack.c.bf16 %v539_v2, %v535_v5  ;;  %v4181_v39 = vpack.c.bf16 %v541_v54, %v537_v45  ;;  %v540_v31 = vld [vmem:[#allocation5 + $0x570] sm:$0xff]  ;;  %v543_v46 = vld [vmem:[#allocation5 + $0x588] sm:$0xff]  ;;  %5107 = vst [vmem:[#allocation62_spill] sm:$0xff] %v4188_v36  ;;  %v542_v45 = vld [vmem:[#allocation5 + $0x580] sm:$0xff]  ;;  %v363_v54 = vpop.f32.mrb[1].mxu1 }
 0x15e   :  { %v4190_v5 = vpack.c.bf16 %v540_v31, %v536_v58  ;;  %v546_v2 = vld [vmem:[#allocation5 + $0x5a0] sm:$0xff]  ;;  %v557_v31 = vld [vmem:[#allocation5 + $0x5f8] sm:$0xff] }
 0x15f   :  { %5105 = vst [vmem:[#allocation60_spill] sm:$0xff] %v4179_v61  ;;  %5106 = vst [vmem:[#allocation61_spill] sm:$0xff] %v4181_v39  ;;  %v550_v58 = vld [vmem:[#allocation5 + $0x5c0] sm:$0xff] }
 0x160   :  { %2889 = vmatpush1.bf16.msra.mxu0 %v4158_v11  ;;  %3017 = vmatpush1.bf16.msra.mxu1 %v4160_v20  ;;  %v223_v11 = vrot.slane %v79_v8, %v4106_v15  ;;  %v547_v20 = vld [vmem:[#allocation5 + $0x5a8] sm:$0xff]  ;;  %5108 = vst [vmem:[#allocation63_spill] sm:$0xff] %v4190_v5 }
 0x161   :  { %2891 = vmatprep.subr.bf16.mxu0 %v4164_v21  ;;  %3019 = vmatprep.subr.bf16.mxu1 %v4166_v26  ;;  %v4194_v8 = vpack.c.bf16 %v547_v20, %v543_v46  ;;  %v4196_v26 = vpack.c.bf16 %v549_v59, %v545_v24  ;;  %v544_v21 = vld [vmem:[#allocation5 + $0x590] sm:$0xff]  ;;  %v4204_v46 = vpack.c.bf16 %v546_v2, %v542_v45  ;;  %v554_v24 = vld [vmem:[#allocation5 + $0x5e0] sm:$0xff] }
 0x162   :  { %v4198_v42 = vadd.f32 %v363_v54, %v223_v11  ;;  %v4206_v20 = vpack.c.bf16 %v548_v49, %v544_v21  ;;  %v4212_v59 = vpack.c.bf16 %v557_v31, %v553_v7  ;;  %v552_v54 = vld [vmem:[#allocation5 + $0x5d0] sm:$0xff]  ;;  %v4216_v49 = vpack.c.bf16 %v554_v24, %v550_v58  ;;  %v558_v45 = vld [vmem:[#allocation5 + $0x600] sm:$0xff] }
 0x163   :  { %5109 = vst [vmem:[#allocation64_spill] sm:$0xff] %v4194_v8  ;;  %5110 = vst [vmem:[#allocation65_spill] sm:$0xff] %v4196_v26  ;;  %v562_v2 = vld [vmem:[#allocation5 + $0x620] sm:$0xff]  ;;  %v560_v7 = vld [vmem:[#allocation5 + $0x610] sm:$0xff] }
 0x164   :  { %2893 = vmatpush1.bf16.msra.mxu0 %v4173_v18  ;;  %3021 = vmatpush1.bf16.msra.mxu1 %v4175_v38  ;;  %v551_v18 = vld [vmem:[#allocation5 + $0x5c8] sm:$0xff]  ;;  %5111 = vst [vmem:[#allocation66_spill] sm:$0xff] %v4204_v46  ;;  %5112 = vst [vmem:[#allocation67_spill] sm:$0xff] %v4206_v20  ;;  %v561_v38 = vld [vmem:[#allocation5 + $0x618] sm:$0xff] }
 0x165   :  { %2895 = vmatprep.subr.bf16.mxu0 %v4179_v61  ;;  %3023 = vmatprep.subr.bf16.mxu1 %v4181_v39  ;;  %v4210_v11 = vpack.c.bf16 %v555_v57, %v551_v18  ;;  %5114 = vst [vmem:[#allocation69_spill] sm:$0xff] %v4212_v59  ;;  %v556_v39 = vld [vmem:[#allocation5 + $0x5f0] sm:$0xff]  ;;  %v559_v61 = vld [vmem:[#allocation5 + $0x608] sm:$0xff]  ;;  %5115 = vst [vmem:[#allocation70_spill] sm:$0xff] %v4216_v49 }
 0x166   :  { %757 = vmatprep.mubr.f32.mxu0 %v4198_v42  ;;  %899 = vmatprep.mubr.f32.mxu1 %v4198_v42  ;;  %v4218_v21 = vpack.c.bf16 %v556_v39, %v552_v54  ;;  %v564_v31 = vld [vmem:[#allocation5 + $0x630] sm:$0xff]  ;;  %v4228_v39 = vpack.c.bf16 %v562_v2, %v558_v45  ;;  %v566_v24 = vld [vmem:[#allocation5 + $0x640] sm:$0xff] }
 0x167   :  { %5113 = vst [vmem:[#allocation68_spill] sm:$0xff] %v4210_v11  ;;  %v4230_v58 = vpack.c.bf16 %v564_v31, %v560_v7  ;;  %v570_v54 = vld [vmem:[#allocation5 + $0x660] sm:$0xff] }
 0x168   :  { %2897 = vmatpush1.bf16.msra.mxu0 %v4188_v36  ;;  %3025 = vmatpush1.bf16.msra.mxu1 %v4190_v5  ;;  %v563_v36 = vld [vmem:[#allocation5 + $0x628] sm:$0xff]  ;;  %v565_v5 = vld [vmem:[#allocation5 + $0x638] sm:$0xff]  ;;  %5116 = vst [vmem:[#allocation71_spill] sm:$0xff] %v4218_v21  ;;  %5119 = vst [vmem:[#allocation74_spill] sm:$0xff] %v4228_v39  ;;  %v4240_v45 = vpack.c.bf16 %v570_v54, %v566_v24 }
 0x169   :  { %2899 = vmatprep.subr.bf16.mxu0 %v4194_v8  ;;  %3027 = vmatprep.subr.bf16.mxu1 %v4196_v26  ;;  %v4222_v18 = vpack.c.bf16 %v563_v36, %v559_v61  ;;  %v4224_v57 = vpack.c.bf16 %v565_v5, %v561_v38  ;;  %v567_v26 = vld [vmem:[#allocation5 + $0x648] sm:$0xff]  ;;  %v569_v8 = vld [vmem:[#allocation5 + $0x658] sm:$0xff]  ;;  %5120 = vst [vmem:[#allocation75_spill] sm:$0xff] %v4230_v58  ;;  %v568_v36 = vld [vmem:[#allocation5 + $0x650] sm:$0xff] }
 0x16a   :  { %v572_v5 = vld [vmem:[#allocation5 + $0x670] sm:$0xff]  ;;  %5123 = vst [vmem:[#allocation78_spill] sm:$0xff] %v4240_v45  ;;  %v574_v7 = vld [vmem:[#allocation5 + $0x680] sm:$0xff] }
 0x16b   :  { %5117 = vst [vmem:[#allocation72_spill] sm:$0xff] %v4222_v18  ;;  %5118 = vst [vmem:[#allocation73_spill] sm:$0xff] %v4224_v57  ;;  %v4242_v2 = vpack.c.bf16 %v572_v5, %v568_v36  ;;  %v578_v31 = vld [vmem:[#allocation5 + $0x6a0] sm:$0xff] }
 0x16c   :  { %2901 = vmatpush1.bf16.msra.mxu0 %v4204_v46  ;;  %3029 = vmatpush1.bf16.msra.mxu1 %v4206_v20  ;;  %v571_v46 = vld [vmem:[#allocation5 + $0x668] sm:$0xff]  ;;  %v573_v20 = vld [vmem:[#allocation5 + $0x678] sm:$0xff]  ;;  %v4252_v24 = vpack.c.bf16 %v578_v31, %v574_v7  ;;  %v582_v36 = vld [vmem:[#allocation5 + $0x6c0] sm:$0xff] }
 0x16d   :  { %2903 = vmatprep.subr.bf16.mxu0 %v4210_v11  ;;  %3031 = vmatprep.subr.bf16.mxu1 %v4212_v59  ;;  %v4234_v38 = vpack.c.bf16 %v571_v46, %v567_v26  ;;  %v4236_v61 = vpack.c.bf16 %v573_v20, %v569_v8  ;;  %v575_v59 = vld [vmem:[#allocation5 + $0x688] sm:$0xff]  ;;  %v577_v11 = vld [vmem:[#allocation5 + $0x698] sm:$0xff]  ;;  %5124 = vst [vmem:[#allocation79_spill] sm:$0xff] %v4242_v2  ;;  %v576_v46 = vld [vmem:[#allocation5 + $0x690] sm:$0xff] }
 0x16e   :  { %v580_v20 = vld [vmem:[#allocation5 + $0x6b0] sm:$0xff]  ;;  %5127 = vst [vmem:[#allocation82_spill] sm:$0xff] %v4252_v24  ;;  %v586_v5 = vld [vmem:[#allocation5 + $0x6e0] sm:$0xff] }
 0x16f   :  { %5121 = vst [vmem:[#allocation76_spill] sm:$0xff] %v4234_v38  ;;  %5122 = vst [vmem:[#allocation77_spill] sm:$0xff] %v4236_v61  ;;  %v4254_v54 = vpack.c.bf16 %v580_v20, %v576_v46  ;;  %v4264_v7 = vpack.c.bf16 %v586_v5, %v582_v36  ;;  %v590_v46 = vld [vmem:[#allocation5 + $0x700] sm:$0xff] }
 0x170   :  { %2905 = vmatpush1.bf16.msra.mxu0 %v4216_v49  ;;  %3033 = vmatpush1.bf16.msra.mxu1 %v4218_v21  ;;  %v579_v49 = vld [vmem:[#allocation5 + $0x6a8] sm:$0xff]  ;;  %v581_v21 = vld [vmem:[#allocation5 + $0x6b8] sm:$0xff]  ;;  %v594_v20 = vld [vmem:[#allocation5 + $0x720] sm:$0xff] }
 0x171   :  { %2907 = vmatprep.subr.bf16.mxu0 %v4222_v18  ;;  %3035 = vmatprep.subr.bf16.mxu1 %v4224_v57  ;;  %v4246_v26 = vpack.c.bf16 %v579_v49, %v575_v59  ;;  %v4248_v8 = vpack.c.bf16 %v581_v21, %v577_v11  ;;  %v583_v57 = vld [vmem:[#allocation5 + $0x6c8] sm:$0xff]  ;;  %v585_v18 = vld [vmem:[#allocation5 + $0x6d8] sm:$0xff]  ;;  %5128 = vst [vmem:[#allocation83_spill] sm:$0xff] %v4254_v54  ;;  %v584_v49 = vld [vmem:[#allocation5 + $0x6d0] sm:$0xff] }
 0x172   :  { %v588_v21 = vld [vmem:[#allocation5 + $0x6f0] sm:$0xff]  ;;  %5131 = vst [vmem:[#allocation86_spill] sm:$0xff] %v4264_v7  ;;  %v4276_v36 = vpack.c.bf16 %v594_v20, %v590_v46 }
 0x173   :  { %5125 = vst [vmem:[#allocation80_spill] sm:$0xff] %v4246_v26  ;;  %5126 = vst [vmem:[#allocation81_spill] sm:$0xff] %v4248_v8  ;;  %v4266_v31 = vpack.c.bf16 %v588_v21, %v584_v49  ;;  %v598_v49 = vld [vmem:[#allocation5 + $0x740] sm:$0xff] }
 0x174   :  { %2909 = vmatpush1.bf16.msra.mxu0 %v4228_v39  ;;  %3037 = vmatpush1.bf16.msra.mxu1 %v4230_v58  ;;  %v587_v39 = vld [vmem:[#allocation5 + $0x6e8] sm:$0xff]  ;;  %v589_v58 = vld [vmem:[#allocation5 + $0x6f8] sm:$0xff]  ;;  %5135 = vst [vmem:[#allocation90_spill] sm:$0xff] %v4276_v36  ;;  %v602_v21 = vld [vmem:[#allocation5 + $0x760] sm:$0xff] }
 0x175   :  { %2911 = vmatprep.subr.bf16.mxu0 %v4234_v38  ;;  %3039 = vmatprep.subr.bf16.mxu1 %v4236_v61  ;;  %v4258_v11 = vpack.c.bf16 %v587_v39, %v583_v57  ;;  %v4260_v59 = vpack.c.bf16 %v589_v58, %v585_v18  ;;  %v591_v61 = vld [vmem:[#allocation5 + $0x708] sm:$0xff]  ;;  %v593_v38 = vld [vmem:[#allocation5 + $0x718] sm:$0xff]  ;;  %5132 = vst [vmem:[#allocation87_spill] sm:$0xff] %v4266_v31  ;;  %v592_v39 = vld [vmem:[#allocation5 + $0x710] sm:$0xff] }
 0x176   :  { %v596_v58 = vld [vmem:[#allocation5 + $0x730] sm:$0xff]  ;;  %v4288_v46 = vpack.c.bf16 %v602_v21, %v598_v49 }
 0x177   :  { %5129 = vst [vmem:[#allocation84_spill] sm:$0xff] %v4258_v11  ;;  %5130 = vst [vmem:[#allocation85_spill] sm:$0xff] %v4260_v59  ;;  %v4278_v5 = vpack.c.bf16 %v596_v58, %v592_v39  ;;  %v606_v39 = vld [vmem:[#allocation5 + $0x780] sm:$0xff] }
 0x178   :  { %2913 = vmatpush1.bf16.msra.mxu0 %v4240_v45  ;;  %3041 = vmatpush1.bf16.msra.mxu1 %v4242_v2  ;;  %v595_v45 = vld [vmem:[#allocation5 + $0x728] sm:$0xff]  ;;  %v597_v2 = vld [vmem:[#allocation5 + $0x738] sm:$0xff]  ;;  %v610_v58 = vld [vmem:[#allocation5 + $0x7a0] sm:$0xff] }
 0x179   :  { %2915 = vmatprep.subr.bf16.mxu0 %v4246_v26  ;;  %3043 = vmatprep.subr.bf16.mxu1 %v4248_v8  ;;  %v4270_v18 = vpack.c.bf16 %v595_v45, %v591_v61  ;;  %v4272_v57 = vpack.c.bf16 %v597_v2, %v593_v38  ;;  %v599_v8 = vld [vmem:[#allocation5 + $0x748] sm:$0xff]  ;;  %v601_v26 = vld [vmem:[#allocation5 + $0x758] sm:$0xff]  ;;  %5136 = vst [vmem:[#allocation91_spill] sm:$0xff] %v4278_v5  ;;  %v600_v45 = vld [vmem:[#allocation5 + $0x750] sm:$0xff] }
 0x17a   :  { %v604_v2 = vld [vmem:[#allocation5 + $0x770] sm:$0xff]  ;;  %v4300_v49 = vpack.c.bf16 %v610_v58, %v606_v39 }
 0x17b   :  { %5133 = vst [vmem:[#allocation88_spill] sm:$0xff] %v4270_v18  ;;  %5134 = vst [vmem:[#allocation89_spill] sm:$0xff] %v4272_v57  ;;  %v4290_v20 = vpack.c.bf16 %v604_v2, %v600_v45  ;;  %v614_v45 = vld [vmem:[#allocation5 + $0x7c0] sm:$0xff]  ;;  %v620_v2 = vld [vmem:[#allocation5 + $0x7f0] sm:$0xff] }
 0x17c   :  { %2917 = vmatpush1.bf16.msra.mxu0 %v4252_v24  ;;  %3045 = vmatpush1.bf16.msra.mxu1 %v4254_v54  ;;  %v603_v24 = vld [vmem:[#allocation5 + $0x768] sm:$0xff]  ;;  %v605_v54 = vld [vmem:[#allocation5 + $0x778] sm:$0xff] }
 0x17d   :  { %2919 = vmatprep.subr.bf16.mxu0 %v4258_v11  ;;  %3047 = vmatprep.subr.bf16.mxu1 %v4260_v59  ;;  %v4282_v38 = vpack.c.bf16 %v603_v24, %v599_v8  ;;  %v4284_v61 = vpack.c.bf16 %v605_v54, %v601_v26  ;;  %v607_v59 = vld [vmem:[#allocation5 + $0x788] sm:$0xff]  ;;  %v609_v11 = vld [vmem:[#allocation5 + $0x798] sm:$0xff]  ;;  %5137 = vst [vmem:[#allocation92_spill] sm:$0xff] %v4290_v20  ;;  %v608_v24 = vld [vmem:[#allocation5 + $0x790] sm:$0xff] }
 0x17e   :  { %v612_v54 = vld [vmem:[#allocation5 + $0x7b0] sm:$0xff] }
 0x17f   :  { %v4302_v21 = vpack.c.bf16 %v612_v54, %v608_v24  ;;  %v5172_v24 = vld [vmem:[#allocation47_spill] sm:$0xff]  ;;  %v5173_v54 = vld [vmem:[#allocation48_spill] sm:$0xff] }
 0x180   :  { %2921 = vmatpush1.bf16.msra.mxu0 %v4264_v7  ;;  %3049 = vmatpush1.bf16.msra.mxu1 %v4266_v31  ;;  %v611_v7 = vld [vmem:[#allocation5 + $0x7a8] sm:$0xff]  ;;  %v613_v31 = vld [vmem:[#allocation5 + $0x7b8] sm:$0xff] }
 0x181   :  { %2923 = vmatprep.subr.bf16.mxu0 %v4270_v18  ;;  %3051 = vmatprep.subr.bf16.mxu1 %v4272_v57  ;;  %v4294_v26 = vpack.c.bf16 %v611_v7, %v607_v59  ;;  %v4296_v8 = vpack.c.bf16 %v613_v31, %v609_v11  ;;  %v615_v57 = vld [vmem:[#allocation5 + $0x7c8] sm:$0xff]  ;;  %v617_v18 = vld [vmem:[#allocation5 + $0x7d8] sm:$0xff]  ;;  %v618_v7 = vld [vmem:[#allocation5 + $0x7e0] sm:$0xff] }
 0x182   :  { %v616_v31 = vld [vmem:[#allocation5 + $0x7d0] sm:$0xff]  ;;  %v4317_v39 = vpack.c.bf16 %v618_v7, %v614_v45  ;;  %v5175_v7 = vld [vmem:[#allocation50_spill] sm:$0xff] }
 0x183   :  { %v4319_v58 = vpack.c.bf16 %v620_v2, %v616_v31  ;;  %v5174_v45 = vld [vmem:[#allocation49_spill] sm:$0xff]  ;;  %v5176_v31 = vld [vmem:[#allocation51_spill] sm:$0xff]  ;;  %v5177_v2 = vld [vmem:[#allocation52_spill] sm:$0xff] }
 0x184   :  { %2925 = vmatpush1.bf16.msra.mxu0 %v4276_v36  ;;  %3053 = vmatpush1.bf16.msra.mxu1 %v4278_v5  ;;  %v619_v36 = vld [vmem:[#allocation5 + $0x7e8] sm:$0xff]  ;;  %v621_v5 = vld [vmem:[#allocation5 + $0x7f8] sm:$0xff] }
 0x185   :  { %2927 = vmatprep.subr.bf16.mxu0 %v4282_v38  ;;  %3055 = vmatprep.subr.bf16.mxu1 %v4284_v61  ;;  %v4306_v11 = vpack.c.bf16 %v619_v36, %v615_v57  ;;  %v4308_v59 = vpack.c.bf16 %v621_v5, %v617_v18  ;;  %v5170_v36 = vld [vmem:[#allocation45_spill] sm:$0xff]  ;;  %v5171_v5 = vld [vmem:[#allocation46_spill] sm:$0xff] }
 0x188   :  { %2929 = vmatpush1.bf16.msra.mxu0 %v4288_v46  ;;  %3057 = vmatpush1.bf16.msra.mxu1 %v4290_v20  ;;  %v4313_v20 = vld [vmem:[%s4973_s8 + $0x10] sm:$0x3f] }
 0x189   :  { %2931 = vmatprep.subr.bf16.mxu0 %v4294_v26  ;;  %3059 = vmatprep.subr.bf16.mxu1 %v4296_v8  ;;  %v219_v18 = vrot.slane %v4313_v20, %v4106_v15  ;;  %v5167_v15 = vld [vmem:[#allocation41_spill] sm:$0xff] }
 0x18b   :  { %v4328_v57 = vadd.f32 %v4184_v35, %v219_v18  ;;  %v5168_v35 = vld [vmem:[#allocation42_spill] sm:$0xff]  ;;  %v5178_v18 = vld [vmem:[#allocation53_spill] sm:$0xff] }
 0x18c   :  { %2933 = vmatpush1.bf16.msra.mxu0 %v4300_v49  ;;  %3061 = vmatpush1.bf16.msra.mxu1 %v4302_v21 }
 0x18d   :  { %2935 = vmatprep.subr.bf16.mxu0 %v4306_v11  ;;  %3063 = vmatprep.subr.bf16.mxu1 %v4308_v59 }
 0x190   :  { %2937 = vmatpush1.bf16.msra.mxu0 %v4317_v39  ;;  %3065 = vmatpush1.bf16.msra.mxu1 %v4319_v58 }
 0x191   :  { %3067 = vmatprep.subr.bf16.mxu0 %v3898_v40  ;;  %3195 = vmatprep.subr.bf16.mxu1 %v3935_v41  ;;  %v5138_v40 = vld [vmem:[#allocation22_spill] sm:$0xff]  ;;  %v5149_v41 = vld [vmem:[#allocation17_spill] sm:$0xff] }
 0x193   :  { %758 = vmatmul.mubr.f32.vlgmr.msra.gmra.mrb[2].mxu0 %v4328_v57  ;;  %900 = vmatmul.mubr.f32.vlgmr.msra.gmra.mrb[2].mxu1 %v4328_v57 }
 0x194   :  { %3069 = vmatpush1.bf16.msra.mxu0 %v3905_v50  ;;  %3197 = vmatpush1.bf16.msra.mxu1 %v3940_v48  ;;  %v5139_v50 = vld [vmem:[#allocation12_spill] sm:$0xff]  ;;  %v5151_v48 = vld [vmem:[#allocation18_spill] sm:$0xff] }
 0x195   :  { %3071 = vmatprep.subr.bf16.mxu0 %v3908_v53  ;;  %3199 = vmatprep.subr.bf16.mxu1 %v3946_v56  ;;  %v5140_v53 = vld [vmem:[#allocation23_spill] sm:$0xff] }
 0x196   :  { %v5153_v56 = vld [vmem:[#allocation19_spill] sm:$0xff] }
 0x198   :  { %3073 = vmatpush1.bf16.msra.mxu0 %v3912_v62  ;;  %3201 = vmatpush1.bf16.msra.mxu1 %v3953_v0  ;;  %v5141_v62 = vld [vmem:[#allocation13_spill] sm:$0xff]  ;;  %v5155_v0 = vld [vmem:[#allocation20_spill] sm:$0xff] }
 0x199   :  { %3075 = vmatprep.subr.bf16.mxu0 %v3915_v1  ;;  %3203 = vmatprep.subr.bf16.mxu1 %v3959_v6  ;;  %v5142_v1 = vld [vmem:[#allocation24_spill] sm:$0xff]  ;;  %v5157_v6 = vld [vmem:[#allocation21_spill] sm:$0xff] }
 0x19c   :  { %3077 = vmatpush1.bf16.msra.mxu0 %v3918_v10  ;;  %3205 = vmatpush1.bf16.msra.mxu1 %v3965_v14  ;;  %v5143_v10 = vld [vmem:[#allocation14_spill] sm:$0xff]  ;;  %v5159_v14 = vld [vmem:[#allocation33_spill] sm:$0xff] }
 0x19d   :  { %3079 = vmatprep.subr.bf16.mxu0 %v3921_v13  ;;  %3207 = vmatprep.subr.bf16.mxu1 %v3971_v19  ;;  %v5144_v13 = vld [vmem:[#allocation25_spill] sm:$0xff]  ;;  %v5161_v19 = vld [vmem:[#allocation35_spill] sm:$0xff] }
 0x1a0   :  { %3081 = vmatpush1.bf16.msra.mxu0 %v3924_v22  ;;  %3209 = vmatpush1.bf16.msra.mxu1 %v3977_v28  ;;  %v5145_v22 = vld [vmem:[#allocation15_spill] sm:$0xff]  ;;  %v5163_v28 = vld [vmem:[#allocation37_spill] sm:$0xff] }
 0x1a1   :  { %3083 = vmatprep.subr.bf16.mxu0 %v3927_v25  ;;  %3211 = vmatprep.subr.bf16.mxu1 %v3983_v33  ;;  %v5146_v25 = vld [vmem:[#allocation26_spill] sm:$0xff] }
 0x1a4   :  { %3085 = vmatpush1.bf16.msra.mxu0 %v3930_v34  ;;  %3213 = vmatpush1.bf16.msra.mxu1 %v3989_v44  ;;  %v5147_v34 = vld [vmem:[#allocation16_spill] sm:$0xff]  ;;  %v5165_v44 = vld [vmem:[#allocation43_spill] sm:$0xff] }
 0x1a5   :  { %3087 = vmatprep.subr.bf16.mxu0 %v3933_v37  ;;  %3215 = vmatprep.subr.bf16.mxu1 %v3995_v55  ;;  %v5148_v37 = vld [vmem:[#allocation27_spill] sm:$0xff] }
 0x1a8   :  { %3089 = vmatpush1.bf16.msra.mxu0 %v3938_v47  ;;  %3217 = vmatpush1.bf16.msra.mxu1 %v4001_v4  ;;  %v5150_v47 = vld [vmem:[#allocation28_spill] sm:$0xff] }
 0x1a9   :  { %3091 = vmatprep.subr.bf16.mxu0 %v3943_v52  ;;  %3219 = vmatprep.subr.bf16.mxu1 %v4007_v9  ;;  %v5152_v52 = vld [vmem:[#allocation29_spill] sm:$0xff] }
 0x1ac   :  { %3093 = vmatpush1.bf16.msra.mxu0 %v3950_v63  ;;  %3221 = vmatpush1.bf16.msra.mxu1 %v4013_v23  ;;  %v5154_v63 = vld [vmem:[#allocation30_spill] sm:$0xff]  ;;  %v5166_v23 = vld [vmem:[#allocation40_spill] sm:$0xff] }
 0x1ad   :  { %3095 = vmatprep.subr.bf16.mxu0 %v3956_v3  ;;  %3223 = vmatprep.subr.bf16.mxu1 %v4019_v32  ;;  %v5156_v3 = vld [vmem:[#allocation31_spill] sm:$0xff] }
 0x1b0   :  { %3097 = vmatpush1.bf16.msra.mxu0 %v3962_v12  ;;  %3225 = vmatpush1.bf16.msra.mxu1 %v4025_v51  ;;  %v5158_v12 = vld [vmem:[#allocation32_spill] sm:$0xff] }
 0x1b1   :  { %3099 = vmatprep.subr.bf16.mxu0 %v3968_v16  ;;  %3227 = vmatprep.subr.bf16.mxu1 %v4031_v60  ;;  %v5160_v16 = vld [vmem:[#allocation34_spill] sm:$0xff] }
 0x1b4   :  { %3101 = vmatpush1.bf16.msra.mxu0 %v3974_v27  ;;  %3229 = vmatpush1.bf16.msra.mxu1 %v4037_v17  ;;  %v5162_v27 = vld [vmem:[#allocation36_spill] sm:$0xff] }
 0x1b5   :  { %3103 = vmatprep.subr.bf16.mxu0 %v3980_v30  ;;  %3231 = vmatprep.subr.bf16.mxu1 %v4043_v29  ;;  %v5164_v30 = vld [vmem:[#allocation38_spill] sm:$0xff] }
 0x1b8   :  { %3105 = vmatpush1.bf16.msra.mxu0 %v3986_v43  ;;  %3233 = vmatpush1.bf16.msra.mxu1 %v5138_v40  ;;  %v5179_v40 = vld [vmem:[#allocation54_spill] sm:$0xff] }
 0x1b9   :  { %3107 = vmatprep.subr.bf16.mxu0 %v5139_v50  ;;  %3235 = vmatprep.subr.bf16.mxu1 %v5140_v53  ;;  %v5180_v50 = vld [vmem:[#allocation55_spill] sm:$0xff]  ;;  %v5181_v53 = vld [vmem:[#allocation56_spill] sm:$0xff] }
 0x1bc   :  { %3109 = vmatpush1.bf16.msra.mxu0 %v5141_v62  ;;  %3237 = vmatpush1.bf16.msra.mxu1 %v5142_v1  ;;  %v5182_v62 = vld [vmem:[#allocation57_spill] sm:$0xff]  ;;  %v5183_v1 = vld [vmem:[#allocation58_spill] sm:$0xff] }
 0x1bd   :  { %3111 = vmatprep.subr.bf16.mxu0 %v5143_v10  ;;  %3239 = vmatprep.subr.bf16.mxu1 %v5144_v13  ;;  %v5184_v10 = vld [vmem:[#allocation59_spill] sm:$0xff]  ;;  %v5185_v13 = vld [vmem:[#allocation60_spill] sm:$0xff] }
 0x1c0   :  { %3113 = vmatpush1.bf16.msra.mxu0 %v5145_v22  ;;  %3241 = vmatpush1.bf16.msra.mxu1 %v5146_v25  ;;  %v5186_v22 = vld [vmem:[#allocation61_spill] sm:$0xff]  ;;  %v5187_v25 = vld [vmem:[#allocation62_spill] sm:$0xff] }
 0x1c1   :  { %3115 = vmatprep.subr.bf16.mxu0 %v5147_v34  ;;  %3243 = vmatprep.subr.bf16.mxu1 %v5148_v37  ;;  %v5188_v34 = vld [vmem:[#allocation63_spill] sm:$0xff]  ;;  %v5189_v37 = vld [vmem:[#allocation64_spill] sm:$0xff] }
 0x1c4   :  { %3117 = vmatpush1.bf16.msra.mxu0 %v5149_v41  ;;  %3245 = vmatpush1.bf16.msra.mxu1 %v5150_v47  ;;  %v5190_v41 = vld [vmem:[#allocation65_spill] sm:$0xff]  ;;  %v5191_v47 = vld [vmem:[#allocation66_spill] sm:$0xff] }
 0x1c5   :  { %3119 = vmatprep.subr.bf16.mxu0 %v5151_v48  ;;  %3247 = vmatprep.subr.bf16.mxu1 %v5152_v52  ;;  %v5192_v48 = vld [vmem:[#allocation67_spill] sm:$0xff]  ;;  %v5193_v52 = vld [vmem:[#allocation68_spill] sm:$0xff] }
 0x1c8   :  { %3121 = vmatpush1.bf16.msra.mxu0 %v5153_v56  ;;  %3249 = vmatpush1.bf16.msra.mxu1 %v5154_v63  ;;  %v5194_v56 = vld [vmem:[#allocation69_spill] sm:$0xff]  ;;  %v5195_v63 = vld [vmem:[#allocation70_spill] sm:$0xff] }
 0x1c9   :  { %3123 = vmatprep.subr.bf16.mxu0 %v5155_v0  ;;  %3251 = vmatprep.subr.bf16.mxu1 %v5156_v3  ;;  %v5196_v0 = vld [vmem:[#allocation71_spill] sm:$0xff]  ;;  %v5197_v3 = vld [vmem:[#allocation72_spill] sm:$0xff] }
 0x1cc   :  { %3125 = vmatpush1.bf16.msra.mxu0 %v5157_v6  ;;  %3253 = vmatpush1.bf16.msra.mxu1 %v5158_v12  ;;  %v5198_v6 = vld [vmem:[#allocation73_spill] sm:$0xff]  ;;  %v5199_v12 = vld [vmem:[#allocation74_spill] sm:$0xff] }
 0x1cd   :  { %3127 = vmatprep.subr.bf16.mxu0 %v5159_v14  ;;  %3255 = vmatprep.subr.bf16.mxu1 %v5160_v16  ;;  %v5200_v14 = vld [vmem:[#allocation75_spill] sm:$0xff]  ;;  %v5201_v16 = vld [vmem:[#allocation76_spill] sm:$0xff] }
 0x1d0   :  { %3129 = vmatpush1.bf16.msra.mxu0 %v5161_v19  ;;  %3257 = vmatpush1.bf16.msra.mxu1 %v5162_v27  ;;  %v5202_v19 = vld [vmem:[#allocation77_spill] sm:$0xff]  ;;  %v5203_v27 = vld [vmem:[#allocation78_spill] sm:$0xff] }
 0x1d1   :  { %3131 = vmatprep.subr.bf16.mxu0 %v5163_v28  ;;  %3259 = vmatprep.subr.bf16.mxu1 %v5164_v30  ;;  %v5204_v28 = vld [vmem:[#allocation79_spill] sm:$0xff]  ;;  %v5205_v30 = vld [vmem:[#allocation80_spill] sm:$0xff] }
 0x266   :  { %v759_v33 = vpop.f32.mrb[2].mxu0  ;;  %v4398_v43 = vpop.f32.mrb[2].mxu1 }
 0x267   :  { %v4401_v55 = vsub.f32 %v5165_v44, %v759_v33  ;;  %v761_v4 = vpop.f32.mrb[3].mxu0  ;;  %v903_v9 = vpop.f32.mrb[3].mxu1  ;;  %v5206_v33 = vld [vmem:[#allocation81_spill] sm:$0xff]  ;;  %v5207_v44 = vld [vmem:[#allocation82_spill] sm:$0xff] }
 0x268   :  { %v4404_v32 = vsub.f32 %v5166_v23, %v761_v4  ;;  %v4407_v51 = vsub.f32 %v4198_v42, %v903_v9  ;;  %v5169_v42 = vld [vmem:[#allocation44_spill] sm:$0xff]  ;;  %v5208_v4 = vld [vmem:[#allocation83_spill] sm:$0xff]  ;;  %v5210_v23 = vld [vmem:[#allocation85_spill] sm:$0xff] }
 0x269   :  { %v910_v17 = vmul.f32 %v4401_v55, %v4401_v55  ;;  %v5209_v9 = vld [vmem:[#allocation84_spill] sm:$0xff] }
 0x26a   :  { %v911_v60 = vmul.f32 %v4404_v32, %v4404_v32  ;;  %v913_v29 = vmul.f32 %v4407_v51, %v4407_v51 }
 0x26c   :  { %978 = vmatprep.mubr.f32.mxu0 %v911_v60  ;;  %1120 = vmatprep.mubr.f32.mxu1 %v911_v60  ;;  %v5211_v60 = vld [vmem:[#allocation86_spill] sm:$0xff] }
 0x26d   :  { %979 = vmatmul.mubr.f32.vlgmr.msra.gmra.mrb[4].mxu0 %v910_v17  ;;  %1121 = vmatmul.mubr.f32.vlgmr.msra.gmra.mrb[4].mxu1 %v910_v17  ;;  %v5212_v17 = vld [vmem:[#allocation87_spill] sm:$0xff] }
 0x26e   :  { %3133 = vmatpush1.bf16.msra.mxu0 %v5167_v15  ;;  %3261 = vmatpush1.bf16.msra.mxu1 %v5168_v35  ;;  %v5214_v15 = vld [vmem:[#allocation89_spill] sm:$0xff]  ;;  %v5215_v35 = vld [vmem:[#allocation90_spill] sm:$0xff] }
 0x26f   :  { %1049 = vmatprep.mubr.f32.mxu0 %v913_v29  ;;  %1191 = vmatprep.mubr.f32.mxu1 %v913_v29  ;;  %v5213_v29 = vld [vmem:[#allocation88_spill] sm:$0xff] }
 0x270   :  { %3135 = vmatprep.subr.bf16.mxu0 %v5169_v42  ;;  %3263 = vmatprep.subr.bf16.mxu1 %v5170_v36  ;;  %v5216_v42 = vld [vmem:[#allocation91_spill] sm:$0xff]  ;;  %v5217_v36 = vld [vmem:[#allocation92_spill] sm:$0xff] }
 0x272   :  { %3137 = vmatpush1.bf16.msra.mxu0 %v5171_v5  ;;  %3265 = vmatpush1.bf16.msra.mxu1 %v5172_v24  ;;  %v1283_v5 = vld [vmem:[#allocation7 + $0x8] sm:$0xff]  ;;  %v1286_v24 = vld [vmem:[#allocation7 + $0x20] sm:$0xff] }
 0x273   :  { %3139 = vmatprep.subr.bf16.mxu0 %v5173_v54  ;;  %3267 = vmatprep.subr.bf16.mxu1 %v5174_v45  ;;  %v4475_v54 = vsub.f32 %v4328_v57, %v4398_v43  ;;  %v1292_v45 = vld [vmem:[#allocation7 + $0x50] sm:$0xff]  ;;  %v1291_v43 = vld [vmem:[#allocation7 + $0x48] sm:$0xff] }
 0x274   :  { %v1288_v57 = vld [vmem:[#allocation7 + $0x30] sm:$0xff] }
 0x276   :  { %3141 = vmatpush1.bf16.msra.mxu0 %v5175_v7  ;;  %3269 = vmatpush1.bf16.msra.mxu1 %v5176_v31  ;;  %v1298_v7 = vld [vmem:[#allocation7 + $0x80] sm:$0xff] }
 0x277   :  { %3143 = vmatprep.subr.bf16.mxu0 %v5177_v2  ;;  %3271 = vmatprep.subr.bf16.mxu1 %v5178_v18  ;;  %v1294_v2 = vld [vmem:[#allocation7 + $0x60] sm:$0xff]  ;;  %v1301_v18 = vld [vmem:[#allocation7 + $0x98] sm:$0xff] }
 0x27a   :  { %3145 = vmatpush1.bf16.msra.mxu0 %v5179_v40  ;;  %3273 = vmatpush1.bf16.msra.mxu1 %v5180_v50 }
 0x27b   :  { %3147 = vmatprep.subr.bf16.mxu0 %v5181_v53  ;;  %3275 = vmatprep.subr.bf16.mxu1 %v5182_v62  ;;  %v1300_v53 = vld [vmem:[#allocation7 + $0x90] sm:$0xff]  ;;  %v1303_v62 = vld [vmem:[#allocation7 + $0xa8] sm:$0xff] }
 0x27e   :  { %3149 = vmatpush1.bf16.msra.mxu0 %v5183_v1  ;;  %3277 = vmatpush1.bf16.msra.mxu1 %v5184_v10  ;;  %v3336_v1 = vpack.c.bf16 %v1303_v62, %v1300_v53  ;;  %v1307_v10 = vld [vmem:[#allocation7 + $0xc8] sm:$0xff]  ;;  %v1296_v53 = vld [vmem:[#allocation7 + $0x70] sm:$0xff] }
 0x27f   :  { %3151 = vmatprep.subr.bf16.mxu0 %v5185_v13  ;;  %3279 = vmatprep.subr.bf16.mxu1 %v5186_v22  ;;  %v1310_v13 = vld [vmem:[#allocation7 + $0xe0] sm:$0xff]  ;;  %v1299_v62 = vld [vmem:[#allocation7 + $0x88] sm:$0xff] }
 0x280   :  { %v3338_v22 = vpack.c.bf16 %v1310_v13, %v1307_v10  ;;  %v1349_v10 = vld [vmem:[#allocation7 + $0x218] sm:$0xff]  ;;  %v1352_v13 = vld [vmem:[#allocation7 + $0x230] sm:$0xff] }
 0x282   :  { %3153 = vmatpush1.bf16.msra.mxu0 %v5187_v25  ;;  %3281 = vmatpush1.bf16.msra.mxu1 %v5188_v34  ;;  %v1306_v25 = vld [vmem:[#allocation7 + $0xc0] sm:$0xff]  ;;  %v1309_v34 = vld [vmem:[#allocation7 + $0xd8] sm:$0xff] }
 0x283   :  { %3155 = vmatprep.subr.bf16.mxu0 %v5189_v37  ;;  %3283 = vmatprep.subr.bf16.mxu1 %v5190_v41  ;;  %v3340_v37 = vpack.c.bf16 %v1309_v34, %v1306_v25  ;;  %v1313_v41 = vld [vmem:[#allocation7 + $0xf8] sm:$0xff]  ;;  %v3460_v25 = vpack.c.bf16 %v1299_v62, %v1296_v53  ;;  %v3366_v34 = vpack.c.bf16 %v1352_v13, %v1349_v10  ;;  %v1326_v62 = vld [vmem:[#allocation7 + $0x160] sm:$0xff] }
 0x286   :  { %3157 = vmatpush1.bf16.msra.mxu0 %v5191_v47  ;;  %3285 = vmatpush1.bf16.msra.mxu1 %v5192_v48  ;;  %v1316_v47 = vld [vmem:[#allocation7 + $0x110] sm:$0xff] }
 0x287   :  { %3159 = vmatprep.subr.bf16.mxu0 %v5193_v52  ;;  %3287 = vmatprep.subr.bf16.mxu1 %v5194_v56  ;;  %v3342_v48 = vpack.c.bf16 %v1316_v47, %v1313_v41  ;;  %v1312_v52 = vld [vmem:[#allocation7 + $0xf0] sm:$0xff]  ;;  %v1315_v56 = vld [vmem:[#allocation7 + $0x108] sm:$0xff] }
 0x288   :  { %v1348_v41 = vld [vmem:[#allocation7 + $0x210] sm:$0xff]  ;;  %v1351_v47 = vld [vmem:[#allocation7 + $0x228] sm:$0xff] }
 0x28a   :  { %3161 = vmatpush1.bf16.msra.mxu0 %v5195_v63  ;;  %3289 = vmatpush1.bf16.msra.mxu1 %v5196_v0  ;;  %v3344_v63 = vpack.c.bf16 %v1315_v56, %v1312_v52  ;;  %v1319_v0 = vld [vmem:[#allocation7 + $0x128] sm:$0xff]  ;;  %v1302_v52 = vld [vmem:[#allocation7 + $0xa0] sm:$0xff]  ;;  %v1305_v56 = vld [vmem:[#allocation7 + $0xb8] sm:$0xff] }
 0x28b   :  { %3163 = vmatprep.subr.bf16.mxu0 %v5197_v3  ;;  %3291 = vmatprep.subr.bf16.mxu1 %v5198_v6  ;;  %v1322_v3 = vld [vmem:[#allocation7 + $0x140] sm:$0xff] }
 0x28c   :  { %v3346_v6 = vpack.c.bf16 %v1322_v3, %v1319_v0  ;;  %v1358_v0 = vld [vmem:[#allocation7 + $0x260] sm:$0xff]  ;;  %v1356_v3 = vld [vmem:[#allocation7 + $0x250] sm:$0xff] }
 0x28e   :  { %3165 = vmatpush1.bf16.msra.mxu0 %v5199_v12  ;;  %3293 = vmatpush1.bf16.msra.mxu1 %v5200_v14  ;;  %v1318_v12 = vld [vmem:[#allocation7 + $0x120] sm:$0xff]  ;;  %v1321_v14 = vld [vmem:[#allocation7 + $0x138] sm:$0xff] }
 0x28f   :  { %3167 = vmatprep.subr.bf16.mxu0 %v5201_v16  ;;  %3295 = vmatprep.subr.bf16.mxu1 %v5202_v19  ;;  %v3348_v16 = vpack.c.bf16 %v1321_v14, %v1318_v12  ;;  %v1325_v19 = vld [vmem:[#allocation7 + $0x158] sm:$0xff]  ;;  %v3368_v12 = vpack.c.bf16 %v1351_v47, %v1348_v41  ;;  %v3464_v14 = vpack.c.bf16 %v1305_v56, %v1302_v52  ;;  %v1431_v41 = vld [vmem:[#allocation7 + $0x4a8] sm:$0xff] }
 0x292   :  { %3169 = vmatpush1.bf16.msra.mxu0 %v5203_v27  ;;  %3297 = vmatpush1.bf16.msra.mxu1 %v5204_v28  ;;  %v1328_v27 = vld [vmem:[#allocation7 + $0x170] sm:$0xff] }
 0x293   :  { %3171 = vmatprep.subr.bf16.mxu0 %v5205_v30  ;;  %3299 = vmatprep.subr.bf16.mxu1 %v5206_v33  ;;  %v3350_v28 = vpack.c.bf16 %v1328_v27, %v1325_v19  ;;  %v1324_v30 = vld [vmem:[#allocation7 + $0x150] sm:$0xff]  ;;  %v1327_v33 = vld [vmem:[#allocation7 + $0x168] sm:$0xff]  ;;  %v1354_v19 = vld [vmem:[#allocation7 + $0x240] sm:$0xff] }
 0x294   :  { %v1357_v27 = vld [vmem:[#allocation7 + $0x258] sm:$0xff] }
 0x296   :  { %3173 = vmatpush1.bf16.msra.mxu0 %v5207_v44  ;;  %3301 = vmatpush1.bf16.msra.mxu1 %v5208_v4  ;;  %v3352_v44 = vpack.c.bf16 %v1327_v33, %v1324_v30  ;;  %v1331_v4 = vld [vmem:[#allocation7 + $0x188] sm:$0xff] }
 0x297   :  { %3175 = vmatprep.subr.bf16.mxu0 %v5209_v9  ;;  %3303 = vmatprep.subr.bf16.mxu1 %v5210_v23  ;;  %v1334_v9 = vld [vmem:[#allocation7 + $0x1a0] sm:$0xff]  ;;  %v1332_v23 = vld [vmem:[#allocation7 + $0x190] sm:$0xff]  ;;  %v1311_v33 = vld [vmem:[#allocation7 + $0xe8] sm:$0xff] }
 0x29a   :  { %3177 = vmatpush1.bf16.msra.mxu0 %v5211_v60  ;;  %3305 = vmatpush1.bf16.msra.mxu1 %v5212_v17  ;;  %v3354_v60 = vpack.c.bf16 %v1334_v9, %v1331_v4  ;;  %v1335_v17 = vld [vmem:[#allocation7 + $0x1a8] sm:$0xff]  ;;  %v1364_v4 = vld [vmem:[#allocation7 + $0x290] sm:$0xff]  ;;  %v1362_v9 = vld [vmem:[#allocation7 + $0x280] sm:$0xff] }
 0x29b   :  { %3179 = vmatprep.subr.bf16.mxu0 %v5213_v29  ;;  %3307 = vmatprep.subr.bf16.mxu1 %v5214_v15  ;;  %v1330_v29 = vld [vmem:[#allocation7 + $0x180] sm:$0xff]  ;;  %v1333_v15 = vld [vmem:[#allocation7 + $0x198] sm:$0xff] }
 0x29e   :  { %3181 = vmatpush1.bf16.msra.mxu0 %v5215_v35  ;;  %3309 = vmatpush1.bf16.msra.mxu1 %v5216_v42  ;;  %v3450_v35 = vpack.c.bf16 %v1335_v17, %v1332_v23  ;;  %v3356_v42 = vpack.c.bf16 %v1333_v15, %v1330_v29  ;;  %v1365_v23 = vld [vmem:[#allocation7 + $0x298] sm:$0xff]  ;;  %v1360_v15 = vld [vmem:[#allocation7 + $0x270] sm:$0xff] }
 0x29f   :  { %3183 = vmatprep.subr.bf16.mxu0 %v4282_v38  ;;  %3311 = vmatprep.subr.bf16.mxu1 %v4284_v61  ;;  %v3322_v38 = vpack.c.bf16 %v1286_v24, %v1283_v5  ;;  %v1282_v61 = vld [vmem:[#allocation7] sm:$0xff]  ;;  %v1287_v5 = vld [vmem:[#allocation7 + $0x28] sm:$0xff]  ;;  %v1337_v24 = vld [vmem:[#allocation7 + $0x1b8] sm:$0xff] }
 0x2a2   :  { %3185 = vmatpush1.bf16.msra.mxu0 %v4288_v46  ;;  %3313 = vmatpush1.bf16.msra.mxu1 %v5217_v36  ;;  %v1285_v46 = vld [vmem:[#allocation7 + $0x18] sm:$0xff]  ;;  %v1284_v36 = vld [vmem:[#allocation7 + $0x10] sm:$0xff] }
 0x2a3   :  { %3187 = vmatprep.subr.bf16.mxu0 %v4294_v26  ;;  %3315 = vmatprep.subr.bf16.mxu1 %v4296_v8  ;;  %v1289_v26 = vld [vmem:[#allocation7 + $0x38] sm:$0xff]  ;;  %v3324_v8 = vpack.c.bf16 %v1285_v46, %v1282_v61  ;;  %v1340_v61 = vld [vmem:[#allocation7 + $0x1d0] sm:$0xff]  ;;  %v1338_v46 = vld [vmem:[#allocation7 + $0x1c0] sm:$0xff] }
 0x2a6   :  { %3189 = vmatpush1.bf16.msra.mxu0 %v4300_v49  ;;  %3317 = vmatpush1.bf16.msra.mxu1 %v4302_v21  ;;  %v912_v49 = vmul.f32 %v4475_v54, %v4475_v54  ;;  %v3326_v21 = vpack.c.bf16 %v1292_v45, %v1289_v26  ;;  %v1341_v26 = vld [vmem:[#allocation7 + $0x1d8] sm:$0xff]  ;;  %v3358_v45 = vpack.c.bf16 %v1340_v61, %v1337_v24  ;;  %v1367_v24 = vld [vmem:[#allocation7 + $0x2a8] sm:$0xff]  ;;  %v1368_v61 = vld [vmem:[#allocation7 + $0x2b0] sm:$0xff] }
 0x2a7   :  { %3191 = vmatprep.subr.bf16.mxu0 %v4306_v11  ;;  %3319 = vmatprep.subr.bf16.mxu1 %v4308_v59  ;;  %v1295_v11 = vld [vmem:[#allocation7 + $0x68] sm:$0xff]  ;;  %v3328_v59 = vpack.c.bf16 %v1291_v43, %v1288_v57  ;;  %v1290_v57 = vld [vmem:[#allocation7 + $0x40] sm:$0xff] }
 0x2a8   :  { %v3330_v31 = vpack.c.bf16 %v1298_v7, %v1295_v11  ;;  %v1293_v11 = vld [vmem:[#allocation7 + $0x58] sm:$0xff]  ;;  %v1343_v7 = vld [vmem:[#allocation7 + $0x1e8] sm:$0xff] }
 0x2aa   :  { %3193 = vmatpush1.bf16.msra.mxu0 %v4317_v39  ;;  %3321 = vmatpush1.bf16.msra.mxu1 %v4319_v58  ;;  %v1297_v39 = vld [vmem:[#allocation7 + $0x78] sm:$0xff]  ;;  %v1304_v58 = vld [vmem:[#allocation7 + $0xb0] sm:$0xff] }
 0x2ab   :  { %3323 = vmatprep.subr.bf16.mxu0 %v3322_v38  ;;  %v3332_v40 = vpack.c.bf16 %v1297_v39, %v1294_v2  ;;  %v3334_v50 = vpack.c.bf16 %v1304_v58, %v1301_v18  ;;  %v3452_v38 = vpack.c.bf16 %v1287_v5, %v1284_v36  ;;  %3451 = vmatprep.subr.bf16.mxu1 %v3450_v35  ;;  %v1344_v39 = vld [vmem:[#allocation7 + $0x1f0] sm:$0xff]  ;;  %v1347_v18 = vld [vmem:[#allocation7 + $0x208] sm:$0xff]  ;;  %v1342_v58 = vld [vmem:[#allocation7 + $0x1e0] sm:$0xff] }
 0x2ac   :  { %v1363_v35 = vld [vmem:[#allocation7 + $0x288] sm:$0xff]  ;;  %v3470_v36 = vpack.c.bf16 %v1365_v23, %v1362_v9  ;;  %v1317_v5 = vld [vmem:[#allocation7 + $0x118] sm:$0xff] }
 0x2ad   :  { %1050 = vmatmul.mubr.f32.vlgmr.msra.gmra.mrb[4].mxu0 %v912_v49  ;;  %1192 = vmatmul.mubr.f32.vlgmr.msra.gmra.mrb[4].mxu1 %v912_v49  ;;  %v1336_v49 = vld [vmem:[#allocation7 + $0x1b0] sm:$0xff] }
 0x2ae   :  { %3325 = vmatpush1.bf16.msra.mxu0 %v3324_v8  ;;  %v3454_v8 = vpack.c.bf16 %v1341_v26, %v1338_v46  ;;  %3453 = vmatpush3.bf16.msra.mxu1 %v3452_v38  ;;  %v1370_v38 = vld [vmem:[#allocation7 + $0x2c0] sm:$0xff]  ;;  %v1371_v46 = vld [vmem:[#allocation7 + $0x2c8] sm:$0xff]  ;;  %v3376_v26 = vpack.c.bf16 %v1363_v35, %v1360_v15 }
 0x2af   :  { %3327 = vmatprep.subr.bf16.mxu0 %v3326_v21  ;;  %v1339_v21 = vld [vmem:[#allocation7 + $0x1c8] sm:$0xff] }
 0x2b0   :  { %v3360_v43 = vpack.c.bf16 %v1339_v21, %v1336_v49  ;;  %3455 = vmatprep.subr.bf16.mxu1 %v3454_v8  ;;  %v3378_v8 = vpack.c.bf16 %v1370_v38, %v1367_v24  ;;  %v1366_v49 = vld [vmem:[#allocation7 + $0x2a0] sm:$0xff]  ;;  %v1369_v21 = vld [vmem:[#allocation7 + $0x2b8] sm:$0xff] }
 0x2b2   :  { %3329 = vmatpush1.bf16.msra.mxu0 %v3328_v59  ;;  %v1346_v59 = vld [vmem:[#allocation7 + $0x200] sm:$0xff] }
 0x2b3   :  { %3331 = vmatprep.subr.bf16.mxu0 %v3330_v31  ;;  %v3456_v31 = vpack.c.bf16 %v1293_v11, %v1290_v57  ;;  %v3362_v2 = vpack.c.bf16 %v1346_v59, %v1343_v7  ;;  %v1320_v57 = vld [vmem:[#allocation7 + $0x130] sm:$0xff]  ;;  %v1323_v11 = vld [vmem:[#allocation7 + $0x148] sm:$0xff]  ;;  %v1373_v7 = vld [vmem:[#allocation7 + $0x2d8] sm:$0xff] }
 0x2b4   :  { %v1376_v59 = vld [vmem:[#allocation7 + $0x2f0] sm:$0xff] }
 0x2b5   :  { %3457 = vmatpush3.bf16.msra.mxu1 %v3456_v31  ;;  %v1374_v31 = vld [vmem:[#allocation7 + $0x2e0] sm:$0xff] }
 0x2b6   :  { %3333 = vmatpush1.bf16.msra.mxu0 %v3332_v40  ;;  %v3458_v40 = vpack.c.bf16 %v1347_v18, %v1344_v39  ;;  %v3380_v39 = vpack.c.bf16 %v1369_v21, %v1366_v49  ;;  %v3476_v18 = vpack.c.bf16 %v1323_v11, %v1320_v57 }
 0x2b7   :  { %3335 = vmatprep.subr.bf16.mxu0 %v3334_v50  ;;  %v1345_v50 = vld [vmem:[#allocation7 + $0x1f8] sm:$0xff] }
 0x2b8   :  { %3459 = vmatprep.subr.bf16.mxu1 %v3458_v40  ;;  %v1372_v40 = vld [vmem:[#allocation7 + $0x2d0] sm:$0xff] }
 0x2b9   :  { %3461 = vmatpush3.bf16.msra.mxu1 %v3460_v25  ;;  %v1382_v25 = vld [vmem:[#allocation7 + $0x320] sm:$0xff] }
 0x2ba   :  { %3337 = vmatpush1.bf16.msra.mxu0 %v3336_v1  ;;  %v3364_v1 = vpack.c.bf16 %v1345_v50, %v1342_v58  ;;  %v3382_v58 = vpack.c.bf16 %v1376_v59, %v1373_v7  ;;  %v1375_v50 = vld [vmem:[#allocation7 + $0x2e8] sm:$0xff] }
 0x2bb   :  { %3339 = vmatprep.subr.bf16.mxu0 %v3338_v22  ;;  %v1350_v22 = vld [vmem:[#allocation7 + $0x220] sm:$0xff]  ;;  %v3384_v10 = vpack.c.bf16 %v1375_v50, %v1372_v40 }
 0x2be   :  { %3341 = vmatpush1.bf16.msra.mxu0 %v3340_v37  ;;  %v1353_v37 = vld [vmem:[#allocation7 + $0x238] sm:$0xff] }
 0x2bf   :  { %3343 = vmatprep.subr.bf16.mxu0 %v3342_v48  ;;  %v3462_v48 = vpack.c.bf16 %v1353_v37, %v1350_v22  ;;  %v1379_v22 = vld [vmem:[#allocation7 + $0x308] sm:$0xff] }
 0x2c0   :  { %v3386_v37 = vpack.c.bf16 %v1382_v25, %v1379_v22 }
 0x2c1   :  { %3463 = vmatprep.subr.bf16.mxu1 %v3462_v48 }
 0x2c2   :  { %3345 = vmatpush1.bf16.msra.mxu0 %v3344_v63  ;;  %v1355_v63 = vld [vmem:[#allocation7 + $0x248] sm:$0xff]  ;;  %3465 = vmatpush3.bf16.msra.mxu1 %v3464_v14 }
 0x2c3   :  { %3347 = vmatprep.subr.bf16.mxu0 %v3346_v6  ;;  %v1359_v6 = vld [vmem:[#allocation7 + $0x268] sm:$0xff] }
 0x2c4   :  { %v3466_v30 = vpack.c.bf16 %v1359_v6, %v1356_v3 }
 0x2c6   :  { %3349 = vmatpush1.bf16.msra.mxu0 %v3348_v16  ;;  %v3370_v16 = vpack.c.bf16 %v1358_v0, %v1355_v63  ;;  %3467 = vmatprep.subr.bf16.mxu1 %v3466_v30 }
 0x2c7   :  { %3351 = vmatprep.subr.bf16.mxu0 %v3350_v28  ;;  %v1308_v28 = vld [vmem:[#allocation7 + $0xd0] sm:$0xff] }
 0x2c8   :  { %v3468_v17 = vpack.c.bf16 %v1311_v33, %v1308_v28  ;;  %v3692_v33 = vld [vmem:[%s4973_s8 + $0x8] sm:$0x3f] }
 0x2ca   :  { %3353 = vmatpush1.bf16.msra.mxu0 %v3352_v44  ;;  %v1361_v44 = vld [vmem:[#allocation7 + $0x278] sm:$0xff]  ;;  %3469 = vmatpush3.bf16.msra.mxu1 %v3468_v17 }
 0x2cb   :  { %3355 = vmatprep.subr.bf16.mxu0 %v3354_v60  ;;  %v3372_v60 = vpack.c.bf16 %v1357_v27, %v1354_v19  ;;  %v3374_v29 = vpack.c.bf16 %v1364_v4, %v1361_v44  ;;  %3471 = vmatprep.subr.bf16.mxu1 %v3470_v36  ;;  %v4488_v27 = vld [vmem:[%s4973_s8] sm:$0x3f] }
 0x2ce   :  { %3357 = vmatpush1.bf16.msra.mxu0 %v3356_v42  ;;  %v1314_v42 = vld [vmem:[#allocation7 + $0x100] sm:$0xff] }
 0x2cf   :  { %3359 = vmatprep.subr.bf16.mxu0 %v3358_v45  ;;  %v3472_v45 = vpack.c.bf16 %v1317_v5, %v1314_v42 }
 0x2d1   :  { %3473 = vmatpush3.bf16.msra.mxu1 %v3472_v45 }
 0x2d2   :  { %3361 = vmatpush1.bf16.msra.mxu0 %v3360_v43  ;;  %v3474_v43 = vpack.c.bf16 %v1371_v46, %v1368_v61 }
 0x2d3   :  { %3363 = vmatprep.subr.bf16.mxu0 %v3362_v2  ;;  %v1377_v2 = vld [vmem:[#allocation7 + $0x2f8] sm:$0xff] }
 0x2d4   :  { %3475 = vmatprep.subr.bf16.mxu1 %v3474_v43  ;;  %v3478_v53 = vpack.c.bf16 %v1377_v2, %v1374_v31 }
 0x2d5   :  { %3477 = vmatpush3.bf16.msra.mxu1 %v3476_v18 }
 0x2d6   :  { %3365 = vmatpush1.bf16.msra.mxu0 %v3364_v1  ;;  %v1329_v1 = vld [vmem:[#allocation7 + $0x178] sm:$0xff]  ;;  %3479 = vmatprep.subr.bf16.mxu1 %v3478_v53 }
 0x2d7   :  { %3367 = vmatprep.subr.bf16.mxu0 %v3366_v34  ;;  %v3480_v13 = vpack.c.bf16 %v1329_v1, %v1326_v62  ;;  %v1428_v34 = vld [vmem:[#allocation7 + $0x490] sm:$0xff] }
 0x2d8   :  { %v3482_v47 = vpack.c.bf16 %v1431_v41, %v1428_v34  ;;  %v1378_v34 = vld [vmem:[#allocation7 + $0x300] sm:$0xff] }
 0x2d9   :  { %3481 = vmatpush3.bf16.msra.mxu1 %v3480_v13 }
 0x2da   :  { %3369 = vmatpush1.bf16.msra.mxu0 %v3368_v12  ;;  %3483 = vmatprep.subr.bf16.mxu1 %v3482_v47  ;;  %v5218_v12 = vld [vmem:[#allocation39_spill] sm:$0xff]  ;;  %v1381_v47 = vld [vmem:[#allocation7 + $0x318] sm:$0xff] }
 0x2db   :  { %3371 = vmatprep.subr.bf16.mxu0 %v3370_v16  ;;  %v1208_v14 = vsub.s32 1, %v5218_v12  ;;  %v1228_v16 = vsub.s32 2, %v5218_v12 }
 0x2dd   :  { %v1209_v28 = vrot.slane %v4488_v27, %v1208_v14  ;;  %v1213_v44 = vrot.slane %v3692_v33, %v1208_v14  ;;  %v1229_v9 = vrot.slane %v4488_v27, %v1228_v16  ;;  %v1233_v15 = vrot.slane %v3692_v33, %v1228_v16  ;;  %v1387_v33 = vld [vmem:[#allocation7 + $0x348] sm:$0xff] }
 0x2de   :  { %3373 = vmatpush1.bf16.msra.mxu0 %v3372_v60  ;;  %v3693_v60 = vld [vmem:[%s4973_s8 + $0x18] sm:$0x3f]  ;;  %v1237_v40 = vrot.slane %v4313_v20, %v1228_v16 }
 0x2df   :  { %3375 = vmatprep.subr.bf16.mxu0 %v3374_v29  ;;  %v1221_v17 = vrot.slane %v3693_v60, %v1208_v14  ;;  %v1241_v36 = vrot.slane %v3693_v60, %v1228_v16  ;;  %v1391_v60 = vld [vmem:[#allocation7 + $0x368] sm:$0xff] }
 0x2e2   :  { %3377 = vmatpush1.bf16.msra.mxu0 %v3376_v26 }
 0x2e3   :  { %3379 = vmatprep.subr.bf16.mxu0 %v3378_v8 }
 0x2e6   :  { %3381 = vmatpush1.bf16.msra.mxu0 %v3380_v39 }
 0x2e7   :  { %3383 = vmatprep.subr.bf16.mxu0 %v3382_v58 }
 0x2ea   :  { %3385 = vmatpush1.bf16.msra.mxu0 %v3384_v10 }
 0x2eb   :  { %3387 = vmatprep.subr.bf16.mxu0 %v3386_v37 }
 0x380   :  { %v1051_v48 = vpop.f32.mrb[4].mxu0  ;;  %v1193_v52 = vpop.f32.mrb[4].mxu1 }
 0x381   :  { %v3644_v56 = vadd.f32 1e-05, %v1051_v48  ;;  %v1053_v63 = vpop.f32.mrb[5].mxu0  ;;  %v1195_v0 = vpop.f32.mrb[5].mxu1  ;;  %v3646_v19 = vadd.f32 1e-05, %v1193_v52 }
 0x382   :  { %v3645_v3 = vadd.f32 1e-05, %v1053_v63  ;;  %v3647_v6 = vadd.f32 1e-05, %v1195_v0  ;;  %v1383_v48 = vld [vmem:[#allocation7 + $0x328] sm:$0xff]  ;;  %v1385_v63 = vld [vmem:[#allocation7 + $0x338] sm:$0xff] }
 0x383   :  { %3671 = vrsqrt.f32 %v3644_v56 }
 0x384   :  { %3673 = vrsqrt.f32 %v3645_v3  ;;  %v1388_v3 = vld [vmem:[#allocation7 + $0x350] sm:$0xff] }
 0x385   :  { %3675 = vrsqrt.f32 %v3647_v6  ;;  %v1434_v6 = vld [vmem:[#allocation7 + $0x4c0] sm:$0xff] }
 0x386   :  { %3677 = vrsqrt.f32 %v3646_v19  ;;  %v3388_v19 = vpack.c.bf16 %v1381_v47, %v1378_v34  ;;  %v1404_v34 = vld [vmem:[#allocation7 + $0x3d0] sm:$0xff] }
 0x387   :  { %v1412_v47 = vld [vmem:[#allocation7 + $0x410] sm:$0xff] }
 0x38d   :  { %v3672_v30 = vpop.eup %3671 }
 0x38e   :  { %v1202_v4 = vmul.f32 %v3672_v30, %v4401_v55  ;;  %v3674_v23 = vpop.eup %3673  ;;  %v1384_v30 = vld [vmem:[#allocation7 + $0x330] sm:$0xff] }
 0x38f   :  { %v3676_v29 = vpop.eup %3675  ;;  %v1203_v42 = vmul.f32 %v3674_v23, %v4404_v32  ;;  %v1217_v32 = vrot.slane %v4313_v20, %v1208_v14  ;;  %v1380_v20 = vld [vmem:[#allocation7 + $0x310] sm:$0xff]  ;;  %v1437_v14 = vld [vmem:[#allocation7 + $0x4d8] sm:$0xff] }
 0x390   :  { %v1222_v35 = vmul.f32 %v1209_v28, %v1202_v4  ;;  %v1205_v5 = vmul.f32 %v3676_v29, %v4407_v51  ;;  %v3678_v21 = vpop.eup %3677  ;;  %v3484_v28 = vpack.c.bf16 %v1383_v48, %v1380_v20  ;;  %v1389_v23 = vld [vmem:[#allocation7 + $0x358] sm:$0xff]  ;;  %v3486_v29 = vpack.c.bf16 %v1437_v14, %v1434_v6  ;;  %v1458_v20 = vld [vmem:[#allocation7 + $0x580] sm:$0xff] }
 0x391   :  { %v1223_v24 = vmul.f32 %v1213_v44, %v1203_v42  ;;  %v1204_v31 = vmul.f32 %v3678_v21, %v4475_v54  ;;  %v1443_v42 = vld [vmem:[#allocation7 + $0x508] sm:$0xff]  ;;  %v1397_v21 = vld [vmem:[#allocation7 + $0x398] sm:$0xff]  ;;  %v1410_v14 = vld [vmem:[#allocation7 + $0x400] sm:$0xff] }
 0x392   :  { %v1242_v38 = vadd.f32 %v1229_v9, %v1222_v35  ;;  %v1225_v55 = vmul.f32 %v1221_v17, %v1205_v5  ;;  %v1386_v9 = vld [vmem:[#allocation7 + $0x340] sm:$0xff]  ;;  %v3390_v17 = vpack.c.bf16 %v1388_v3, %v1385_v63  ;;  %v1440_v35 = vld [vmem:[#allocation7 + $0x4f0] sm:$0xff]  ;;  %v3392_v5 = vpack.c.bf16 %v1387_v33, %v1384_v30  ;;  %v1461_v48 = vld [vmem:[#allocation7 + $0x598] sm:$0xff] }
 0x393   :  { %v1243_v61 = vadd.f32 %v1233_v15, %v1223_v24  ;;  %v1224_v50 = vmul.f32 %v1217_v32, %v1204_v31  ;;  %v1394_v15 = vld [vmem:[#allocation7 + $0x380] sm:$0xff]  ;;  %v3488_v24 = vpack.c.bf16 %v1389_v23, %v1386_v9  ;;  %v1399_v32 = vld [vmem:[#allocation7 + $0x3a8] sm:$0xff]  ;;  %v1408_v63 = vld [vmem:[#allocation7 + $0x3f0] sm:$0xff]  ;;  %v3502_v6 = vpack.c.bf16 %v1461_v48, %v1458_v20 }
 0x394   :  { %v1246_v46 = vmul.f32 %v1242_v38, %v1242_v38  ;;  %v1245_v26 = vadd.f32 %v1241_v36, %v1225_v55  ;;  %v1393_v55 = vld [vmem:[#allocation7 + $0x378] sm:$0xff]  ;;  %v1418_v30 = vld [vmem:[#allocation7 + $0x440] sm:$0xff]  ;;  %v1464_v33 = vld [vmem:[#allocation7 + $0x5b0] sm:$0xff] }
 0x395   :  { %v1247_v45 = vmul.f32 %v1243_v61, %v1243_v61  ;;  %v4504_v62 = vadd.f32 %v1237_v40, %v1224_v50  ;;  %v1406_v40 = vld [vmem:[#allocation7 + $0x3e0] sm:$0xff]  ;;  %v1452_v50 = vld [vmem:[#allocation7 + $0x550] sm:$0xff] }
 0x396   :  { %v1250_v8 = vmul.f32 %v1246_v46, %v1242_v38  ;;  %v1249_v49 = vmul.f32 %v1245_v26, %v1245_v26  ;;  %v3394_v46 = vpack.c.bf16 %v1394_v15, %v1391_v60  ;;  %v1414_v60 = vld [vmem:[#allocation7 + $0x420] sm:$0xff]  ;;  %v1770_v48 = vld [vmem:[%s4969_s4 + $0x10] sm:$0xff] }
 0x397   :  { %v1251_v57 = vmul.f32 %v1247_v45, %v1243_v61  ;;  %v1248_v1 = vmul.f32 %v4504_v62, %v4504_v62  ;;  %v3490_v45 = vpack.c.bf16 %v1443_v42, %v1440_v35  ;;  %v1416_v35 = vld [vmem:[#allocation7 + $0x430] sm:$0xff]  ;;  %v1419_v42 = vld [vmem:[#allocation7 + $0x448] sm:$0xff] }
 0x398   :  { %v1254_v43 = vmul.f32 0.044715, %v1250_v8  ;;  %v1253_v11 = vmul.f32 %v1249_v49, %v1245_v26  ;;  %v1392_v8 = vld [vmem:[#allocation7 + $0x370] sm:$0xff]  ;;  %v1395_v49 = vld [vmem:[#allocation7 + $0x388] sm:$0xff] }
 0x399   :  { %v1255_v7 = vmul.f32 0.044715, %v1251_v57  ;;  %v1252_v37 = vmul.f32 %v1248_v1, %v4504_v62  ;;  %v1446_v57 = vld [vmem:[#allocation7 + $0x520] sm:$0xff] }
 0x39a   :  { %v1258_v59 = vadd.f32 %v1254_v43, %v1242_v38  ;;  %v1257_v51 = vmul.f32 0.044715, %v1253_v11  ;;  %v1449_v43 = vld [vmem:[#allocation7 + $0x538] sm:$0xff] }
 0x39b   :  { %v1259_v2 = vadd.f32 %v1255_v7, %v1243_v61  ;;  %v1256_v44 = vmul.f32 0.044715, %v1252_v37  ;;  %v3492_v7 = vpack.c.bf16 %v1395_v49, %v1392_v8  ;;  %v1407_v37 = vld [vmem:[#allocation7 + $0x3e8] sm:$0xff]  ;;  %v1420_v8 = vld [vmem:[#allocation7 + $0x450] sm:$0xff] }
 0x39c   :  { %v1262_v39 = vmul.f32 0.7978846, %v1258_v59  ;;  %v1261_v18 = vadd.f32 %v1257_v51, %v1245_v26  ;;  %v1396_v59 = vld [vmem:[#allocation7 + $0x390] sm:$0xff]  ;;  %v1423_v49 = vld [vmem:[#allocation7 + $0x468] sm:$0xff] }
 0x39d   :  { %v1263_v58 = vmul.f32 0.7978846, %v1259_v2  ;;  %v3494_v2 = vpack.c.bf16 %v1449_v43, %v1446_v57  ;;  %v3400_v1 = vpack.c.bf16 %v1399_v32, %v1396_v59  ;;  %v1422_v57 = vld [vmem:[#allocation7 + $0x460] sm:$0xff]  ;;  %v1425_v43 = vld [vmem:[#allocation7 + $0x478] sm:$0xff] }
 0x39e   :  { %3679 = vtanh.f32 %v1262_v39  ;;  %v1265_v53 = vmul.f32 0.7978846, %v1261_v18  ;;  %v1398_v39 = vld [vmem:[#allocation7 + $0x3a0] sm:$0xff]  ;;  %v1401_v18 = vld [vmem:[#allocation7 + $0x3b8] sm:$0xff] }
 0x39f   :  { %3681 = vtanh.f32 %v1263_v58  ;;  %v1403_v58 = vld [vmem:[#allocation7 + $0x3c8] sm:$0xff]  ;;  %v1430_v59 = vld [vmem:[#allocation7 + $0x4a0] sm:$0xff] }
 0x3a0   :  { %3683 = vtanh.f32 %v1265_v53  ;;  %v1455_v53 = vld [vmem:[#allocation7 + $0x568] sm:$0xff]  ;;  %v1784_v32 = vld [vmem:[%s4969_s4 + $0x80] sm:$0xff] }
 0x3a8   :  { %v3680_v10 = vpop.eup %3679 }
 0x3a9   :  { %v1270_v13 = vadd.f32 1.0, %v3680_v10  ;;  %v3682_v54 = vpop.eup %3681  ;;  %v3496_v10 = vpack.c.bf16 %v1401_v18, %v1398_v39  ;;  %v1426_v39 = vld [vmem:[#allocation7 + $0x480] sm:$0xff] }
 0x3aa   :  { %v3684_v22 = vpop.eup %3683  ;;  %v1271_v25 = vadd.f32 1.0, %v3682_v54  ;;  %v1405_v54 = vld [vmem:[#allocation7 + $0x3d8] sm:$0xff] }
 0x3ab   :  { %v1274_v41 = vmul.f32 0.5, %v1270_v13  ;;  %v1273_v52 = vadd.f32 1.0, %v3684_v22  ;;  %v1402_v13 = vld [vmem:[#allocation7 + $0x3c0] sm:$0xff]  ;;  %v3402_v22 = vpack.c.bf16 %v1406_v40, %v1403_v58 }
 0x3ac   :  { %v1275_v56 = vmul.f32 0.5, %v1271_v25  ;;  %v3498_v25 = vpack.c.bf16 %v1455_v53, %v1452_v50  ;;  %v1429_v50 = vld [vmem:[#allocation7 + $0x498] sm:$0xff]  ;;  %v1768_v53 = vld [vmem:[%s4969_s4] sm:$0xff] }
 0x3ad   :  { %v1277_v0 = vmul.f32 0.5, %v1273_v52  ;;  %v4511_v4 = vmul.f32 %v1274_v41, %v1242_v38  ;;  %v1390_v38 = vld [vmem:[#allocation7 + $0x360] sm:$0xff]  ;;  %v1409_v41 = vld [vmem:[#allocation7 + $0x3f8] sm:$0xff]  ;;  %v3404_v52 = vpack.c.bf16 %v1405_v54, %v1402_v13  ;;  %v1436_v13 = vld [vmem:[#allocation7 + $0x4d0] sm:$0xff] }
 0x3ae   :  { %v4509_v16 = vmul.f32 %v1275_v56, %v1243_v61  ;;  %v1260_v61 = vadd.f32 %v1256_v44, %v4504_v62  ;;  %v3396_v11 = vpack.c.bf16 %v1393_v55, %v1390_v38  ;;  %v3500_v56 = vpack.c.bf16 %v1407_v37, %v1404_v34  ;;  %v1467_v44 = vld [vmem:[#allocation7 + $0x5c8] sm:$0xff]  ;;  %v1424_v38 = vld [vmem:[#allocation7 + $0x470] sm:$0xff]  ;;  %v1470_v55 = vld [vmem:[#allocation7 + $0x5e0] sm:$0xff] }
 0x3af   :  { %v4517_v36 = vmul.f32 %v1277_v0, %v1245_v26  ;;  %v1400_v26 = vld [vmem:[#allocation7 + $0x3b0] sm:$0xff]  ;;  %v1411_v0 = vld [vmem:[#allocation7 + $0x408] sm:$0xff]  ;;  %v3406_v3 = vpack.c.bf16 %v1412_v47, %v1409_v41  ;;  %v3506_v15 = vpack.c.bf16 %v1467_v44, %v1464_v33  ;;  %v1772_v44 = vld [vmem:[%s4969_s4 + $0x20] sm:$0xff] }
 0x3b0   :  { %1550 = vmatprep.mubr.f32.mxu0 %v4509_v16  ;;  %1692 = vmatprep.mubr.f32.mxu1 %v4509_v16  ;;  %v1264_v31 = vmul.f32 0.7978846, %v1260_v61  ;;  %v3398_v51 = vpack.c.bf16 %v1400_v26, %v1397_v21  ;;  %v3408_v9 = vpack.c.bf16 %v1411_v0, %v1408_v63  ;;  %v1473_v61 = vld [vmem:[#allocation7 + $0x5f8] sm:$0xff]  ;;  %v1786_v54 = vld [vmem:[%s4969_s4 + $0x90] sm:$0xff]  ;;  %v1435_v41 = vld [vmem:[#allocation7 + $0x4c8] sm:$0xff] }
 0x3b1   :  { %1551 = vmatmul.mubr.f32.vlgmr.msra.gmra.mrb[6].mxu0 %v4511_v4  ;;  %1693 = vmatmul.mubr.f32.vlgmr.msra.gmra.mrb[6].mxu1 %v4511_v4  ;;  %v3510_v26 = vpack.c.bf16 %v1473_v61, %v1470_v55  ;;  %v1432_v37 = vld [vmem:[#allocation7 + $0x4b0] sm:$0xff]  ;;  %v1442_v0 = vld [vmem:[#allocation7 + $0x500] sm:$0xff]  ;;  %v1775_v55 = vld [vmem:[%s4969_s4 + $0x38] sm:$0xff] }
 0x3b2   :  { %3389 = vmatpush1.bf16.msra.mxu0 %v3388_v19  ;;  %3485 = vmatpush3.bf16.msra.mxu1 %v3484_v28  ;;  %3685 = vtanh.f32 %v1264_v31  ;;  %v1413_v19 = vld [vmem:[#allocation7 + $0x418] sm:$0xff]  ;;  %v1415_v28 = vld [vmem:[#allocation7 + $0x428] sm:$0xff] }
 0x3b3   :  { %1621 = vmatprep.mubr.f32.mxu0 %v4517_v36  ;;  %1762 = vmatprep.mubr.f32.mxu1 %v4517_v36  ;;  %v3504_v23 = vpack.c.bf16 %v1413_v19, %v1410_v14  ;;  %v1785_v31 = vld [vmem:[%s4969_s4 + $0x88] sm:$0xff]  ;;  %v1438_v19 = vld [vmem:[#allocation7 + $0x4e0] sm:$0xff] }
 0x3b4   :  { %3391 = vmatprep.subr.bf16.mxu0 %v3390_v17  ;;  %3487 = vmatprep.subr.bf16.mxu1 %v3486_v29  ;;  %v1417_v17 = vld [vmem:[#allocation7 + $0x438] sm:$0xff]  ;;  %v3410_v29 = vpack.c.bf16 %v1418_v30, %v1415_v28  ;;  %v3514_v40 = vpack.c.bf16 %v1785_v31, %v1784_v32  ;;  %v1451_v61 = vld [vmem:[#allocation7 + $0x548] sm:$0xff]  ;;  %v1460_v31 = vld [vmem:[#allocation7 + $0x590] sm:$0xff] }
 0x3b5   :  { %v1441_v28 = vld [vmem:[#allocation7 + $0x4f8] sm:$0xff] }
 0x3b6   :  { %3393 = vmatpush1.bf16.msra.mxu0 %v3392_v5  ;;  %3489 = vmatpush3.bf16.msra.mxu1 %v3488_v24  ;;  %v1421_v5 = vld [vmem:[#allocation7 + $0x458] sm:$0xff] }
 0x3b7   :  { %3395 = vmatprep.subr.bf16.mxu0 %v3394_v46  ;;  %3491 = vmatprep.subr.bf16.mxu1 %v3490_v45  ;;  %v3412_v46 = vpack.c.bf16 %v1417_v17, %v1414_v60  ;;  %v3508_v45 = vpack.c.bf16 %v1419_v42, %v1416_v35  ;;  %v3414_v21 = vpack.c.bf16 %v1424_v38, %v1421_v5  ;;  %v1448_v60 = vld [vmem:[#allocation7 + $0x530] sm:$0xff]  ;;  %v1447_v42 = vld [vmem:[#allocation7 + $0x528] sm:$0xff]  ;;  %v1457_v32 = vld [vmem:[#allocation7 + $0x578] sm:$0xff] }
 0x3b8   :  { %v1790_v17 = vld [vmem:[%s4969_s4 + $0xb0] sm:$0xff] }
 0x3b9   :  { %v1444_v35 = vld [vmem:[#allocation7 + $0x510] sm:$0xff] }
 0x3ba   :  { %3397 = vmatpush1.bf16.msra.mxu0 %v3396_v11  ;;  %3493 = vmatpush3.bf16.msra.mxu1 %v3492_v7  ;;  %v1427_v11 = vld [vmem:[#allocation7 + $0x488] sm:$0xff]  ;;  %v1774_v38 = vld [vmem:[%s4969_s4 + $0x30] sm:$0xff] }
 0x3bb   :  { %3399 = vmatprep.subr.bf16.mxu0 %v3398_v51  ;;  %3495 = vmatprep.subr.bf16.mxu1 %v3494_v2  ;;  %v3416_v51 = vpack.c.bf16 %v1423_v49, %v1420_v8  ;;  %v3512_v2 = vpack.c.bf16 %v1425_v43, %v1422_v57  ;;  %v3418_v18 = vpack.c.bf16 %v1430_v59, %v1427_v11  ;;  %v1793_v8 = vld [vmem:[%s4969_s4 + $0xc8] sm:$0xff]  ;;  %v1453_v57 = vld [vmem:[#allocation7 + $0x558] sm:$0xff] }
 0x3bc   :  { %v3686_v24 = vpop.eup %3685  ;;  %v3432_v49 = vpack.c.bf16 %v1447_v42, %v1444_v35  ;;  %v1777_v59 = vld [vmem:[%s4969_s4 + $0x48] sm:$0xff]  ;;  %v1800_v35 = vld [vmem:[%s4969_s4 + $0x100] sm:$0xff] }
 0x3bd   :  { %v1272_v7 = vadd.f32 1.0, %v3686_v24  ;;  %v1801_v42 = vld [vmem:[%s4969_s4 + $0x108] sm:$0xff] }
 0x3be   :  { %3401 = vmatpush1.bf16.msra.mxu0 %v3400_v1  ;;  %3497 = vmatpush3.bf16.msra.mxu1 %v3496_v10  ;;  %v1769_v1 = vld [vmem:[%s4969_s4 + $0x8] sm:$0xff]  ;;  %v1433_v10 = vld [vmem:[#allocation7 + $0x4b8] sm:$0xff] }
 0x3bf   :  { %3403 = vmatprep.subr.bf16.mxu0 %v3402_v22  ;;  %3499 = vmatprep.subr.bf16.mxu1 %v3498_v25  ;;  %v1276_v58 = vmul.f32 0.5, %v1272_v7  ;;  %v1787_v22 = vld [vmem:[%s4969_s4 + $0x98] sm:$0xff]  ;;  %v3420_v25 = vpack.c.bf16 %v1429_v50, %v1426_v39  ;;  %v3516_v34 = vpack.c.bf16 %v1769_v1, %v1768_v53  ;;  %v3422_v20 = vpack.c.bf16 %v1436_v13, %v1433_v10  ;;  %v1776_v7 = vld [vmem:[%s4969_s4 + $0x40] sm:$0xff]  ;;  %v1778_v1 = vld [vmem:[%s4969_s4 + $0x50] sm:$0xff] }
 0x3c0   :  { %v3518_v63 = vpack.c.bf16 %v1787_v22, %v1786_v54  ;;  %v3438_v50 = vpack.c.bf16 %v1460_v31, %v1457_v32  ;;  %v1779_v10 = vld [vmem:[%s4969_s4 + $0x58] sm:$0xff]  ;;  %v1463_v13 = vld [vmem:[#allocation7 + $0x5a8] sm:$0xff]  ;;  %v1466_v54 = vld [vmem:[#allocation7 + $0x5c0] sm:$0xff] }
 0x3c1   :  { %v4541_v47 = vmul.f32 %v1276_v58, %v4504_v62  ;;  %v1789_v62 = vld [vmem:[%s4969_s4 + $0xa8] sm:$0xff]  ;;  %v1456_v58 = vld [vmem:[#allocation7 + $0x570] sm:$0xff]  ;;  %v1796_v22 = vld [vmem:[%s4969_s4 + $0xe0] sm:$0xff] }
 0x3c2   :  { %3405 = vmatpush1.bf16.msra.mxu0 %v3404_v52  ;;  %3501 = vmatpush3.bf16.msra.mxu1 %v3500_v56  ;;  %v1771_v52 = vld [vmem:[%s4969_s4 + $0x18] sm:$0xff]  ;;  %v1439_v56 = vld [vmem:[#allocation7 + $0x4e8] sm:$0xff]  ;;  %v1824_v32 = vld [vmem:[%s4969_s4 + $0x1c0] sm:$0xff] }
 0x3c3   :  { %3407 = vmatprep.subr.bf16.mxu0 %v3406_v3  ;;  %3503 = vmatprep.subr.bf16.mxu1 %v3502_v6  ;;  %v1788_v3 = vld [vmem:[%s4969_s4 + $0xa0] sm:$0xff]  ;;  %v3424_v6 = vpack.c.bf16 %v1435_v41, %v1432_v37  ;;  %v3520_v14 = vpack.c.bf16 %v1771_v52, %v1770_v48  ;;  %v3426_v30 = vpack.c.bf16 %v1442_v0, %v1439_v56  ;;  %v1469_v0 = vld [vmem:[#allocation7 + $0x5d8] sm:$0xff]  ;;  %v1825_v31 = vld [vmem:[%s4969_s4 + $0x1c8] sm:$0xff] }
 0x3c4   :  { %v3522_v33 = vpack.c.bf16 %v1789_v62, %v1788_v3  ;;  %v3536_v37 = vpack.c.bf16 %v1779_v10, %v1778_v1  ;;  %v1462_v41 = vld [vmem:[#allocation7 + $0x5a0] sm:$0xff]  ;;  %v3442_v48 = vpack.c.bf16 %v1466_v54, %v1463_v13  ;;  %v1472_v3 = vld [vmem:[#allocation7 + $0x5f0] sm:$0xff]  ;;  %v1811_v10 = vld [vmem:[%s4969_s4 + $0x158] sm:$0xff] }
 0x3c5   :  { %v1780_v56 = vld [vmem:[%s4969_s4 + $0x60] sm:$0xff]  ;;  %v1798_v62 = vld [vmem:[%s4969_s4 + $0xf0] sm:$0xff]  ;;  %v1829_v54 = vld [vmem:[%s4969_s4 + $0x1e8] sm:$0xff] }
 0x3c6   :  { %3409 = vmatpush1.bf16.msra.mxu0 %v3408_v9  ;;  %3505 = vmatpush3.bf16.msra.mxu1 %v3504_v23  ;;  %v1773_v9 = vld [vmem:[%s4969_s4 + $0x28] sm:$0xff]  ;;  %v1445_v23 = vld [vmem:[#allocation7 + $0x518] sm:$0xff]  ;;  %v1810_v1 = vld [vmem:[%s4969_s4 + $0x150] sm:$0xff] }
 0x3c7   :  { %3411 = vmatprep.subr.bf16.mxu0 %v3410_v29  ;;  %3507 = vmatprep.subr.bf16.mxu1 %v3506_v15  ;;  %v3428_v29 = vpack.c.bf16 %v1441_v28, %v1438_v19  ;;  %v3524_v15 = vpack.c.bf16 %v1773_v9, %v1772_v44  ;;  %v3430_v5 = vpack.c.bf16 %v1448_v60, %v1445_v23  ;;  %v1468_v28 = vld [vmem:[#allocation7 + $0x5d0] sm:$0xff]  ;;  %v1471_v44 = vld [vmem:[#allocation7 + $0x5e8] sm:$0xff]  ;;  %v1783_v23 = vld [vmem:[%s4969_s4 + $0x78] sm:$0xff] }
 0x3c8   :  { %v1782_v9 = vld [vmem:[%s4969_s4 + $0x70] sm:$0xff]  ;;  %v1816_v60 = vld [vmem:[%s4969_s4 + $0x180] sm:$0xff] }
 0x3c9   :  { %v1828_v13 = vld [vmem:[%s4969_s4 + $0x1e0] sm:$0xff] }
 0x3ca   :  { %3413 = vmatpush1.bf16.msra.mxu0 %v3412_v46  ;;  %3509 = vmatpush3.bf16.msra.mxu1 %v3508_v45  ;;  %v1454_v46 = vld [vmem:[#allocation7 + $0x560] sm:$0xff] }
 0x3cb   :  { %3415 = vmatprep.subr.bf16.mxu0 %v3414_v21  ;;  %3511 = vmatprep.subr.bf16.mxu1 %v3510_v26  ;;  %v1792_v45 = vld [vmem:[%s4969_s4 + $0xc0] sm:$0xff]  ;;  %v3528_v21 = vpack.c.bf16 %v1775_v55, %v1774_v38  ;;  %v3434_v43 = vpack.c.bf16 %v1454_v46, %v1451_v61  ;;  %v3548_v38 = vpack.c.bf16 %v1801_v42, %v1800_v35  ;;  %v1802_v61 = vld [vmem:[%s4969_s4 + $0x110] sm:$0xff]  ;;  %v1803_v46 = vld [vmem:[%s4969_s4 + $0x118] sm:$0xff] }
 0x3cc   :  { %v1450_v26 = vld [vmem:[#allocation7 + $0x540] sm:$0xff]  ;;  %v3530_v11 = vpack.c.bf16 %v1793_v8, %v1792_v45  ;;  %v1821_v8 = vld [vmem:[%s4969_s4 + $0x1a8] sm:$0xff] }
 0x3cd   :  { %v3436_v39 = vpack.c.bf16 %v1453_v57, %v1450_v26  ;;  %v1820_v45 = vld [vmem:[%s4969_s4 + $0x1a0] sm:$0xff]  ;;  %v1805_v57 = vld [vmem:[%s4969_s4 + $0x128] sm:$0xff] }
 0x3ce   :  { %3417 = vmatpush1.bf16.msra.mxu0 %v3416_v51  ;;  %3513 = vmatpush3.bf16.msra.mxu1 %v3512_v2  ;;  %v1794_v51 = vld [vmem:[%s4969_s4 + $0xd0] sm:$0xff]  ;;  %v1795_v2 = vld [vmem:[%s4969_s4 + $0xd8] sm:$0xff]  ;;  %v1804_v26 = vld [vmem:[%s4969_s4 + $0x120] sm:$0xff] }
 0x3cf   :  { %3419 = vmatprep.subr.bf16.mxu0 %v3418_v18  ;;  %3515 = vmatprep.subr.bf16.mxu1 %v3514_v40  ;;  %v3532_v18 = vpack.c.bf16 %v1777_v59, %v1776_v7  ;;  %v1459_v40 = vld [vmem:[#allocation7 + $0x588] sm:$0xff]  ;;  %v3534_v53 = vpack.c.bf16 %v1795_v2, %v1794_v51  ;;  %v1806_v7 = vld [vmem:[%s4969_s4 + $0x130] sm:$0xff]  ;;  %v1807_v59 = vld [vmem:[%s4969_s4 + $0x138] sm:$0xff]  ;;  %v3562_v2 = vpack.c.bf16 %v1825_v31, %v1824_v32 }
 0x3d0   :  { %v3560_v51 = vpack.c.bf16 %v1807_v59, %v1806_v7  ;;  %v2061_v59 = vld [vmem:[%s4971_s6] sm:$0xff]  ;;  %v2064_v32 = vld [vmem:[%s4971_s6 + $0x18] sm:$0xff]  ;;  %v2063_v31 = vld [vmem:[%s4971_s6 + $0x10] sm:$0xff] }
 0x3d1   :  { %1763 = vmatmul.mubr.f32.vlgmr.msra.gmra.mrb[8].mxu1 %v4541_v47 }
 0x3d2   :  { %3421 = vmatpush1.bf16.msra.mxu0 %v3420_v25  ;;  %3517 = vmatpush3.bf16.msra.mxu1 %v3516_v34  ;;  %v1797_v25 = vld [vmem:[%s4969_s4 + $0xe8] sm:$0xff]  ;;  %v3440_v34 = vpack.c.bf16 %v1459_v40, %v1456_v58  ;;  %v1826_v58 = vld [vmem:[%s4969_s4 + $0x1d0] sm:$0xff]  ;;  %v1827_v40 = vld [vmem:[%s4969_s4 + $0x1d8] sm:$0xff] }
 0x3d3   :  { %1900 = vmatprep.mubr.f32.mxu1 %v4509_v16  ;;  %3423 = vmatprep.subr.bf16.mxu0 %v3422_v20  ;;  %v1791_v16 = vld [vmem:[%s4969_s4 + $0xb8] sm:$0xff]  ;;  %v3538_v52 = vpack.c.bf16 %v1797_v25, %v1796_v22  ;;  %v3568_v22 = vpack.c.bf16 %v1811_v10, %v1810_v1  ;;  %v3570_v25 = vpack.c.bf16 %v1829_v54, %v1828_v13  ;;  %v2249_v54 = vld [vmem:[%s4972_s7 + $0x100] sm:$0xff] }
 0x3d4   :  { %3519 = vmatprep.subr.bf16.mxu1 %v3518_v63  ;;  %v3526_v24 = vpack.c.bf16 %v1791_v16, %v1790_v17  ;;  %v1465_v20 = vld [vmem:[#allocation7 + $0x5b8] sm:$0xff]  ;;  %v1781_v63 = vld [vmem:[%s4969_s4 + $0x68] sm:$0xff]  ;;  %v3448_v16 = vpack.c.bf16 %v1471_v44, %v1468_v28 }
 0x3d5   :  { %v3540_v19 = vpack.c.bf16 %v1781_v63, %v1780_v56  ;;  %v1817_v17 = vld [vmem:[%s4969_s4 + $0x188] sm:$0xff]  ;;  %v1814_v56 = vld [vmem:[%s4969_s4 + $0x170] sm:$0xff]  ;;  %v1815_v63 = vld [vmem:[%s4969_s4 + $0x178] sm:$0xff] }
 0x3d6   :  { %3425 = vmatpush1.bf16.msra.mxu0 %v3424_v6  ;;  %3521 = vmatpush3.bf16.msra.mxu1 %v3520_v14  ;;  %v1799_v6 = vld [vmem:[%s4969_s4 + $0xf8] sm:$0xff]  ;;  %v3444_v14 = vpack.c.bf16 %v1465_v20, %v1462_v41  ;;  %v1830_v41 = vld [vmem:[%s4969_s4 + $0x1f0] sm:$0xff] }
 0x3d7   :  { %3427 = vmatprep.subr.bf16.mxu0 %v3426_v30  ;;  %3523 = vmatprep.subr.bf16.mxu1 %v3522_v33  ;;  %v3446_v30 = vpack.c.bf16 %v1472_v3, %v1469_v0  ;;  %v3542_v33 = vpack.c.bf16 %v1799_v6, %v1798_v62  ;;  %v1831_v20 = vld [vmem:[%s4969_s4 + $0x1f8] sm:$0xff]  ;;  %v3576_v0 = vpack.c.bf16 %v1815_v63, %v1814_v56  ;;  %v2251_v56 = vld [vmem:[%s4972_s7 + $0x110] sm:$0xff] }
 0x3da   :  { %3429 = vmatpush1.bf16.msra.mxu0 %v3428_v29  ;;  %3525 = vmatpush3.bf16.msra.mxu1 %v3524_v15  ;;  %v3544_v29 = vpack.c.bf16 %v1783_v23, %v1782_v9  ;;  %v3546_v15 = vpack.c.bf16 %v1817_v17, %v1816_v60 }
 0x3db   :  { %3431 = vmatprep.subr.bf16.mxu0 %v3430_v5  ;;  %3527 = vmatprep.subr.bf16.mxu1 %v3526_v24  ;;  %v1818_v5 = vld [vmem:[%s4969_s4 + $0x190] sm:$0xff]  ;;  %v1819_v24 = vld [vmem:[%s4969_s4 + $0x198] sm:$0xff] }
 0x3dc   :  { %v3550_v55 = vpack.c.bf16 %v1819_v24, %v1818_v5 }
 0x3de   :  { %3433 = vmatpush1.bf16.msra.mxu0 %v3432_v49  ;;  %3529 = vmatpush3.bf16.msra.mxu1 %v3528_v21  ;;  %v3552_v49 = vpack.c.bf16 %v1803_v46, %v1802_v61  ;;  %v3554_v21 = vpack.c.bf16 %v1821_v8, %v1820_v45  ;;  %v1983_v46 = vld [vmem:[%s4970_s5] sm:$0xff]  ;;  %v1984_v45 = vld [vmem:[%s4970_s5 + $0x8] sm:$0xff]  ;;  %v3798_v8 = vmov 0.0|0.0  }
 0x3df   :  { %3435 = vmatprep.subr.bf16.mxu0 %v3434_v43  ;;  %3531 = vmatprep.subr.bf16.mxu1 %v3530_v11  ;;  %v1822_v43 = vld [vmem:[%s4969_s4 + $0x1b0] sm:$0xff] }
 0x3e2   :  { %3437 = vmatpush1.bf16.msra.mxu0 %v3436_v39  ;;  %3533 = vmatpush3.bf16.msra.mxu1 %v3532_v18  ;;  %v1808_v39 = vld [vmem:[%s4969_s4 + $0x140] sm:$0xff]  ;;  %v1809_v18 = vld [vmem:[%s4969_s4 + $0x148] sm:$0xff] }
 0x3e3   :  { %3439 = vmatprep.subr.bf16.mxu0 %v3438_v50  ;;  %3535 = vmatprep.subr.bf16.mxu1 %v3534_v53  ;;  %v3564_v50 = vpack.c.bf16 %v1809_v18, %v1808_v39  ;;  %v3566_v53 = vpack.c.bf16 %v1827_v40, %v1826_v58  ;;  %v2068_v18 = vld [vmem:[%s4971_s6 + $0x38] sm:$0xff]  ;;  %v2067_v58 = vld [vmem:[%s4971_s6 + $0x30] sm:$0xff]  ;;  %v2069_v40 = vld [vmem:[%s4971_s6 + $0x40] sm:$0xff] }
 0x3e6   :  { %3441 = vmatpush1.bf16.msra.mxu0 %v3440_v34  ;;  %3537 = vmatpush3.bf16.msra.mxu1 %v3536_v37  ;;  %v1812_v34 = vld [vmem:[%s4969_s4 + $0x160] sm:$0xff]  ;;  %v1813_v37 = vld [vmem:[%s4969_s4 + $0x168] sm:$0xff] }
 0x3e7   :  { %3443 = vmatprep.subr.bf16.mxu0 %v3442_v48  ;;  %3539 = vmatprep.subr.bf16.mxu1 %v3538_v52  ;;  %v3572_v48 = vpack.c.bf16 %v1813_v37, %v1812_v34  ;;  %v3574_v52 = vpack.c.bf16 %v1831_v20, %v1830_v41  ;;  %v2218_v34 = vld [vmem:[%s4972_s7 + $0x8] sm:$0xff]  ;;  %v2235_v37 = vld [vmem:[%s4972_s7 + $0x90] sm:$0xff]  ;;  %v2236_v41 = vld [vmem:[%s4972_s7 + $0x98] sm:$0xff] }
 0x3ea   :  { %3445 = vmatpush1.bf16.msra.mxu0 %v3444_v14  ;;  %3541 = vmatpush3.bf16.msra.mxu1 %v3540_v19  ;;  %v4724_v14 = vsub.s32 3, %v5218_v12  ;;  %v3694_v19 = vld [vmem:[%s4973_s8 + $0x10] sm:$0x3f] }
 0x3eb   :  { %3447 = vmatprep.subr.bf16.mxu0 %v3446_v30  ;;  %3543 = vmatprep.subr.bf16.mxu1 %v3542_v33 }
 0x3ec   :  { %v1485_v28 = vrot.slane %v3694_v19, %v4724_v14  ;;  %v2237_v19 = vld [vmem:[%s4972_s7 + $0xa0] sm:$0xff] }
 0x3ee   :  { %3449 = vmatpush1.bf16.msra.mxu0 %v3448_v16  ;;  %3545 = vmatpush3.bf16.msra.mxu1 %v3544_v29 }
 0x3ef   :  { %3547 = vmatprep.subr.bf16.mxu1 %v3546_v15  ;;  %v1834_v15 = vsub.s32 4, %v5218_v12  ;;  %3578 = vmatprep.subr.bf16.mxu0 %v3798_v8 }
 0x3f1   :  { %1622 = vmatmul.mubr.f32.vlgmr.msra.gmra.mrb[6].mxu0 %v4541_v47  ;;  %1901 = vmatmul.mubr.f32.vlgmr.msra.gmra.mrb[10].mxu1 %v4511_v4  ;;  %v1823_v4 = vld [vmem:[%s4969_s4 + $0x1b8] sm:$0xff]  ;;  %v1835_v35 = vrot.slane %v4488_v27, %v1834_v15  ;;  %v3579_v27 = vpack.c.bf16 %v1984_v45, %v1983_v46  ;;  %v2239_v15 = vld [vmem:[%s4972_s7 + $0xb0] sm:$0xff]  ;;  %v2241_v45 = vld [vmem:[%s4972_s7 + $0xc0] sm:$0xff] }
 0x3f2   :  { %3549 = vmatpush3.bf16.msra.mxu1 %v3548_v38  ;;  %1970 = vmatprep.mubr.f32.mxu1 %v4517_v36  ;;  %v3556_v36 = vpack.c.bf16 %v1805_v57, %v1804_v26  ;;  %v3558_v11 = vpack.c.bf16 %v1823_v4, %v1822_v43  ;;  %v2224_v46 = vld [vmem:[%s4972_s7 + $0x38] sm:$0xff] }
 0x3f3   :  { %3551 = vmatprep.subr.bf16.mxu1 %v3550_v55  ;;  %3580 = vmatpush3.bf16.msra.mxu0 %v3579_v27  ;;  %v2242_v27 = vld [vmem:[%s4972_s7 + $0xc8] sm:$0xff] }
 0x3f6   :  { %3553 = vmatpush3.bf16.msra.mxu1 %v3552_v49  ;;  %v3800_v49 = vmov 0.0  }
 0x3f7   :  { %3555 = vmatprep.subr.bf16.mxu1 %v3554_v21  ;;  %2635 = vmatprep.mubr.msk.f32.mxu0 %vm3799_vm1, %v3800_v49  ;;  %v1985_v21 = vld [vmem:[%s4970_s5 + $0x10] sm:$0xff] }
 0x3f8   :  { %2633 = vmatprep.subr.mxu0 %v3800_v49 }
 0x3f9   :  { %2634 = vmatpush3.msra.mxu0 %v1985_v21 }
 0x3fa   :  { %3557 = vmatpush3.bf16.msra.mxu1 %v3556_v36  ;;  %3585 = vmatprep.subr.bf16.mxu0 %v3798_v8  ;;  %v2062_v36 = vld [vmem:[%s4971_s6 + $0x8] sm:$0xff] }
 0x3fb   :  { %3559 = vmatprep.subr.bf16.mxu1 %v3558_v11  ;;  %v2065_v11 = vld [vmem:[%s4971_s6 + $0x20] sm:$0xff] }
 0x3fc   :  { %v3581_v7 = vpack.c.bf16 %v2065_v11, %v2062_v36  ;;  %v2226_v36 = vld [vmem:[%s4972_s7 + $0x48] sm:$0xff]  ;;  %v2243_v11 = vld [vmem:[%s4972_s7 + $0xd0] sm:$0xff] }
 0x3fe   :  { %3561 = vmatpush3.bf16.msra.mxu1 %v3560_v51  ;;  %v3583_v51 = vpack.c.bf16 %v2064_v32, %v2061_v59 }
 0x3ff   :  { %3563 = vmatprep.subr.bf16.mxu1 %v3562_v2  ;;  %v2066_v2 = vld [vmem:[%s4971_s6 + $0x28] sm:$0xff] }
 0x400   :  { %v3586_v39 = vpack.c.bf16 %v2066_v2, %v2063_v31  ;;  %v2259_v31 = vld [vmem:[%s4972_s7 + $0x150] sm:$0xff] }
 0x402   :  { %3565 = vmatpush3.bf16.msra.mxu1 %v3564_v50  ;;  %v2233_v50 = vld [vmem:[%s4972_s7 + $0x80] sm:$0xff] }
 0x403   :  { %3567 = vmatprep.subr.bf16.mxu1 %v3566_v53  ;;  %v2234_v53 = vld [vmem:[%s4972_s7 + $0x88] sm:$0xff] }
 0x404   :  { %v3588_v1 = vpack.c.bf16 %v2234_v53, %v2233_v50 }
 0x406   :  { %3569 = vmatpush3.bf16.msra.mxu1 %v3568_v22  ;;  %v2250_v22 = vld [vmem:[%s4972_s7 + $0x108] sm:$0xff] }
 0x407   :  { %3571 = vmatprep.subr.bf16.mxu1 %v3570_v25  ;;  %v2217_v25 = vld [vmem:[%s4972_s7] sm:$0xff] }
 0x40a   :  { %3573 = vmatpush3.bf16.msra.mxu1 %v3572_v48  ;;  %v3621_v48 = vpack.c.bf16 %v2250_v22, %v2249_v54  ;;  %v2229_v54 = vld [vmem:[%s4972_s7 + $0x60] sm:$0xff]  ;;  %v2230_v22 = vld [vmem:[%s4972_s7 + $0x68] sm:$0xff] }
 0x40b   :  { %3575 = vmatprep.subr.bf16.mxu1 %v3574_v52  ;;  %v3590_v52 = vpack.c.bf16 %v2218_v34, %v2217_v25  ;;  %v3614_v34 = vpack.c.bf16 %v2230_v22, %v2229_v54 }
 0x40e   :  { %3577 = vmatpush3.bf16.msra.mxu1 %v3576_v0  ;;  %v2252_v0 = vld [vmem:[%s4972_s7 + $0x118] sm:$0xff] }
 0x40f   :  { %3582 = vmatprep.subr.bf16.mxu1 %v3581_v7  ;;  %v2244_v7 = vld [vmem:[%s4972_s7 + $0xd8] sm:$0xff] }
 0x410   :  { %v3608_v2 = vpack.c.bf16 %v2244_v7, %v2243_v11 }
 0x411   :  { %1971 = vmatmul.mubr.f32.vlgmr.msra.gmra.mrb[12].mxu1 %v4541_v47 }
 0x412   :  { %2137 = vmatprep.mubr.f32.mxu1 %v3800_v49  ;;  %3584 = vmatpush1.bf16.msra.mxu1 %v3583_v51  ;;  %v2260_v51 = vld [vmem:[%s4972_s7 + $0x158] sm:$0xff] }
 0x413   :  { %2077 = vmatprep.subr.mxu1 %v2068_v18  ;;  %v2228_v18 = vld [vmem:[%s4972_s7 + $0x58] sm:$0xff]  ;;  %v3636_v50 = vpack.c.bf16 %v2260_v51, %v2259_v31 }
 0x416   :  { %2078 = vmatpush1.msra.mxu1 %v2067_v58  ;;  %v2245_v58 = vld [vmem:[%s4972_s7 + $0xe0] sm:$0xff] }
 0x417   :  { %3589 = vmatprep.subr.bf16.mxu1 %v3588_v1  ;;  %v2261_v1 = vld [vmem:[%s4972_s7 + $0x160] sm:$0xff] }
 0x484   :  { %v2461_v3 = vpop.f32.mrb[6].mxu1 }
 0x485   :  { %v2462_v62 = vpop.f32.mrb[7].mxu1 }
 0x486   :  { %v2463_v6 = vadd.f32 %v2462_v62, %v2461_v3  ;;  %v3592_v3 = vpack.c.bf16 %v2236_v41, %v2235_v37  ;;  %v2219_v62 = vld [vmem:[%s4972_s7 + $0x10] sm:$0xff]  ;;  %v2264_v41 = vld [vmem:[%s4972_s7 + $0x178] sm:$0xff] }
 0x487   :  { %v2263_v37 = vld [vmem:[%s4972_s7 + $0x170] sm:$0xff] }
 0x488   :  { %v1695_v44 = vadd.f32 %v2463_v6, %v1485_v28  ;;  %v2220_v6 = vld [vmem:[%s4972_s7 + $0x18] sm:$0xff]  ;;  %v2238_v28 = vld [vmem:[%s4972_s7 + $0xa8] sm:$0xff] }
 0x4a4   :  { %v2496_v30 = vpop.f32.mrb[8].mxu1 }
 0x4a5   :  { %v2497_v33 = vpop.f32.mrb[9].mxu1 }
 0x4a6   :  { %v2498_v9 = vadd.f32 %v2497_v33, %v2496_v30  ;;  %v3624_v30 = vpack.c.bf16 %v2252_v0, %v2251_v56  ;;  %v3594_v33 = vpack.c.bf16 %v2220_v6, %v2219_v62  ;;  %v3696_v6 = vld [vmem:[%s4973_s8 + $0x8] sm:$0x3f] }
 0x4a8   :  { %v4730_v23 = vadd.f32 %v2498_v9, %v1695_v44  ;;  %v2253_v44 = vld [vmem:[%s4972_s7 + $0x120] sm:$0xff]  ;;  %v2254_v9 = vld [vmem:[%s4972_s7 + $0x128] sm:$0xff] }
 0x4c4   :  { %v4732_v60 = vpop.f32.mrb[6].mxu0  ;;  %v2531_v47 = vpop.f32.mrb[10].mxu1 }
 0x4c5   :  { %v4734_v17 = vpop.f32.mrb[7].mxu0  ;;  %v2532_v16 = vpop.f32.mrb[11].mxu1 }
 0x4c6   :  { %v2533_v29 = vadd.f32 %v2532_v16, %v2531_v47  ;;  %v3596_v47 = vpack.c.bf16 %v2238_v28, %v2237_v19  ;;  %v2221_v16 = vld [vmem:[%s4972_s7 + $0x20] sm:$0xff]  ;;  %v1481_v19 = vrot.slane %v3696_v6, %v4724_v14 }
 0x4c8   :  { %v1903_v24 = vadd.f32 %v2533_v29, %v1835_v35  ;;  %v2222_v29 = vld [vmem:[%s4972_s7 + $0x28] sm:$0xff]  ;;  %v2240_v35 = vld [vmem:[%s4972_s7 + $0xb8] sm:$0xff] }
 0x4e4   :  { %v2566_v42 = vpop.f32.mrb[12].mxu1 }
 0x4e5   :  { %v2567_v5 = vpop.f32.mrb[13].mxu1 }
 0x4e6   :  { %v2568_v38 = vadd.f32 %v2567_v5, %v2566_v42  ;;  %v3627_v42 = vpack.c.bf16 %v2254_v9, %v2253_v44  ;;  %v3598_v5 = vpack.c.bf16 %v2222_v29, %v2221_v16 }
 0x4e8   :  { %v1973_v55 = vadd.f32 %v2568_v38, %v1903_v24  ;;  %v2255_v24 = vld [vmem:[%s4972_s7 + $0x130] sm:$0xff]  ;;  %v2256_v38 = vld [vmem:[%s4972_s7 + $0x138] sm:$0xff] }
 0x4ea   :  { %v1977_v61 = vsel %vm1976_vm0, %v1973_v55, -inf }
 0x4eb   :  { %1978 = vmax.xlane.f32.xlu0 %v1977_v61  ;;  %v2223_v61 = vld [vmem:[%s4972_s7 + $0x30] sm:$0xff] }
 0x4ec   :  { %v3602_v21 = vpack.c.bf16 %v2224_v46, %v2223_v61 }
 0x578   :  { %v1979_v26 = vpop.xlane.xlu0 %1978 }
 0x579   :  { %v1980_v57 = vsub.f32 %v1973_v55, %v1979_v26  ;;  %v3600_v55 = vpack.c.bf16 %v2240_v35, %v2239_v15  ;;  %v2257_v26 = vld [vmem:[%s4972_s7 + $0x140] sm:$0xff]  ;;  %v2267_v35 = vsub.s32 5, %v5218_v12 }
 0x57b   :  { %v1981_v43 = vmul.f32 1.442695, %v1980_v57  ;;  %v2258_v57 = vld [vmem:[%s4972_s7 + $0x148] sm:$0xff] }
 0x57c   :  { %v3633_v59 = vpack.c.bf16 %v2258_v57, %v2257_v26 }
 0x57d   :  { %3687 = vpow2.f32 %v1981_v43  ;;  %v3604_v43 = vpack.c.bf16 %v2242_v27, %v2241_v45 }
 0x587   :  { %v3688_v4 = vpop.eup %3687 }
 0x588   :  { %2636 = vmatmul.mubr.msk.f32.vlgmr.msra.gmra.mrb[8].mxu0 %vm1976_vm0, %v3688_v4 }
 0x589   :  { %2644 = vmatprep.mubr.msk.f32.mxu0 %vm3799_vm1, %v3800_v49  ;;  %3587 = vmatpush3.bf16.msra.mxu0 %v3586_v39  ;;  %v2227_v39 = vld [vmem:[%s4972_s7 + $0x50] sm:$0xff] }
 0x58a   :  { %2642 = vmatprep.subr.mxu0 %v3800_v49  ;;  %v3610_v53 = vpack.c.bf16 %v2228_v18, %v2227_v39 }
 0x58d   :  { %2643 = vmatpush3.msra.mxu0 %v2069_v40  ;;  %v2246_v40 = vld [vmem:[%s4972_s7 + $0xe8] sm:$0xff] }
 0x58e   :  { %3620 = vmatprep.subr.bf16.mxu0 %v3798_v8 }
 0x65b   :  { %v2055_v10 = vpop.f32.mrb[8].mxu0 }
 0x65c   :  { %3689 = vrcp.f32 %v2055_v10  ;;  %v2637_v13 = vpop.f32.mrb[9].mxu0  ;;  %v2262_v10 = vld [vmem:[%s4972_s7 + $0x168] sm:$0xff] }
 0x65d   :  { %v3612_v13 = vpack.c.bf16 %v2246_v40, %v2245_v58  ;;  %v3639_v25 = vpack.c.bf16 %v2262_v10, %v2261_v1 }
 0x666   :  { %v3690_v20 = vpop.eup %3689 }
 0x667   :  { %v2060_v63 = vmul.f32 %v3690_v20, %v3688_v4  ;;  %v2225_v4 = vld [vmem:[%s4972_s7 + $0x40] sm:$0xff]  ;;  %v3642_v20 = vpack.c.bf16 %v2264_v41, %v2263_v37 }
 0x668   :  { %v3606_v32 = vpack.c.bf16 %v2226_v36, %v2225_v4 }
 0x669   :  { %2427 = vmatmul.mubr.msk.f32.vlgmr.msra.gmra.mrb[14].mxu1 %vm1976_vm0, %v2060_v63  ;;  %2645 = vmatmul.mubr.msk.f32.vlgmr.msra.gmra.mrb[10].mxu0 %vm1976_vm0, %v2060_v63  ;;  %v2232_v63 = vld [vmem:[%s4972_s7 + $0x78] sm:$0xff] }
 0x66a   :  { %3622 = vmatpush3.bf16.msra.mxu0 %v3621_v48  ;;  %3591 = vmatpush3.bf16.msra.mxu1 %v3590_v52  ;;  %v2247_v48 = vld [vmem:[%s4972_s7 + $0xf0] sm:$0xff]  ;;  %v2248_v52 = vld [vmem:[%s4972_s7 + $0xf8] sm:$0xff] }
 0x66b   :  { %3623 = vmatprep.subr.bf16.mxu0 %v3798_v8  ;;  %3593 = vmatprep.subr.bf16.mxu1 %v3592_v3  ;;  %v3616_v56 = vpack.c.bf16 %v2248_v52, %v2247_v48  ;;  %v3695_v3 = vld [vmem:[%s4973_s8] sm:$0x3f] }
 0x66c   :  { %2679 = vmatprep.mubr.msk.f32.mxu0 %vm3799_vm1, %v3800_v49  ;;  %v3630_v49 = vpack.c.bf16 %v2256_v38, %v2255_v24  ;;  %v1477_v62 = vrot.slane %v3695_v3, %v4724_v14  ;;  %v2268_v24 = vrot.slane %v3695_v3, %v2267_v35 }
 0x66e   :  { %3625 = vmatpush3.bf16.msra.mxu0 %v3624_v30  ;;  %3595 = vmatpush3.bf16.msra.mxu1 %v3594_v33  ;;  %v3648_v28 = vadd.f32 %v4732_v60, %v1477_v62  ;;  %v3649_v30 = vadd.f32 %v4734_v17, %v1481_v19 }
 0x66f   :  { %3626 = vmatprep.subr.bf16.mxu0 %v3798_v8  ;;  %3597 = vmatprep.subr.bf16.mxu1 %v3596_v47 }
 0x672   :  { %3628 = vmatpush3.bf16.msra.mxu0 %v3627_v42  ;;  %3599 = vmatpush3.bf16.msra.mxu1 %v3598_v5 }
 0x673   :  { %3629 = vmatprep.subr.bf16.mxu0 %v3798_v8  ;;  %3601 = vmatprep.subr.bf16.mxu1 %v3600_v55 }
 0x676   :  { %3631 = vmatpush3.bf16.msra.mxu0 %v3630_v49  ;;  %3603 = vmatpush3.bf16.msra.mxu1 %v3602_v21 }
 0x677   :  { %3632 = vmatprep.subr.bf16.mxu0 %v3798_v8  ;;  %3605 = vmatprep.subr.bf16.mxu1 %v3604_v43 }
 0x67a   :  { %3634 = vmatpush3.bf16.msra.mxu0 %v3633_v59  ;;  %3607 = vmatpush3.bf16.msra.mxu1 %v3606_v32 }
 0x67b   :  { %3635 = vmatprep.subr.bf16.mxu0 %v3798_v8  ;;  %3609 = vmatprep.subr.bf16.mxu1 %v3608_v2 }
 0x67e   :  { %3637 = vmatpush3.bf16.msra.mxu0 %v3636_v50  ;;  %3611 = vmatpush3.bf16.msra.mxu1 %v3610_v53 }
 0x67f   :  { %3638 = vmatprep.subr.bf16.mxu0 %v3798_v8  ;;  %3613 = vmatprep.subr.bf16.mxu1 %v3612_v13 }
 0x682   :  { %3640 = vmatpush3.bf16.msra.mxu0 %v3639_v25  ;;  %3615 = vmatpush3.bf16.msra.mxu1 %v3614_v34 }
 0x683   :  { %3641 = vmatprep.subr.bf16.mxu0 %v3798_v8  ;;  %v2231_v8 = vld [vmem:[%s4972_s7 + $0x70] sm:$0xff]  ;;  %3617 = vmatprep.subr.bf16.mxu1 %v3616_v56  ;;  %s3801_s7 = smov [#allocation8]  }
 0x684   :  { %v3618_v0 = vpack.c.bf16 %v2232_v63, %v2231_v8  ;;  %s2416_s8 = sshll.u32 %s3801_s7, 4  ;;  %s2417_s8 = int_to_ptr.vmem [resolvable:$true] %s2416_s8 }
 0x685   :  { %s3763_s13 = scalar_lea.vmem %s2417_s8, 128  ;;  %p3768_p11 = scmp.lt.s32.totalorder %s2417_s8, %s2417_s8 }
 0x686   :  { %3643 = vmatpush3.bf16.msra.mxu0 %v3642_v20  ;;  %3619 = vmatpush3.bf16.msra.mxu1 %v3618_v0  ;;  %p3764_p10 = scmp.ne.s32.totalorder %s2417_s8, %s3763_s13  ;;  %p3769_p12 = scmp.lt.s32.totalorder %s3763_s13, %s3763_s13 }
 0x688   :  { %p3770_p13 = por %p3769_p12, %p3768_p11 }
 0x68a   :  { %p3771_p0 = pnand %p3770_p13, %p3764_p10 }
 0x73c   :  { %v2139_v33 = vpop.f32.mrb[14].mxu1  ;;  %v2210_v44 = vpop.f32.mrb[10].mxu0 }
 0x73d   :  { %v2214_v9 = vmul.f32 %v3648_v28, %v2139_v33  ;;  %v2216_v47 = vmul.f32 %v2210_v44, %v4730_v23  ;;  %v2141_v16 = vpop.f32.mrb[15].mxu1  ;;  %v2646_v29 = vpop.f32.mrb[11].mxu0 }
 0x73e   :  { %v2215_v15 = vmul.f32 %v3649_v30, %v2141_v16 }
 0x73f   :  { %2680 = vmatmul.mubr.f32.vlgmr.msra.gmra.mrb[12].mxu0 %v2216_v47 }
 0x740   :  { %2333 = vmatprep.mubr.f32.mxu1 %v2215_v15 }
 0x741   :  { %2334 = vmatmul.mubr.f32.vlgmr.msra.gmra.mrb[16].mxu1 %v2214_v9 }
 0x812   :  { %v2405_v42 = vpop.f32.mrb[12].mxu0 }
 0x813   :  { %v2681_v5 = vpop.f32.mrb[13].mxu0 }
 0x814   :  { %v2609_v14 = vpop.f32.mrb[16].mxu1 }
 0x815   :  { %v2610_v60 = vpop.f32.mrb[17].mxu1 }
 0x816   :  { %v2611_v38 = vadd.f32 %v2610_v60, %v2609_v14 }
 0x818   :  { %v2336_v17 = vadd.f32 %v2611_v38, %v2268_v24 }
 0x81a   :  { %v2406_v55 = vadd.f32 %v2405_v42, %v2336_v17 }
 0x81c   :  { %2409 = vst [vmem:[#allocation8] sm:$0xff] %v2406_v55 }
 0x81d   :  { %3774 = shalt.err (!%p3771_p0)
}
 0x81e   :  { %s3775_s14 = scalar_lea.hbm %s4974_s9, 128 }
 0x81f   :  { %p3776_p1 = scmp.ne.s32.totalorder %s4974_s9, %s3775_s14  ;;  %p3779_p2 = scmp.lt.u32.totalorder %s3775_s14, %s4974_s9 }
 0x821   :  { %p3781_p3 = pnand %p3779_p2, %p3776_p1 }
 0x823   :  { %3784 = shalt.err (!%p3781_p3)
}
 0x824   :  { %2419 = dma.vmem_to_hbm [thread:$0]  %s2417_s8, 128, %s4974_s9, [#allocation4]  }
 0x825   :  { %3789 = dma.done.wait [#allocation4], 128  }
 0x826   :  { %3790 = vsyncadd [#allocation4], 4294967168 }
 0x827   :  { %2423 = vsyncpa [#allocation3], 1 }
 0x828   :  { %2424 = vsyncpa [#allocation6], 1 }
 0x829   :  { %2425 = vsyncpa [#allocation4], 1 }

</bundles_post_ra>
